<compile_context>
chip_gen: v7x
topology: tpu7x:2x2x1
jax: 0.10.0
libtpu: 0.0.40
codegen_flags: <defaults>
</compile_context>

<pallas_src>
import functools

import jax
import jax.numpy as jnp
from jax import lax
from jax.experimental import pallas as pl
from jax.experimental.pallas import tpu as pltpu


def _round_up(x, m):
    return (x + m - 1) // m * m


# ---------------------------------------------------------------------------
# Pallas kernels
# ---------------------------------------------------------------------------
def _run_recurrence(gx_ref, whh, T, Bp, Hp, out_ref=None):
    """Serial LSTM recurrence over T steps.

    gx_ref : (T, Bp, 4Hp) VMEM scratch holding precomputed x@W_ih + b for every t.
    whh    : (Hp, 4Hp) bf16 value (hidden->gates, pre-transposed).
    out_ref: optional (T, Bp, Hp) output ref; if given, h_t is stored per step.
    Returns (h_T, c_T).
    """

    def step(t, carry):
        h_prev, c_prev = carry
        # Only the hidden projection is on the serial critical path.
        gates = gx_ref[t] + jnp.dot(
            h_prev.astype(whh.dtype), whh, preferred_element_type=jnp.float32
        )  # (Bp, 4Hp), gate order i, f, g, o — each slice is 128-lane aligned.
        i_g = jax.nn.sigmoid(gates[:, 0 * Hp:1 * Hp])
        f_g = jax.nn.sigmoid(gates[:, 1 * Hp:2 * Hp])
        g_g = jnp.tanh(gates[:, 2 * Hp:3 * Hp])
        o_g = jax.nn.sigmoid(gates[:, 3 * Hp:4 * Hp])
        c_new = f_g * c_prev + i_g * g_g
        h_new = o_g * jnp.tanh(c_new)
        if out_ref is not None:
            out_ref[t] = h_new.astype(out_ref.dtype)
        return h_new, c_new

    h0 = jnp.zeros((Bp, Hp), jnp.float32)
    c0 = jnp.zeros((Bp, Hp), jnp.float32)
    unroll = True if T <= 16 else 4
    return lax.fori_loop(0, T, step, (h0, c0), unroll=unroll)


def lstm_seq_kernel(x_ref, wih_ref, whh_ref, b_ref, out_ref, gx_ref):
    """One (non-final) LSTM layer; writes the full hidden sequence.

    x_ref  : (T, Bp, Dp)   bf16 layer input
    wih_ref: (Dp, 4Hp)     bf16 (pre-transposed input->gates)
    whh_ref: (Hp, 4Hp)     bf16 (pre-transposed hidden->gates)
    b_ref  : (1, 4Hp)      f32  (b_ih + b_hh, gate-block padded)
    out_ref: (T, Bp, Hp)   bf16 hidden sequence
    gx_ref : (T, Bp, 4Hp)  f32  scratch (hoisted input projection)
    """
    T, Bp, Dp = x_ref.shape
    Hp = whh_ref.shape[0]
    # Hoisted input projection for all timesteps: one large MXU-friendly matmul.
    x_all = x_ref[...].reshape(T * Bp, Dp)
    gx = jnp.dot(x_all, wih_ref[...], preferred_element_type=jnp.float32) + b_ref[...]
    gx_ref[...] = gx.reshape(T, Bp, 4 * Hp)
    _run_recurrence(gx_ref, whh_ref[...], T, Bp, Hp, out_ref=out_ref)


def lstm_last_fc_kernel(x_ref, wih_ref, whh_ref, b_ref, wfc_ref, bfc_ref,
                        out_ref, gx_ref):
    """Final LSTM layer fused with the Linear head: out = h_{T-1} @ W_fc + b_fc.

    Only (Bp, Op) is written to HBM (no (T,B,H) writeback for the last layer).
    """
    T, Bp, Dp = x_ref.shape
    Hp = whh_ref.shape[0]
    x_all = x_ref[...].reshape(T * Bp, Dp)
    gx = jnp.dot(x_all, wih_ref[...], preferred_element_type=jnp.float32) + b_ref[...]
    gx_ref[...] = gx.reshape(T, Bp, 4 * Hp)
    h_last, _ = _run_recurrence(gx_ref, whh_ref[...], T, Bp, Hp, out_ref=None)
    out_ref[...] = (
        jnp.dot(h_last.astype(wfc_ref.dtype), wfc_ref[...],
                preferred_element_type=jnp.float32)
        + bfc_ref[...]
    ).astype(out_ref.dtype)


# ---------------------------------------------------------------------------
# pallas_call wrappers
# ---------------------------------------------------------------------------
def _lstm_layer_seq(x_tbd, wih_t, whh_t, b):
    """x_tbd: (T, Bp, Dp) bf16 -> (T, Bp, Hp) bf16 hidden sequence."""
    T, Bp, Dp = x_tbd.shape
    Hp = whh_t.shape[0]
    return pl.pallas_call(
        lstm_seq_kernel,
        out_shape=jax.ShapeDtypeStruct((T, Bp, Hp), jnp.bfloat16),
        grid=(1,),
        in_specs=[
            pl.BlockSpec((T, Bp, Dp), lambda i: (0, 0, 0)),
            pl.BlockSpec((Dp, 4 * Hp), lambda i: (0, 0)),
            pl.BlockSpec((Hp, 4 * Hp), lambda i: (0, 0)),
            pl.BlockSpec((1, 4 * Hp), lambda i: (0, 0)),
        ],
        out_specs=pl.BlockSpec((T, Bp, Hp), lambda i: (0, 0, 0)),
        scratch_shapes=[pltpu.VMEM((T, Bp, 4 * Hp), jnp.float32)],
        compiler_params=pltpu.CompilerParams(
            dimension_semantics=("arbitrary",),
        ),
    )(x_tbd, wih_t, whh_t, b)


def _lstm_last_fc(x_tbd, wih_t, whh_t, b, wfc_t, bfc):
    """Final LSTM layer + fused Linear: (T, Bp, Dp) -> (Bp, Op)."""
    T, Bp, Dp = x_tbd.shape
    Hp = whh_t.shape[0]
    Op = wfc_t.shape[1]
    return pl.pallas_call(
        lstm_last_fc_kernel,
        out_shape=jax.ShapeDtypeStruct((Bp, Op), jnp.float32),
        grid=(1,),
        in_specs=[
            pl.BlockSpec((T, Bp, Dp), lambda i: (0, 0, 0)),
            pl.BlockSpec((Dp, 4 * Hp), lambda i: (0, 0)),
            pl.BlockSpec((Hp, 4 * Hp), lambda i: (0, 0)),
            pl.BlockSpec((1, 4 * Hp), lambda i: (0, 0)),
            pl.BlockSpec((Hp, Op), lambda i: (0, 0)),
            pl.BlockSpec((1, Op), lambda i: (0, 0)),
        ],
        out_specs=pl.BlockSpec((Bp, Op), lambda i: (0, 0)),
        scratch_shapes=[pltpu.VMEM((T, Bp, 4 * Hp), jnp.float32)],
        compiler_params=pltpu.CompilerParams(
            dimension_semantics=("arbitrary",),
        ),
    )(x_tbd, wih_t, whh_t, b, wfc_t, bfc)


# ---------------------------------------------------------------------------
# Parameter preparation (host side: pre-transpose, lane-pad, bf16-cast)
# ---------------------------------------------------------------------------
def _pack_gate_columns(w_t, H, Hp):
    """(rows, 4H) -> (rows, 4Hp), gate g placed at columns [g*Hp, g*Hp+H), zeros elsewhere."""
    if Hp == H:
        return w_t
    rows = w_t.shape[0]
    out = jnp.zeros((rows, 4 * Hp), w_t.dtype)
    for g in range(4):
        out = out.at[:, g * Hp:g * Hp + H].set(w_t[:, g * H:(g + 1) * H])
    return out


def prepare_params(params, input_size, hidden_size, num_layers, output_size):
    """Convert PyTorch-layout LSTM/Linear params to kernel layout once, on the host."""
    H, O = hidden_size, output_size
    Hp, Op = _round_up(H, 128), _round_up(O, 128)
    w_ih, w_hh, b = [], [], []
    for layer in range(num_layers):
        d_in = input_size if layer == 0 else hidden_size
        d_in_p = _round_up(input_size, 128) if layer == 0 else Hp
        wih_t = _pack_gate_columns(params[f"w_ih_l{layer}"].T, H, Hp)   # (d_in, 4Hp)
        wih_t = jnp.pad(wih_t, ((0, d_in_p - d_in), (0, 0)))
        whh_t = _pack_gate_columns(params[f"w_hh_l{layer}"].T, H, Hp)   # (H, 4Hp)
        whh_t = jnp.pad(whh_t, ((0, Hp - H), (0, 0)))
        b_p = _pack_gate_columns(params[f"b_l{layer}"], H, Hp)          # (1, 4Hp)
        w_ih.append(wih_t.astype(jnp.bfloat16))
        w_hh.append(whh_t.astype(jnp.bfloat16))
        b.append(b_p.astype(jnp.float32))
    wfc_t = jnp.pad(params["w_fc"].T, ((0, Hp - H), (0, Op - O))).astype(jnp.bfloat16)
    bfc = jnp.pad(params["b_fc"], ((0, 0), (0, Op - O))).astype(jnp.float32)
    return {"w_ih": w_ih, "w_hh": w_hh, "b": b, "w_fc": wfc_t, "b_fc": bfc}


# ---------------------------------------------------------------------------
# Forward pass (equivalent of LSTM_Network.forward)
# ---------------------------------------------------------------------------
@functools.partial(jax.jit, static_argnames=("num_layers", "output_size"))
def lstm_network_forward(x_btd, padded_params, num_layers, output_size):
    """x_btd: (B, T, input_size) batch-first, like PyTorch. Returns (B, output_size)."""
    B, T, D = x_btd.shape
    Dp = padded_params["w_ih"][0].shape[0]
    Bp = _round_up(B, 16)  # sublane alignment (16 for bf16 activations)

    # time-major, zero-padded, bf16 activations (f32 accumulation inside kernels)
    x = jnp.transpose(x_btd, (1, 0, 2))
    x = jnp.pad(x, ((0, 0), (0, Bp - B), (0, Dp - D))).astype(jnp.bfloat16)

    seq = x
    for layer in range(num_layers - 1):
        seq = _lstm_layer_seq(
            seq,
            padded_params["w_ih"][layer],
            padded_params["w_hh"][layer],
            padded_params["b"][layer],
        )
    out_p = _lstm_last_fc(
        seq,
        padded_params["w_ih"][num_layers - 1],
        padded_params["w_hh"][num_layers - 1],
        padded_params["b"][num_layers - 1],
        padded_params["w_fc"],
        padded_params["b_fc"],
    )
    return out_p[:B, :output_size]


# ---------------------------------------------------------------------------
# Synthetic params + pure-JAX reference
# ---------------------------------------------------------------------------
def init_params(key, input_size, hidden_size, num_layers, output_size):
    """Deterministic synthetic params, PyTorch-style U(-1/sqrt(H), 1/sqrt(H))."""
    params = {}
    k = 1.0 / jnp.sqrt(jnp.float32(hidden_size))

    def uni(key, shape):
        return jax.random.uniform(key, shape, jnp.float32, minval=-k, maxval=k)

    for layer in range(num_layers):
        d_in = input_size if layer == 0 else hidden_size
        key, k1, k2, k3, k4 = jax.random.split(key, 5)
        params[f"w_ih_l{layer}"] = uni(k1, (4 * hidden_size, d_in))
        params[f"w_hh_l{layer}"] = uni(k2, (4 * hidden_size, hidden_size))
        # b_ih + b_hh folded into one (1, 4H) bias row (matches nn.LSTM semantics)
        params[f"b_l{layer}"] = (
            uni(k3, (1, 4 * hidden_size)) + uni(k4, (1, 4 * hidden_size))
        )
    key, k1, k2 = jax.random.split(key, 3)
    params["w_fc"] = jax.random.uniform(
        k1, (output_size, hidden_size), jnp.float32, minval=-k, maxval=k
    )
    params["b_fc"] = jax.random.uniform(
        k2, (1, output_size), jnp.float32, minval=-k, maxval=k
    )
    return params


def lstm_network_reference(x_btd, params, num_layers):
    """Pure-JAX f32 reference with PyTorch nn.LSTM semantics."""
    B, T, _ = x_btd.shape
    seq = x_btd.astype(jnp.float32)
    for layer in range(num_layers):
        w_ih = params[f"w_ih_l{layer}"]
        w_hh = params[f"w_hh_l{layer}"]
        bias = params[f"b_l{layer}"]
        H = w_hh.shape[1]
        h = jnp.zeros((B, H), jnp.float32)
        c = jnp.zeros((B, H), jnp.float32)
        outs = []
        for t in range(T):
            g = seq[:, t, :] @ w_ih.T + h @ w_hh.T + bias
            i = jax.nn.sigmoid(g[:, 0 * H:1 * H])
            f = jax.nn.sigmoid(g[:, 1 * H:2 * H])
            gg = jnp.tanh(g[:, 2 * H:3 * H])
            o = jax.nn.sigmoid(g[:, 3 * H:4 * H])
            c = f * c + i * gg
            h = o * jnp.tanh(c)
            outs.append(h)
        seq = jnp.stack(outs, axis=1)
    return seq[:, -1, :] @ params["w_fc"].T + params["b_fc"]


if __name__ == "__main__":
    # Small shapes consistent with the module's forward.
    batch = 2
    seq_len = 8
    input_size = 16
    hidden_size = 32
    num_layers = 2
    output_size = 10

    key = jax.random.PRNGKey(0)
    key, xkey, pkey = jax.random.split(key, 3)

    x = jax.random.normal(xkey, (batch, seq_len, input_size), jnp.float32)
    params = init_params(pkey, input_size, hidden_size, num_layers, output_size)
    padded = prepare_params(params, input_size, hidden_size, num_layers, output_size)

    out = lstm_network_forward(x, padded, num_layers=num_layers, output_size=output_size)
    out = jax.block_until_ready(out)

    assert out.shape == (batch, output_size), out.shape
    assert jnp.all(jnp.isfinite(out)), "non-finite output"

    # Loose tolerance: kernel uses bf16 weights/activations with f32 accumulation.
    ref = lstm_network_reference(x, params, num_layers)
    err = float(jnp.max(jnp.abs(out.astype(jnp.float32) - ref)))
    assert err < 2e-1, f"max abs error vs f32 reference too large: {err}"

    print("KERNEL_OK")
</pallas_src>

<mosaic_0001>
module attributes {stable_mosaic.version = 11 : i64} {
  func.func @lstm_last_fc_kernel(%arg0: i32, %arg1: memref<8x16x128xbf16, #tpu.memory_space<vmem>>, %arg2: memref<128x512xbf16, #tpu.memory_space<vmem>>, %arg3: memref<128x512xbf16, #tpu.memory_space<vmem>>, %arg4: memref<1x512xf32, #tpu.memory_space<vmem>>, %arg5: memref<128x128xbf16, #tpu.memory_space<vmem>>, %arg6: memref<1x128xf32, #tpu.memory_space<vmem>>, %arg7: memref<16x128xf32, #tpu.memory_space<vmem>>, %arg8: memref<8x16x512xf32, #tpu.memory_space<vmem>>) attributes {dimension_semantics = [#tpu.dimension_semantics<arbitrary>], iteration_bounds = array<i64: 1>, scalar_prefetch = 0 : i64, scratch_operands = 1 : i64, tpu.core_type = #tpu.core_type<tc>, window_params = [{pipeline_mode = #tpu.pipeline_mode<synchronous>, transform_indices = @transform_0, window_bounds = array<i64: 8, 16, 128>}, {pipeline_mode = #tpu.pipeline_mode<synchronous>, transform_indices = @transform_1, window_bounds = array<i64: 128, 512>}, {pipeline_mode = #tpu.pipeline_mode<synchronous>, transform_indices = @transform_2, window_bounds = array<i64: 128, 512>}, {pipeline_mode = #tpu.pipeline_mode<synchronous>, transform_indices = @transform_3, window_bounds = array<i64: 1, 512>}, {pipeline_mode = #tpu.pipeline_mode<synchronous>, transform_indices = @transform_4, window_bounds = array<i64: 128, 128>}, {pipeline_mode = #tpu.pipeline_mode<synchronous>, transform_indices = @transform_5, window_bounds = array<i64: 1, 128>}, {pipeline_mode = #tpu.pipeline_mode<synchronous>, transform_indices = @transform_6, window_bounds = array<i64: 16, 128>}]} {
    %c0 = arith.constant 0 : index
    %c0_0 = arith.constant 0 : index
    %c0_1 = arith.constant 0 : index
    %0 = vector.load %arg1[%c0, %c0_0, %c0_1] : memref<8x16x128xbf16, #tpu.memory_space<vmem>>, vector<8x16x128xbf16>
    %1 = vector.shape_cast %0 : vector<8x16x128xbf16> to vector<128x128xbf16>
    %c0_2 = arith.constant 0 : index
    %c0_3 = arith.constant 0 : index
    %2 = vector.load %arg2[%c0_2, %c0_3] : memref<128x512xbf16, #tpu.memory_space<vmem>>, vector<128x512xbf16>
    %cst = arith.constant dense<0.000000e+00> : vector<128x512xf32>
    %3 = tpu.matmul %1, %2, %cst {dimension_numbers = #tpu.dot_dimension_numbers<[1], [0], [0], [1], [0, 0, 1, 1], [], []>} : vector<128x128xbf16>, vector<128x512xbf16>, vector<128x512xf32> -> vector<128x512xf32>
    %c0_4 = arith.constant 0 : index
    %c0_5 = arith.constant 0 : index
    %4 = vector.load %arg4[%c0_4, %c0_5] : memref<1x512xf32, #tpu.memory_space<vmem>>, vector<1x512xf32>
    %5 = vector.broadcast %4 : vector<1x512xf32> to vector<128x512xf32>
    %6 = arith.addf %3, %5 : vector<128x512xf32>
    %7 = vector.shape_cast %6 : vector<128x512xf32> to vector<8x16x512xf32>
    %c0_6 = arith.constant 0 : index
    %c0_7 = arith.constant 0 : index
    %c0_8 = arith.constant 0 : index
    %8 = vector.load %arg8[%c0_6, %c0_7, %c0_8] : memref<8x16x512xf32, #tpu.memory_space<vmem>>, vector<8x16x512xf32>
    tpu.vector_store %arg8[%c0_6, %c0_7, %c0_8], %7 {strides = array<i32>} : memref<8x16x512xf32, #tpu.memory_space<vmem>>, vector<8x16x512xf32>,
    %c0_9 = arith.constant 0 : index
    %c0_10 = arith.constant 0 : index
    %9 = vector.load %arg3[%c0_9, %c0_10] : memref<128x512xbf16, #tpu.memory_space<vmem>>, vector<128x512xbf16>
    %cst_11 = arith.constant 0.000000e+00 : f32
    %10 = vector.broadcast %cst_11 : f32 to vector<16x128xf32>
    %cst_12 = arith.constant 0.000000e+00 : f32
    %11 = vector.broadcast %cst_12 : f32 to vector<16x128xf32>
    %c0_i32 = arith.constant 0 : i32
    %12 = arith.index_cast %c0_i32 : i32 to index
    %c0_13 = arith.constant 0 : index
    %c0_14 = arith.constant 0 : index
    %13 = vector.load %arg8[%12, %c0_13, %c0_14] : memref<8x16x512xf32, #tpu.memory_space<vmem>>, vector<1x16x512xf32>
    %14 = vector.shape_cast %13 : vector<1x16x512xf32> to vector<16x512xf32>
    %15 = arith.truncf %10 : vector<16x128xf32> to vector<16x128xbf16>
    %cst_15 = arith.constant dense<0.000000e+00> : vector<16x512xf32>
    %16 = tpu.matmul %15, %9, %cst_15 {dimension_numbers = #tpu.dot_dimension_numbers<[1], [0], [0], [1], [0, 0, 1, 1], [], []>} : vector<16x128xbf16>, vector<128x512xbf16>, vector<16x512xf32> -> vector<16x512xf32>
    %17 = arith.addf %14, %16 : vector<16x512xf32>
    %18 = vector.extract_strided_slice %17 {offsets = [0, 0], sizes = [16, 128], strides = [1, 1]} : vector<16x512xf32> to vector<16x128xf32>
    %19 = arith.negf %18 : vector<16x128xf32>
    %20 = math.exp %19 : vector<16x128xf32>
    %cst_16 = arith.constant 1.000000e+00 : f32
    %21 = vector.broadcast %cst_16 : f32 to vector<16x128xf32>
    %22 = arith.addf %21, %20 : vector<16x128xf32>
    %23 = arith.divf %21, %22 : vector<16x128xf32>
    %24 = vector.extract_strided_slice %17 {offsets = [0, 128], sizes = [16, 128], strides = [1, 1]} : vector<16x512xf32> to vector<16x128xf32>
    %25 = arith.negf %24 : vector<16x128xf32>
    %26 = math.exp %25 : vector<16x128xf32>
    %cst_17 = arith.constant 1.000000e+00 : f32
    %27 = vector.broadcast %cst_17 : f32 to vector<16x128xf32>
    %28 = arith.addf %27, %26 : vector<16x128xf32>
    %29 = arith.divf %27, %28 : vector<16x128xf32>
    %30 = vector.extract_strided_slice %17 {offsets = [0, 256], sizes = [16, 128], strides = [1, 1]} : vector<16x512xf32> to vector<16x128xf32>
    %31 = math.tanh %30 : vector<16x128xf32>
    %32 = vector.extract_strided_slice %17 {offsets = [0, 384], sizes = [16, 128], strides = [1, 1]} : vector<16x512xf32> to vector<16x128xf32>
    %33 = arith.negf %32 : vector<16x128xf32>
    %34 = math.exp %33 : vector<16x128xf32>
    %cst_18 = arith.constant 1.000000e+00 : f32
    %35 = vector.broadcast %cst_18 : f32 to vector<16x128xf32>
    %36 = arith.addf %35, %34 : vector<16x128xf32>
    %37 = arith.divf %35, %36 : vector<16x128xf32>
    %38 = arith.mulf %29, %11 : vector<16x128xf32>
    %39 = arith.mulf %23, %31 : vector<16x128xf32>
    %40 = arith.addf %38, %39 : vector<16x128xf32>
    %41 = math.tanh %40 : vector<16x128xf32>
    %42 = arith.mulf %37, %41 : vector<16x128xf32>
    %c1_i32 = arith.constant 1 : i32
    %43 = arith.index_cast %c1_i32 : i32 to index
    %c0_19 = arith.constant 0 : index
    %c0_20 = arith.constant 0 : index
    %44 = vector.load %arg8[%43, %c0_19, %c0_20] : memref<8x16x512xf32, #tpu.memory_space<vmem>>, vector<1x16x512xf32>
    %45 = vector.shape_cast %44 : vector<1x16x512xf32> to vector<16x512xf32>
    %46 = arith.truncf %42 : vector<16x128xf32> to vector<16x128xbf16>
    %cst_21 = arith.constant dense<0.000000e+00> : vector<16x512xf32>
    %47 = tpu.matmul %46, %9, %cst_21 {dimension_numbers = #tpu.dot_dimension_numbers<[1], [0], [0], [1], [0, 0, 1, 1], [], []>} : vector<16x128xbf16>, vector<128x512xbf16>, vector<16x512xf32> -> vector<16x512xf32>
    %48 = arith.addf %45, %47 : vector<16x512xf32>
    %49 = vector.extract_strided_slice %48 {offsets = [0, 0], sizes = [16, 128], strides = [1, 1]} : vector<16x512xf32> to vector<16x128xf32>
    %50 = arith.negf %49 : vector<16x128xf32>
    %51 = math.exp %50 : vector<16x128xf32>
    %cst_22 = arith.constant 1.000000e+00 : f32
    %52 = vector.broadcast %cst_22 : f32 to vector<16x128xf32>
    %53 = arith.addf %52, %51 : vector<16x128xf32>
    %54 = arith.divf %52, %53 : vector<16x128xf32>
    %55 = vector.extract_strided_slice %48 {offsets = [0, 128], sizes = [16, 128], strides = [1, 1]} : vector<16x512xf32> to vector<16x128xf32>
    %56 = arith.negf %55 : vector<16x128xf32>
    %57 = math.exp %56 : vector<16x128xf32>
    %cst_23 = arith.constant 1.000000e+00 : f32
    %58 = vector.broadcast %cst_23 : f32 to vector<16x128xf32>
    %59 = arith.addf %58, %57 : vector<16x128xf32>
    %60 = arith.divf %58, %59 : vector<16x128xf32>
    %61 = vector.extract_strided_slice %48 {offsets = [0, 256], sizes = [16, 128], strides = [1, 1]} : vector<16x512xf32> to vector<16x128xf32>
    %62 = math.tanh %61 : vector<16x128xf32>
    %63 = vector.extract_strided_slice %48 {offsets = [0, 384], sizes = [16, 128], strides = [1, 1]} : vector<16x512xf32> to vector<16x128xf32>
    %64 = arith.negf %63 : vector<16x128xf32>
    %65 = math.exp %64 : vector<16x128xf32>
    %cst_24 = arith.constant 1.000000e+00 : f32
    %66 = vector.broadcast %cst_24 : f32 to vector<16x128xf32>
    %67 = arith.addf %66, %65 : vector<16x128xf32>
    %68 = arith.divf %66, %67 : vector<16x128xf32>
    %69 = arith.mulf %60, %40 : vector<16x128xf32>
    %70 = arith.mulf %54, %62 : vector<16x128xf32>
    %71 = arith.addf %69, %70 : vector<16x128xf32>
    %72 = math.tanh %71 : vector<16x128xf32>
    %73 = arith.mulf %68, %72 : vector<16x128xf32>
    %c2_i32 = arith.constant 2 : i32
    %74 = arith.index_cast %c2_i32 : i32 to index
    %c0_25 = arith.constant 0 : index
    %c0_26 = arith.constant 0 : index
    %75 = vector.load %arg8[%74, %c0_25, %c0_26] : memref<8x16x512xf32, #tpu.memory_space<vmem>>, vector<1x16x512xf32>
    %76 = vector.shape_cast %75 : vector<1x16x512xf32> to vector<16x512xf32>
    %77 = arith.truncf %73 : vector<16x128xf32> to vector<16x128xbf16>
    %cst_27 = arith.constant dense<0.000000e+00> : vector<16x512xf32>
    %78 = tpu.matmul %77, %9, %cst_27 {dimension_numbers = #tpu.dot_dimension_numbers<[1], [0], [0], [1], [0, 0, 1, 1], [], []>} : vector<16x128xbf16>, vector<128x512xbf16>, vector<16x512xf32> -> vector<16x512xf32>
    %79 = arith.addf %76, %78 : vector<16x512xf32>
    %80 = vector.extract_strided_slice %79 {offsets = [0, 0], sizes = [16, 128], strides = [1, 1]} : vector<16x512xf32> to vector<16x128xf32>
    %81 = arith.negf %80 : vector<16x128xf32>
    %82 = math.exp %81 : vector<16x128xf32>
    %cst_28 = arith.constant 1.000000e+00 : f32
    %83 = vector.broadcast %cst_28 : f32 to vector<16x128xf32>
    %84 = arith.addf %83, %82 : vector<16x128xf32>
    %85 = arith.divf %83, %84 : vector<16x128xf32>
    %86 = vector.extract_strided_slice %79 {offsets = [0, 128], sizes = [16, 128], strides = [1, 1]} : vector<16x512xf32> to vector<16x128xf32>
    %87 = arith.negf %86 : vector<16x128xf32>
    %88 = math.exp %87 : vector<16x128xf32>
    %cst_29 = arith.constant 1.000000e+00 : f32
    %89 = vector.broadcast %cst_29 : f32 to vector<16x128xf32>
    %90 = arith.addf %89, %88 : vector<16x128xf32>
    %91 = arith.divf %89, %90 : vector<16x128xf32>
    %92 = vector.extract_strided_slice %79 {offsets = [0, 256], sizes = [16, 128], strides = [1, 1]} : vector<16x512xf32> to vector<16x128xf32>
    %93 = math.tanh %92 : vector<16x128xf32>
    %94 = vector.extract_strided_slice %79 {offsets = [0, 384], sizes = [16, 128], strides = [1, 1]} : vector<16x512xf32> to vector<16x128xf32>
    %95 = arith.negf %94 : vector<16x128xf32>
    %96 = math.exp %95 : vector<16x128xf32>
    %cst_30 = arith.constant 1.000000e+00 : f32
    %97 = vector.broadcast %cst_30 : f32 to vector<16x128xf32>
    %98 = arith.addf %97, %96 : vector<16x128xf32>
    %99 = arith.divf %97, %98 : vector<16x128xf32>
    %100 = arith.mulf %91, %71 : vector<16x128xf32>
    %101 = arith.mulf %85, %93 : vector<16x128xf32>
    %102 = arith.addf %100, %101 : vector<16x128xf32>
    %103 = math.tanh %102 : vector<16x128xf32>
    %104 = arith.mulf %99, %103 : vector<16x128xf32>
    %c3_i32 = arith.constant 3 : i32
    %105 = arith.index_cast %c3_i32 : i32 to index
    %c0_31 = arith.constant 0 : index
    %c0_32 = arith.constant 0 : index
    %106 = vector.load %arg8[%105, %c0_31, %c0_32] : memref<8x16x512xf32, #tpu.memory_space<vmem>>, vector<1x16x512xf32>
    %107 = vector.shape_cast %106 : vector<1x16x512xf32> to vector<16x512xf32>
    %108 = arith.truncf %104 : vector<16x128xf32> to vector<16x128xbf16>
    %cst_33 = arith.constant dense<0.000000e+00> : vector<16x512xf32>
    %109 = tpu.matmul %108, %9, %cst_33 {dimension_numbers = #tpu.dot_dimension_numbers<[1], [0], [0], [1], [0, 0, 1, 1], [], []>} : vector<16x128xbf16>, vector<128x512xbf16>, vector<16x512xf32> -> vector<16x512xf32>
    %110 = arith.addf %107, %109 : vector<16x512xf32>
    %111 = vector.extract_strided_slice %110 {offsets = [0, 0], sizes = [16, 128], strides = [1, 1]} : vector<16x512xf32> to vector<16x128xf32>
    %112 = arith.negf %111 : vector<16x128xf32>
    %113 = math.exp %112 : vector<16x128xf32>
    %cst_34 = arith.constant 1.000000e+00 : f32
    %114 = vector.broadcast %cst_34 : f32 to vector<16x128xf32>
    %115 = arith.addf %114, %113 : vector<16x128xf32>
    %116 = arith.divf %114, %115 : vector<16x128xf32>
    %117 = vector.extract_strided_slice %110 {offsets = [0, 128], sizes = [16, 128], strides = [1, 1]} : vector<16x512xf32> to vector<16x128xf32>
    %118 = arith.negf %117 : vector<16x128xf32>
    %119 = math.exp %118 : vector<16x128xf32>
    %cst_35 = arith.constant 1.000000e+00 : f32
    %120 = vector.broadcast %cst_35 : f32 to vector<16x128xf32>
    %121 = arith.addf %120, %119 : vector<16x128xf32>
    %122 = arith.divf %120, %121 : vector<16x128xf32>
    %123 = vector.extract_strided_slice %110 {offsets = [0, 256], sizes = [16, 128], strides = [1, 1]} : vector<16x512xf32> to vector<16x128xf32>
    %124 = math.tanh %123 : vector<16x128xf32>
    %125 = vector.extract_strided_slice %110 {offsets = [0, 384], sizes = [16, 128], strides = [1, 1]} : vector<16x512xf32> to vector<16x128xf32>
    %126 = arith.negf %125 : vector<16x128xf32>
    %127 = math.exp %126 : vector<16x128xf32>
    %cst_36 = arith.constant 1.000000e+00 : f32
    %128 = vector.broadcast %cst_36 : f32 to vector<16x128xf32>
    %129 = arith.addf %128, %127 : vector<16x128xf32>
    %130 = arith.divf %128, %129 : vector<16x128xf32>
    %131 = arith.mulf %122, %102 : vector<16x128xf32>
    %132 = arith.mulf %116, %124 : vector<16x128xf32>
    %133 = arith.addf %131, %132 : vector<16x128xf32>
    %134 = math.tanh %133 : vector<16x128xf32>
    %135 = arith.mulf %130, %134 : vector<16x128xf32>
    %c4_i32 = arith.constant 4 : i32
    %136 = arith.index_cast %c4_i32 : i32 to index
    %c0_37 = arith.constant 0 : index
    %c0_38 = arith.constant 0 : index
    %137 = vector.load %arg8[%136, %c0_37, %c0_38] : memref<8x16x512xf32, #tpu.memory_space<vmem>>, vector<1x16x512xf32>
    %138 = vector.shape_cast %137 : vector<1x16x512xf32> to vector<16x512xf32>
    %139 = arith.truncf %135 : vector<16x128xf32> to vector<16x128xbf16>
    %cst_39 = arith.constant dense<0.000000e+00> : vector<16x512xf32>
    %140 = tpu.matmul %139, %9, %cst_39 {dimension_numbers = #tpu.dot_dimension_numbers<[1], [0], [0], [1], [0, 0, 1, 1], [], []>} : vector<16x128xbf16>, vector<128x512xbf16>, vector<16x512xf32> -> vector<16x512xf32>
    %141 = arith.addf %138, %140 : vector<16x512xf32>
    %142 = vector.extract_strided_slice %141 {offsets = [0, 0], sizes = [16, 128], strides = [1, 1]} : vector<16x512xf32> to vector<16x128xf32>
    %143 = arith.negf %142 : vector<16x128xf32>
    %144 = math.exp %143 : vector<16x128xf32>
    %cst_40 = arith.constant 1.000000e+00 : f32
    %145 = vector.broadcast %cst_40 : f32 to vector<16x128xf32>
    %146 = arith.addf %145, %144 : vector<16x128xf32>
    %147 = arith.divf %145, %146 : vector<16x128xf32>
    %148 = vector.extract_strided_slice %141 {offsets = [0, 128], sizes = [16, 128], strides = [1, 1]} : vector<16x512xf32> to vector<16x128xf32>
    %149 = arith.negf %148 : vector<16x128xf32>
    %150 = math.exp %149 : vector<16x128xf32>
    %cst_41 = arith.constant 1.000000e+00 : f32
    %151 = vector.broadcast %cst_41 : f32 to vector<16x128xf32>
    %152 = arith.addf %151, %150 : vector<16x128xf32>
    %153 = arith.divf %151, %152 : vector<16x128xf32>
    %154 = vector.extract_strided_slice %141 {offsets = [0, 256], sizes = [16, 128], strides = [1, 1]} : vector<16x512xf32> to vector<16x128xf32>
    %155 = math.tanh %154 : vector<16x128xf32>
    %156 = vector.extract_strided_slice %141 {offsets = [0, 384], sizes = [16, 128], strides = [1, 1]} : vector<16x512xf32> to vector<16x128xf32>
    %157 = arith.negf %156 : vector<16x128xf32>
    %158 = math.exp %157 : vector<16x128xf32>
    %cst_42 = arith.constant 1.000000e+00 : f32
    %159 = vector.broadcast %cst_42 : f32 to vector<16x128xf32>
    %160 = arith.addf %159, %158 : vector<16x128xf32>
    %161 = arith.divf %159, %160 : vector<16x128xf32>
    %162 = arith.mulf %153, %133 : vector<16x128xf32>
    %163 = arith.mulf %147, %155 : vector<16x128xf32>
    %164 = arith.addf %162, %163 : vector<16x128xf32>
    %165 = math.tanh %164 : vector<16x128xf32>
    %166 = arith.mulf %161, %165 : vector<16x128xf32>
    %c5_i32 = arith.constant 5 : i32
    %167 = arith.index_cast %c5_i32 : i32 to index
    %c0_43 = arith.constant 0 : index
    %c0_44 = arith.constant 0 : index
    %168 = vector.load %arg8[%167, %c0_43, %c0_44] : memref<8x16x512xf32, #tpu.memory_space<vmem>>, vector<1x16x512xf32>
    %169 = vector.shape_cast %168 : vector<1x16x512xf32> to vector<16x512xf32>
    %170 = arith.truncf %166 : vector<16x128xf32> to vector<16x128xbf16>
    %cst_45 = arith.constant dense<0.000000e+00> : vector<16x512xf32>
    %171 = tpu.matmul %170, %9, %cst_45 {dimension_numbers = #tpu.dot_dimension_numbers<[1], [0], [0], [1], [0, 0, 1, 1], [], []>} : vector<16x128xbf16>, vector<128x512xbf16>, vector<16x512xf32> -> vector<16x512xf32>
    %172 = arith.addf %169, %171 : vector<16x512xf32>
    %173 = vector.extract_strided_slice %172 {offsets = [0, 0], sizes = [16, 128], strides = [1, 1]} : vector<16x512xf32> to vector<16x128xf32>
    %174 = arith.negf %173 : vector<16x128xf32>
    %175 = math.exp %174 : vector<16x128xf32>
    %cst_46 = arith.constant 1.000000e+00 : f32
    %176 = vector.broadcast %cst_46 : f32 to vector<16x128xf32>
    %177 = arith.addf %176, %175 : vector<16x128xf32>
    %178 = arith.divf %176, %177 : vector<16x128xf32>
    %179 = vector.extract_strided_slice %172 {offsets = [0, 128], sizes = [16, 128], strides = [1, 1]} : vector<16x512xf32> to vector<16x128xf32>
    %180 = arith.negf %179 : vector<16x128xf32>
    %181 = math.exp %180 : vector<16x128xf32>
    %cst_47 = arith.constant 1.000000e+00 : f32
    %182 = vector.broadcast %cst_47 : f32 to vector<16x128xf32>
    %183 = arith.addf %182, %181 : vector<16x128xf32>
    %184 = arith.divf %182, %183 : vector<16x128xf32>
    %185 = vector.extract_strided_slice %172 {offsets = [0, 256], sizes = [16, 128], strides = [1, 1]} : vector<16x512xf32> to vector<16x128xf32>
    %186 = math.tanh %185 : vector<16x128xf32>
    %187 = vector.extract_strided_slice %172 {offsets = [0, 384], sizes = [16, 128], strides = [1, 1]} : vector<16x512xf32> to vector<16x128xf32>
    %188 = arith.negf %187 : vector<16x128xf32>
    %189 = math.exp %188 : vector<16x128xf32>
    %cst_48 = arith.constant 1.000000e+00 : f32
    %190 = vector.broadcast %cst_48 : f32 to vector<16x128xf32>
    %191 = arith.addf %190, %189 : vector<16x128xf32>
    %192 = arith.divf %190, %191 : vector<16x128xf32>
    %193 = arith.mulf %184, %164 : vector<16x128xf32>
    %194 = arith.mulf %178, %186 : vector<16x128xf32>
    %195 = arith.addf %193, %194 : vector<16x128xf32>
    %196 = math.tanh %195 : vector<16x128xf32>
    %197 = arith.mulf %192, %196 : vector<16x128xf32>
    %c6_i32 = arith.constant 6 : i32
    %198 = arith.index_cast %c6_i32 : i32 to index
    %c0_49 = arith.constant 0 : index
    %c0_50 = arith.constant 0 : index
    %199 = vector.load %arg8[%198, %c0_49, %c0_50] : memref<8x16x512xf32, #tpu.memory_space<vmem>>, vector<1x16x512xf32>
    %200 = vector.shape_cast %199 : vector<1x16x512xf32> to vector<16x512xf32>
    %201 = arith.truncf %197 : vector<16x128xf32> to vector<16x128xbf16>
    %cst_51 = arith.constant dense<0.000000e+00> : vector<16x512xf32>
    %202 = tpu.matmul %201, %9, %cst_51 {dimension_numbers = #tpu.dot_dimension_numbers<[1], [0], [0], [1], [0, 0, 1, 1], [], []>} : vector<16x128xbf16>, vector<128x512xbf16>, vector<16x512xf32> -> vector<16x512xf32>
    %203 = arith.addf %200, %202 : vector<16x512xf32>
    %204 = vector.extract_strided_slice %203 {offsets = [0, 0], sizes = [16, 128], strides = [1, 1]} : vector<16x512xf32> to vector<16x128xf32>
    %205 = arith.negf %204 : vector<16x128xf32>
    %206 = math.exp %205 : vector<16x128xf32>
    %cst_52 = arith.constant 1.000000e+00 : f32
    %207 = vector.broadcast %cst_52 : f32 to vector<16x128xf32>
    %208 = arith.addf %207, %206 : vector<16x128xf32>
    %209 = arith.divf %207, %208 : vector<16x128xf32>
    %210 = vector.extract_strided_slice %203 {offsets = [0, 128], sizes = [16, 128], strides = [1, 1]} : vector<16x512xf32> to vector<16x128xf32>
    %211 = arith.negf %210 : vector<16x128xf32>
    %212 = math.exp %211 : vector<16x128xf32>
    %cst_53 = arith.constant 1.000000e+00 : f32
    %213 = vector.broadcast %cst_53 : f32 to vector<16x128xf32>
    %214 = arith.addf %213, %212 : vector<16x128xf32>
    %215 = arith.divf %213, %214 : vector<16x128xf32>
    %216 = vector.extract_strided_slice %203 {offsets = [0, 256], sizes = [16, 128], strides = [1, 1]} : vector<16x512xf32> to vector<16x128xf32>
    %217 = math.tanh %216 : vector<16x128xf32>
    %218 = vector.extract_strided_slice %203 {offsets = [0, 384], sizes = [16, 128], strides = [1, 1]} : vector<16x512xf32> to vector<16x128xf32>
    %219 = arith.negf %218 : vector<16x128xf32>
    %220 = math.exp %219 : vector<16x128xf32>
    %cst_54 = arith.constant 1.000000e+00 : f32
    %221 = vector.broadcast %cst_54 : f32 to vector<16x128xf32>
    %222 = arith.addf %221, %220 : vector<16x128xf32>
    %223 = arith.divf %221, %222 : vector<16x128xf32>
    %224 = arith.mulf %215, %195 : vector<16x128xf32>
    %225 = arith.mulf %209, %217 : vector<16x128xf32>
    %226 = arith.addf %224, %225 : vector<16x128xf32>
    %227 = math.tanh %226 : vector<16x128xf32>
    %228 = arith.mulf %223, %227 : vector<16x128xf32>
    %c7_i32 = arith.constant 7 : i32
    %229 = arith.index_cast %c7_i32 : i32 to index
    %c0_55 = arith.constant 0 : index
    %c0_56 = arith.constant 0 : index
    %230 = vector.load %arg8[%229, %c0_55, %c0_56] : memref<8x16x512xf32, #tpu.memory_space<vmem>>, vector<1x16x512xf32>
    %231 = vector.shape_cast %230 : vector<1x16x512xf32> to vector<16x512xf32>
    %232 = arith.truncf %228 : vector<16x128xf32> to vector<16x128xbf16>
    %cst_57 = arith.constant dense<0.000000e+00> : vector<16x512xf32>
    %233 = tpu.matmul %232, %9, %cst_57 {dimension_numbers = #tpu.dot_dimension_numbers<[1], [0], [0], [1], [0, 0, 1, 1], [], []>} : vector<16x128xbf16>, vector<128x512xbf16>, vector<16x512xf32> -> vector<16x512xf32>
    %234 = arith.addf %231, %233 : vector<16x512xf32>
    %235 = vector.extract_strided_slice %234 {offsets = [0, 0], sizes = [16, 128], strides = [1, 1]} : vector<16x512xf32> to vector<16x128xf32>
    %236 = arith.negf %235 : vector<16x128xf32>
    %237 = math.exp %236 : vector<16x128xf32>
    %cst_58 = arith.constant 1.000000e+00 : f32
    %238 = vector.broadcast %cst_58 : f32 to vector<16x128xf32>
    %239 = arith.addf %238, %237 : vector<16x128xf32>
    %240 = arith.divf %238, %239 : vector<16x128xf32>
    %241 = vector.extract_strided_slice %234 {offsets = [0, 128], sizes = [16, 128], strides = [1, 1]} : vector<16x512xf32> to vector<16x128xf32>
    %242 = arith.negf %241 : vector<16x128xf32>
    %243 = math.exp %242 : vector<16x128xf32>
    %cst_59 = arith.constant 1.000000e+00 : f32
    %244 = vector.broadcast %cst_59 : f32 to vector<16x128xf32>
    %245 = arith.addf %244, %243 : vector<16x128xf32>
    %246 = arith.divf %244, %245 : vector<16x128xf32>
    %247 = vector.extract_strided_slice %234 {offsets = [0, 256], sizes = [16, 128], strides = [1, 1]} : vector<16x512xf32> to vector<16x128xf32>
    %248 = math.tanh %247 : vector<16x128xf32>
    %249 = vector.extract_strided_slice %234 {offsets = [0, 384], sizes = [16, 128], strides = [1, 1]} : vector<16x512xf32> to vector<16x128xf32>
    %250 = arith.negf %249 : vector<16x128xf32>
    %251 = math.exp %250 : vector<16x128xf32>
    %cst_60 = arith.constant 1.000000e+00 : f32
    %252 = vector.broadcast %cst_60 : f32 to vector<16x128xf32>
    %253 = arith.addf %252, %251 : vector<16x128xf32>
    %254 = arith.divf %252, %253 : vector<16x128xf32>
    %255 = arith.mulf %246, %226 : vector<16x128xf32>
    %256 = arith.mulf %240, %248 : vector<16x128xf32>
    %257 = arith.addf %255, %256 : vector<16x128xf32>
    %258 = math.tanh %257 : vector<16x128xf32>
    %259 = arith.mulf %254, %258 : vector<16x128xf32>
    %c8_i32 = arith.constant 8 : i32
    %260 = arith.truncf %259 : vector<16x128xf32> to vector<16x128xbf16>
    %c0_61 = arith.constant 0 : index
    %c0_62 = arith.constant 0 : index
    %261 = vector.load %arg5[%c0_61, %c0_62] : memref<128x128xbf16, #tpu.memory_space<vmem>>, vector<128x128xbf16>
    %cst_63 = arith.constant dense<0.000000e+00> : vector<16x128xf32>
    %262 = tpu.matmul %260, %261, %cst_63 {dimension_numbers = #tpu.dot_dimension_numbers<[1], [0], [0], [1], [0, 0, 1, 1], [], []>} : vector<16x128xbf16>, vector<128x128xbf16>, vector<16x128xf32> -> vector<16x128xf32>
    %c0_64 = arith.constant 0 : index
    %c0_65 = arith.constant 0 : index
    %263 = vector.load %arg6[%c0_64, %c0_65] : memref<1x128xf32, #tpu.memory_space<vmem>>, vector<1x128xf32>
    %264 = vector.broadcast %263 : vector<1x128xf32> to vector<16x128xf32>
    %265 = arith.addf %262, %264 : vector<16x128xf32>
    %c0_66 = arith.constant 0 : index
    %c0_67 = arith.constant 0 : index
    %266 = vector.load %arg7[%c0_66, %c0_67] : memref<16x128xf32, #tpu.memory_space<vmem>>, vector<16x128xf32>
    tpu.vector_store %arg7[%c0_66, %c0_67], %265 {strides = array<i32>} : memref<16x128xf32, #tpu.memory_space<vmem>>, vector<16x128xf32>,
    return
  }
  func.func @transform_0(%arg0: i32) -> (i32, i32, i32) {
    %c0_i32 = arith.constant 0 : i32
    %c0_i32_0 = arith.constant 0 : i32
    %c0_i32_1 = arith.constant 0 : i32
    %c0_i32_2 = arith.constant 0 : i32
    return %c0_i32, %c0_i32_0, %c0_i32_1 : i32, i32, i32
  }
  func.func @transform_1(%arg0: i32) -> (i32, i32) {
    %c0_i32 = arith.constant 0 : i32
    %c0_i32_0 = arith.constant 0 : i32
    %c0_i32_1 = arith.constant 0 : i32
    return %c0_i32, %c0_i32_0 : i32, i32
  }
  func.func @transform_2(%arg0: i32) -> (i32, i32) {
    %c0_i32 = arith.constant 0 : i32
    %c0_i32_0 = arith.constant 0 : i32
    %c0_i32_1 = arith.constant 0 : i32
    return %c0_i32, %c0_i32_0 : i32, i32
  }
  func.func @transform_3(%arg0: i32) -> (i32, i32) {
    %c0_i32 = arith.constant 0 : i32
    %c0_i32_0 = arith.constant 0 : i32
    %c0_i32_1 = arith.constant 0 : i32
    return %c0_i32, %c0_i32_0 : i32, i32
  }
  func.func @transform_4(%arg0: i32) -> (i32, i32) {
    %c0_i32 = arith.constant 0 : i32
    %c0_i32_0 = arith.constant 0 : i32
    %c0_i32_1 = arith.constant 0 : i32
    return %c0_i32, %c0_i32_0 : i32, i32
  }
  func.func @transform_5(%arg0: i32) -> (i32, i32) {
    %c0_i32 = arith.constant 0 : i32
    %c0_i32_0 = arith.constant 0 : i32
    %c0_i32_1 = arith.constant 0 : i32
    return %c0_i32, %c0_i32_0 : i32, i32
  }
  func.func @transform_6(%arg0: i32) -> (i32, i32) {
    %c0_i32 = arith.constant 0 : i32
    %c0_i32_0 = arith.constant 0 : i32
    %c0_i32_1 = arith.constant 0 : i32
    return %c0_i32, %c0_i32_0 : i32, i32
  }
}

module attributes {stable_mosaic.version = 11 : i64} {
  func.func @lstm_seq_kernel(%arg0: i32, %arg1: memref<8x16x128xbf16, #tpu.memory_space<vmem>>, %arg2: memref<128x512xbf16, #tpu.memory_space<vmem>>, %arg3: memref<128x512xbf16, #tpu.memory_space<vmem>>, %arg4: memref<1x512xf32, #tpu.memory_space<vmem>>, %arg5: memref<8x16x128xbf16, #tpu.memory_space<vmem>>, %arg6: memref<8x16x512xf32, #tpu.memory_space<vmem>>) attributes {dimension_semantics = [#tpu.dimension_semantics<arbitrary>], iteration_bounds = array<i64: 1>, scalar_prefetch = 0 : i64, scratch_operands = 1 : i64, tpu.core_type = #tpu.core_type<tc>, window_params = [{pipeline_mode = #tpu.pipeline_mode<synchronous>, transform_indices = @transform_0, window_bounds = array<i64: 8, 16, 128>}, {pipeline_mode = #tpu.pipeline_mode<synchronous>, transform_indices = @transform_1, window_bounds = array<i64: 128, 512>}, {pipeline_mode = #tpu.pipeline_mode<synchronous>, transform_indices = @transform_2, window_bounds = array<i64: 128, 512>}, {pipeline_mode = #tpu.pipeline_mode<synchronous>, transform_indices = @transform_3, window_bounds = array<i64: 1, 512>}, {pipeline_mode = #tpu.pipeline_mode<synchronous>, transform_indices = @transform_4, window_bounds = array<i64: 8, 16, 128>}]} {
    %c0 = arith.constant 0 : index
    %c0_0 = arith.constant 0 : index
    %c0_1 = arith.constant 0 : index
    %0 = vector.load %arg1[%c0, %c0_0, %c0_1] : memref<8x16x128xbf16, #tpu.memory_space<vmem>>, vector<8x16x128xbf16>
    %1 = vector.shape_cast %0 : vector<8x16x128xbf16> to vector<128x128xbf16>
    %c0_2 = arith.constant 0 : index
    %c0_3 = arith.constant 0 : index
    %2 = vector.load %arg2[%c0_2, %c0_3] : memref<128x512xbf16, #tpu.memory_space<vmem>>, vector<128x512xbf16>
    %cst = arith.constant dense<0.000000e+00> : vector<128x512xf32>
    %3 = tpu.matmul %1, %2, %cst {dimension_numbers = #tpu.dot_dimension_numbers<[1], [0], [0], [1], [0, 0, 1, 1], [], []>} : vector<128x128xbf16>, vector<128x512xbf16>, vector<128x512xf32> -> vector<128x512xf32>
    %c0_4 = arith.constant 0 : index
    %c0_5 = arith.constant 0 : index
    %4 = vector.load %arg4[%c0_4, %c0_5] : memref<1x512xf32, #tpu.memory_space<vmem>>, vector<1x512xf32>
    %5 = vector.broadcast %4 : vector<1x512xf32> to vector<128x512xf32>
    %6 = arith.addf %3, %5 : vector<128x512xf32>
    %7 = vector.shape_cast %6 : vector<128x512xf32> to vector<8x16x512xf32>
    %c0_6 = arith.constant 0 : index
    %c0_7 = arith.constant 0 : index
    %c0_8 = arith.constant 0 : index
    %8 = vector.load %arg6[%c0_6, %c0_7, %c0_8] : memref<8x16x512xf32, #tpu.memory_space<vmem>>, vector<8x16x512xf32>
    tpu.vector_store %arg6[%c0_6, %c0_7, %c0_8], %7 {strides = array<i32>} : memref<8x16x512xf32, #tpu.memory_space<vmem>>, vector<8x16x512xf32>,
    %c0_9 = arith.constant 0 : index
    %c0_10 = arith.constant 0 : index
    %9 = vector.load %arg3[%c0_9, %c0_10] : memref<128x512xbf16, #tpu.memory_space<vmem>>, vector<128x512xbf16>
    %cst_11 = arith.constant 0.000000e+00 : f32
    %10 = vector.broadcast %cst_11 : f32 to vector<16x128xf32>
    %cst_12 = arith.constant 0.000000e+00 : f32
    %11 = vector.broadcast %cst_12 : f32 to vector<16x128xf32>
    %c0_i32 = arith.constant 0 : i32
    %12 = arith.index_cast %c0_i32 : i32 to index
    %c0_13 = arith.constant 0 : index
    %c0_14 = arith.constant 0 : index
    %13 = vector.load %arg6[%12, %c0_13, %c0_14] : memref<8x16x512xf32, #tpu.memory_space<vmem>>, vector<1x16x512xf32>
    %14 = vector.shape_cast %13 : vector<1x16x512xf32> to vector<16x512xf32>
    %15 = arith.truncf %10 : vector<16x128xf32> to vector<16x128xbf16>
    %cst_15 = arith.constant dense<0.000000e+00> : vector<16x512xf32>
    %16 = tpu.matmul %15, %9, %cst_15 {dimension_numbers = #tpu.dot_dimension_numbers<[1], [0], [0], [1], [0, 0, 1, 1], [], []>} : vector<16x128xbf16>, vector<128x512xbf16>, vector<16x512xf32> -> vector<16x512xf32>
    %17 = arith.addf %14, %16 : vector<16x512xf32>
    %18 = vector.extract_strided_slice %17 {offsets = [0, 0], sizes = [16, 128], strides = [1, 1]} : vector<16x512xf32> to vector<16x128xf32>
    %19 = arith.negf %18 : vector<16x128xf32>
    %20 = math.exp %19 : vector<16x128xf32>
    %cst_16 = arith.constant 1.000000e+00 : f32
    %21 = vector.broadcast %cst_16 : f32 to vector<16x128xf32>
    %22 = arith.addf %21, %20 : vector<16x128xf32>
    %23 = arith.divf %21, %22 : vector<16x128xf32>
    %24 = vector.extract_strided_slice %17 {offsets = [0, 128], sizes = [16, 128], strides = [1, 1]} : vector<16x512xf32> to vector<16x128xf32>
    %25 = arith.negf %24 : vector<16x128xf32>
    %26 = math.exp %25 : vector<16x128xf32>
    %cst_17 = arith.constant 1.000000e+00 : f32
    %27 = vector.broadcast %cst_17 : f32 to vector<16x128xf32>
    %28 = arith.addf %27, %26 : vector<16x128xf32>
    %29 = arith.divf %27, %28 : vector<16x128xf32>
    %30 = vector.extract_strided_slice %17 {offsets = [0, 256], sizes = [16, 128], strides = [1, 1]} : vector<16x512xf32> to vector<16x128xf32>
    %31 = math.tanh %30 : vector<16x128xf32>
    %32 = vector.extract_strided_slice %17 {offsets = [0, 384], sizes = [16, 128], strides = [1, 1]} : vector<16x512xf32> to vector<16x128xf32>
    %33 = arith.negf %32 : vector<16x128xf32>
    %34 = math.exp %33 : vector<16x128xf32>
    %cst_18 = arith.constant 1.000000e+00 : f32
    %35 = vector.broadcast %cst_18 : f32 to vector<16x128xf32>
    %36 = arith.addf %35, %34 : vector<16x128xf32>
    %37 = arith.divf %35, %36 : vector<16x128xf32>
    %38 = arith.mulf %29, %11 : vector<16x128xf32>
    %39 = arith.mulf %23, %31 : vector<16x128xf32>
    %40 = arith.addf %38, %39 : vector<16x128xf32>
    %41 = math.tanh %40 : vector<16x128xf32>
    %42 = arith.mulf %37, %41 : vector<16x128xf32>
    %43 = arith.truncf %42 : vector<16x128xf32> to vector<16x128xbf16>
    %44 = arith.index_cast %c0_i32 : i32 to index
    %c0_19 = arith.constant 0 : index
    %c0_20 = arith.constant 0 : index
    %45 = vector.load %arg5[%44, %c0_19, %c0_20] : memref<8x16x128xbf16, #tpu.memory_space<vmem>>, vector<1x16x128xbf16>
    %46 = vector.shape_cast %45 : vector<1x16x128xbf16> to vector<16x128xbf16>
    %47 = vector.shape_cast %43 : vector<16x128xbf16> to vector<1x16x128xbf16>
    tpu.vector_store %arg5[%44, %c0_19, %c0_20], %47 {strides = array<i32>} : memref<8x16x128xbf16, #tpu.memory_space<vmem>>, vector<1x16x128xbf16>,
    %c1_i32 = arith.constant 1 : i32
    %48 = arith.index_cast %c1_i32 : i32 to index
    %c0_21 = arith.constant 0 : index
    %c0_22 = arith.constant 0 : index
    %49 = vector.load %arg6[%48, %c0_21, %c0_22] : memref<8x16x512xf32, #tpu.memory_space<vmem>>, vector<1x16x512xf32>
    %50 = vector.shape_cast %49 : vector<1x16x512xf32> to vector<16x512xf32>
    %51 = arith.truncf %42 : vector<16x128xf32> to vector<16x128xbf16>
    %cst_23 = arith.constant dense<0.000000e+00> : vector<16x512xf32>
    %52 = tpu.matmul %51, %9, %cst_23 {dimension_numbers = #tpu.dot_dimension_numbers<[1], [0], [0], [1], [0, 0, 1, 1], [], []>} : vector<16x128xbf16>, vector<128x512xbf16>, vector<16x512xf32> -> vector<16x512xf32>
    %53 = arith.addf %50, %52 : vector<16x512xf32>
    %54 = vector.extract_strided_slice %53 {offsets = [0, 0], sizes = [16, 128], strides = [1, 1]} : vector<16x512xf32> to vector<16x128xf32>
    %55 = arith.negf %54 : vector<16x128xf32>
    %56 = math.exp %55 : vector<16x128xf32>
    %cst_24 = arith.constant 1.000000e+00 : f32
    %57 = vector.broadcast %cst_24 : f32 to vector<16x128xf32>
    %58 = arith.addf %57, %56 : vector<16x128xf32>
    %59 = arith.divf %57, %58 : vector<16x128xf32>
    %60 = vector.extract_strided_slice %53 {offsets = [0, 128], sizes = [16, 128], strides = [1, 1]} : vector<16x512xf32> to vector<16x128xf32>
    %61 = arith.negf %60 : vector<16x128xf32>
    %62 = math.exp %61 : vector<16x128xf32>
    %cst_25 = arith.constant 1.000000e+00 : f32
    %63 = vector.broadcast %cst_25 : f32 to vector<16x128xf32>
    %64 = arith.addf %63, %62 : vector<16x128xf32>
    %65 = arith.divf %63, %64 : vector<16x128xf32>
    %66 = vector.extract_strided_slice %53 {offsets = [0, 256], sizes = [16, 128], strides = [1, 1]} : vector<16x512xf32> to vector<16x128xf32>
    %67 = math.tanh %66 : vector<16x128xf32>
    %68 = vector.extract_strided_slice %53 {offsets = [0, 384], sizes = [16, 128], strides = [1, 1]} : vector<16x512xf32> to vector<16x128xf32>
    %69 = arith.negf %68 : vector<16x128xf32>
    %70 = math.exp %69 : vector<16x128xf32>
    %cst_26 = arith.constant 1.000000e+00 : f32
    %71 = vector.broadcast %cst_26 : f32 to vector<16x128xf32>
    %72 = arith.addf %71, %70 : vector<16x128xf32>
    %73 = arith.divf %71, %72 : vector<16x128xf32>
    %74 = arith.mulf %65, %40 : vector<16x128xf32>
    %75 = arith.mulf %59, %67 : vector<16x128xf32>
    %76 = arith.addf %74, %75 : vector<16x128xf32>
    %77 = math.tanh %76 : vector<16x128xf32>
    %78 = arith.mulf %73, %77 : vector<16x128xf32>
    %79 = arith.truncf %78 : vector<16x128xf32> to vector<16x128xbf16>
    %80 = arith.index_cast %c1_i32 : i32 to index
    %c0_27 = arith.constant 0 : index
    %c0_28 = arith.constant 0 : index
    %81 = vector.load %arg5[%80, %c0_27, %c0_28] : memref<8x16x128xbf16, #tpu.memory_space<vmem>>, vector<1x16x128xbf16>
    %82 = vector.shape_cast %81 : vector<1x16x128xbf16> to vector<16x128xbf16>
    %83 = vector.shape_cast %79 : vector<16x128xbf16> to vector<1x16x128xbf16>
    tpu.vector_store %arg5[%80, %c0_27, %c0_28], %83 {strides = array<i32>} : memref<8x16x128xbf16, #tpu.memory_space<vmem>>, vector<1x16x128xbf16>,
    %c2_i32 = arith.constant 2 : i32
    %84 = arith.index_cast %c2_i32 : i32 to index
    %c0_29 = arith.constant 0 : index
    %c0_30 = arith.constant 0 : index
    %85 = vector.load %arg6[%84, %c0_29, %c0_30] : memref<8x16x512xf32, #tpu.memory_space<vmem>>, vector<1x16x512xf32>
    %86 = vector.shape_cast %85 : vector<1x16x512xf32> to vector<16x512xf32>
    %87 = arith.truncf %78 : vector<16x128xf32> to vector<16x128xbf16>
    %cst_31 = arith.constant dense<0.000000e+00> : vector<16x512xf32>
    %88 = tpu.matmul %87, %9, %cst_31 {dimension_numbers = #tpu.dot_dimension_numbers<[1], [0], [0], [1], [0, 0, 1, 1], [], []>} : vector<16x128xbf16>, vector<128x512xbf16>, vector<16x512xf32> -> vector<16x512xf32>
    %89 = arith.addf %86, %88 : vector<16x512xf32>
    %90 = vector.extract_strided_slice %89 {offsets = [0, 0], sizes = [16, 128], strides = [1, 1]} : vector<16x512xf32> to vector<16x128xf32>
    %91 = arith.negf %90 : vector<16x128xf32>
    %92 = math.exp %91 : vector<16x128xf32>
    %cst_32 = arith.constant 1.000000e+00 : f32
    %93 = vector.broadcast %cst_32 : f32 to vector<16x128xf32>
    %94 = arith.addf %93, %92 : vector<16x128xf32>
    %95 = arith.divf %93, %94 : vector<16x128xf32>
    %96 = vector.extract_strided_slice %89 {offsets = [0, 128], sizes = [16, 128], strides = [1, 1]} : vector<16x512xf32> to vector<16x128xf32>
    %97 = arith.negf %96 : vector<16x128xf32>
    %98 = math.exp %97 : vector<16x128xf32>
    %cst_33 = arith.constant 1.000000e+00 : f32
    %99 = vector.broadcast %cst_33 : f32 to vector<16x128xf32>
    %100 = arith.addf %99, %98 : vector<16x128xf32>
    %101 = arith.divf %99, %100 : vector<16x128xf32>
    %102 = vector.extract_strided_slice %89 {offsets = [0, 256], sizes = [16, 128], strides = [1, 1]} : vector<16x512xf32> to vector<16x128xf32>
    %103 = math.tanh %102 : vector<16x128xf32>
    %104 = vector.extract_strided_slice %89 {offsets = [0, 384], sizes = [16, 128], strides = [1, 1]} : vector<16x512xf32> to vector<16x128xf32>
    %105 = arith.negf %104 : vector<16x128xf32>
    %106 = math.exp %105 : vector<16x128xf32>
    %cst_34 = arith.constant 1.000000e+00 : f32
    %107 = vector.broadcast %cst_34 : f32 to vector<16x128xf32>
    %108 = arith.addf %107, %106 : vector<16x128xf32>
    %109 = arith.divf %107, %108 : vector<16x128xf32>
    %110 = arith.mulf %101, %76 : vector<16x128xf32>
    %111 = arith.mulf %95, %103 : vector<16x128xf32>
    %112 = arith.addf %110, %111 : vector<16x128xf32>
    %113 = math.tanh %112 : vector<16x128xf32>
    %114 = arith.mulf %109, %113 : vector<16x128xf32>
    %115 = arith.truncf %114 : vector<16x128xf32> to vector<16x128xbf16>
    %116 = arith.index_cast %c2_i32 : i32 to index
    %c0_35 = arith.constant 0 : index
    %c0_36 = arith.constant 0 : index
    %117 = vector.load %arg5[%116, %c0_35, %c0_36] : memref<8x16x128xbf16, #tpu.memory_space<vmem>>, vector<1x16x128xbf16>
    %118 = vector.shape_cast %117 : vector<1x16x128xbf16> to vector<16x128xbf16>
    %119 = vector.shape_cast %115 : vector<16x128xbf16> to vector<1x16x128xbf16>
    tpu.vector_store %arg5[%116, %c0_35, %c0_36], %119 {strides = array<i32>} : memref<8x16x128xbf16, #tpu.memory_space<vmem>>, vector<1x16x128xbf16>,
    %c3_i32 = arith.constant 3 : i32
    %120 = arith.index_cast %c3_i32 : i32 to index
    %c0_37 = arith.constant 0 : index
    %c0_38 = arith.constant 0 : index
    %121 = vector.load %arg6[%120, %c0_37, %c0_38] : memref<8x16x512xf32, #tpu.memory_space<vmem>>, vector<1x16x512xf32>
    %122 = vector.shape_cast %121 : vector<1x16x512xf32> to vector<16x512xf32>
    %123 = arith.truncf %114 : vector<16x128xf32> to vector<16x128xbf16>
    %cst_39 = arith.constant dense<0.000000e+00> : vector<16x512xf32>
    %124 = tpu.matmul %123, %9, %cst_39 {dimension_numbers = #tpu.dot_dimension_numbers<[1], [0], [0], [1], [0, 0, 1, 1], [], []>} : vector<16x128xbf16>, vector<128x512xbf16>, vector<16x512xf32> -> vector<16x512xf32>
    %125 = arith.addf %122, %124 : vector<16x512xf32>
    %126 = vector.extract_strided_slice %125 {offsets = [0, 0], sizes = [16, 128], strides = [1, 1]} : vector<16x512xf32> to vector<16x128xf32>
    %127 = arith.negf %126 : vector<16x128xf32>
    %128 = math.exp %127 : vector<16x128xf32>
    %cst_40 = arith.constant 1.000000e+00 : f32
    %129 = vector.broadcast %cst_40 : f32 to vector<16x128xf32>
    %130 = arith.addf %129, %128 : vector<16x128xf32>
    %131 = arith.divf %129, %130 : vector<16x128xf32>
    %132 = vector.extract_strided_slice %125 {offsets = [0, 128], sizes = [16, 128], strides = [1, 1]} : vector<16x512xf32> to vector<16x128xf32>
    %133 = arith.negf %132 : vector<16x128xf32>
    %134 = math.exp %133 : vector<16x128xf32>
    %cst_41 = arith.constant 1.000000e+00 : f32
    %135 = vector.broadcast %cst_41 : f32 to vector<16x128xf32>
    %136 = arith.addf %135, %134 : vector<16x128xf32>
    %137 = arith.divf %135, %136 : vector<16x128xf32>
    %138 = vector.extract_strided_slice %125 {offsets = [0, 256], sizes = [16, 128], strides = [1, 1]} : vector<16x512xf32> to vector<16x128xf32>
    %139 = math.tanh %138 : vector<16x128xf32>
    %140 = vector.extract_strided_slice %125 {offsets = [0, 384], sizes = [16, 128], strides = [1, 1]} : vector<16x512xf32> to vector<16x128xf32>
    %141 = arith.negf %140 : vector<16x128xf32>
    %142 = math.exp %141 : vector<16x128xf32>
    %cst_42 = arith.constant 1.000000e+00 : f32
    %143 = vector.broadcast %cst_42 : f32 to vector<16x128xf32>
    %144 = arith.addf %143, %142 : vector<16x128xf32>
    %145 = arith.divf %143, %144 : vector<16x128xf32>
    %146 = arith.mulf %137, %112 : vector<16x128xf32>
    %147 = arith.mulf %131, %139 : vector<16x128xf32>
    %148 = arith.addf %146, %147 : vector<16x128xf32>
    %149 = math.tanh %148 : vector<16x128xf32>
    %150 = arith.mulf %145, %149 : vector<16x128xf32>
    %151 = arith.truncf %150 : vector<16x128xf32> to vector<16x128xbf16>
    %152 = arith.index_cast %c3_i32 : i32 to index
    %c0_43 = arith.constant 0 : index
    %c0_44 = arith.constant 0 : index
    %153 = vector.load %arg5[%152, %c0_43, %c0_44] : memref<8x16x128xbf16, #tpu.memory_space<vmem>>, vector<1x16x128xbf16>
    %154 = vector.shape_cast %153 : vector<1x16x128xbf16> to vector<16x128xbf16>
    %155 = vector.shape_cast %151 : vector<16x128xbf16> to vector<1x16x128xbf16>
    tpu.vector_store %arg5[%152, %c0_43, %c0_44], %155 {strides = array<i32>} : memref<8x16x128xbf16, #tpu.memory_space<vmem>>, vector<1x16x128xbf16>,
    %c4_i32 = arith.constant 4 : i32
    %156 = arith.index_cast %c4_i32 : i32 to index
    %c0_45 = arith.constant 0 : index
    %c0_46 = arith.constant 0 : index
    %157 = vector.load %arg6[%156, %c0_45, %c0_46] : memref<8x16x512xf32, #tpu.memory_space<vmem>>, vector<1x16x512xf32>
    %158 = vector.shape_cast %157 : vector<1x16x512xf32> to vector<16x512xf32>
    %159 = arith.truncf %150 : vector<16x128xf32> to vector<16x128xbf16>
    %cst_47 = arith.constant dense<0.000000e+00> : vector<16x512xf32>
    %160 = tpu.matmul %159, %9, %cst_47 {dimension_numbers = #tpu.dot_dimension_numbers<[1], [0], [0], [1], [0, 0, 1, 1], [], []>} : vector<16x128xbf16>, vector<128x512xbf16>, vector<16x512xf32> -> vector<16x512xf32>
    %161 = arith.addf %158, %160 : vector<16x512xf32>
    %162 = vector.extract_strided_slice %161 {offsets = [0, 0], sizes = [16, 128], strides = [1, 1]} : vector<16x512xf32> to vector<16x128xf32>
    %163 = arith.negf %162 : vector<16x128xf32>
    %164 = math.exp %163 : vector<16x128xf32>
    %cst_48 = arith.constant 1.000000e+00 : f32
    %165 = vector.broadcast %cst_48 : f32 to vector<16x128xf32>
    %166 = arith.addf %165, %164 : vector<16x128xf32>
    %167 = arith.divf %165, %166 : vector<16x128xf32>
    %168 = vector.extract_strided_slice %161 {offsets = [0, 128], sizes = [16, 128], strides = [1, 1]} : vector<16x512xf32> to vector<16x128xf32>
    %169 = arith.negf %168 : vector<16x128xf32>
    %170 = math.exp %169 : vector<16x128xf32>
    %cst_49 = arith.constant 1.000000e+00 : f32
    %171 = vector.broadcast %cst_49 : f32 to vector<16x128xf32>
    %172 = arith.addf %171, %170 : vector<16x128xf32>
    %173 = arith.divf %171, %172 : vector<16x128xf32>
    %174 = vector.extract_strided_slice %161 {offsets = [0, 256], sizes = [16, 128], strides = [1, 1]} : vector<16x512xf32> to vector<16x128xf32>
    %175 = math.tanh %174 : vector<16x128xf32>
    %176 = vector.extract_strided_slice %161 {offsets = [0, 384], sizes = [16, 128], strides = [1, 1]} : vector<16x512xf32> to vector<16x128xf32>
    %177 = arith.negf %176 : vector<16x128xf32>
    %178 = math.exp %177 : vector<16x128xf32>
    %cst_50 = arith.constant 1.000000e+00 : f32
    %179 = vector.broadcast %cst_50 : f32 to vector<16x128xf32>
    %180 = arith.addf %179, %178 : vector<16x128xf32>
    %181 = arith.divf %179, %180 : vector<16x128xf32>
    %182 = arith.mulf %173, %148 : vector<16x128xf32>
    %183 = arith.mulf %167, %175 : vector<16x128xf32>
    %184 = arith.addf %182, %183 : vector<16x128xf32>
    %185 = math.tanh %184 : vector<16x128xf32>
    %186 = arith.mulf %181, %185 : vector<16x128xf32>
    %187 = arith.truncf %186 : vector<16x128xf32> to vector<16x128xbf16>
    %188 = arith.index_cast %c4_i32 : i32 to index
    %c0_51 = arith.constant 0 : index
    %c0_52 = arith.constant 0 : index
    %189 = vector.load %arg5[%188, %c0_51, %c0_52] : memref<8x16x128xbf16, #tpu.memory_space<vmem>>, vector<1x16x128xbf16>
    %190 = vector.shape_cast %189 : vector<1x16x128xbf16> to vector<16x128xbf16>
    %191 = vector.shape_cast %187 : vector<16x128xbf16> to vector<1x16x128xbf16>
    tpu.vector_store %arg5[%188, %c0_51, %c0_52], %191 {strides = array<i32>} : memref<8x16x128xbf16, #tpu.memory_space<vmem>>, vector<1x16x128xbf16>,
    %c5_i32 = arith.constant 5 : i32
    %192 = arith.index_cast %c5_i32 : i32 to index
    %c0_53 = arith.constant 0 : index
    %c0_54 = arith.constant 0 : index
    %193 = vector.load %arg6[%192, %c0_53, %c0_54] : memref<8x16x512xf32, #tpu.memory_space<vmem>>, vector<1x16x512xf32>
    %194 = vector.shape_cast %193 : vector<1x16x512xf32> to vector<16x512xf32>
    %195 = arith.truncf %186 : vector<16x128xf32> to vector<16x128xbf16>
    %cst_55 = arith.constant dense<0.000000e+00> : vector<16x512xf32>
    %196 = tpu.matmul %195, %9, %cst_55 {dimension_numbers = #tpu.dot_dimension_numbers<[1], [0], [0], [1], [0, 0, 1, 1], [], []>} : vector<16x128xbf16>, vector<128x512xbf16>, vector<16x512xf32> -> vector<16x512xf32>
    %197 = arith.addf %194, %196 : vector<16x512xf32>
    %198 = vector.extract_strided_slice %197 {offsets = [0, 0], sizes = [16, 128], strides = [1, 1]} : vector<16x512xf32> to vector<16x128xf32>
    %199 = arith.negf %198 : vector<16x128xf32>
    %200 = math.exp %199 : vector<16x128xf32>
    %cst_56 = arith.constant 1.000000e+00 : f32
    %201 = vector.broadcast %cst_56 : f32 to vector<16x128xf32>
    %202 = arith.addf %201, %200 : vector<16x128xf32>
    %203 = arith.divf %201, %202 : vector<16x128xf32>
    %204 = vector.extract_strided_slice %197 {offsets = [0, 128], sizes = [16, 128], strides = [1, 1]} : vector<16x512xf32> to vector<16x128xf32>
    %205 = arith.negf %204 : vector<16x128xf32>
    %206 = math.exp %205 : vector<16x128xf32>
    %cst_57 = arith.constant 1.000000e+00 : f32
    %207 = vector.broadcast %cst_57 : f32 to vector<16x128xf32>
    %208 = arith.addf %207, %206 : vector<16x128xf32>
    %209 = arith.divf %207, %208 : vector<16x128xf32>
    %210 = vector.extract_strided_slice %197 {offsets = [0, 256], sizes = [16, 128], strides = [1, 1]} : vector<16x512xf32> to vector<16x128xf32>
    %211 = math.tanh %210 : vector<16x128xf32>
    %212 = vector.extract_strided_slice %197 {offsets = [0, 384], sizes = [16, 128], strides = [1, 1]} : vector<16x512xf32> to vector<16x128xf32>
    %213 = arith.negf %212 : vector<16x128xf32>
    %214 = math.exp %213 : vector<16x128xf32>
    %cst_58 = arith.constant 1.000000e+00 : f32
    %215 = vector.broadcast %cst_58 : f32 to vector<16x128xf32>
    %216 = arith.addf %215, %214 : vector<16x128xf32>
    %217 = arith.divf %215, %216 : vector<16x128xf32>
    %218 = arith.mulf %209, %184 : vector<16x128xf32>
    %219 = arith.mulf %203, %211 : vector<16x128xf32>
    %220 = arith.addf %218, %219 : vector<16x128xf32>
    %221 = math.tanh %220 : vector<16x128xf32>
    %222 = arith.mulf %217, %221 : vector<16x128xf32>
    %223 = arith.truncf %222 : vector<16x128xf32> to vector<16x128xbf16>
    %224 = arith.index_cast %c5_i32 : i32 to index
    %c0_59 = arith.constant 0 : index
    %c0_60 = arith.constant 0 : index
    %225 = vector.load %arg5[%224, %c0_59, %c0_60] : memref<8x16x128xbf16, #tpu.memory_space<vmem>>, vector<1x16x128xbf16>
    %226 = vector.shape_cast %225 : vector<1x16x128xbf16> to vector<16x128xbf16>
    %227 = vector.shape_cast %223 : vector<16x128xbf16> to vector<1x16x128xbf16>
    tpu.vector_store %arg5[%224, %c0_59, %c0_60], %227 {strides = array<i32>} : memref<8x16x128xbf16, #tpu.memory_space<vmem>>, vector<1x16x128xbf16>,
    %c6_i32 = arith.constant 6 : i32
    %228 = arith.index_cast %c6_i32 : i32 to index
    %c0_61 = arith.constant 0 : index
    %c0_62 = arith.constant 0 : index
    %229 = vector.load %arg6[%228, %c0_61, %c0_62] : memref<8x16x512xf32, #tpu.memory_space<vmem>>, vector<1x16x512xf32>
    %230 = vector.shape_cast %229 : vector<1x16x512xf32> to vector<16x512xf32>
    %231 = arith.truncf %222 : vector<16x128xf32> to vector<16x128xbf16>
    %cst_63 = arith.constant dense<0.000000e+00> : vector<16x512xf32>
    %232 = tpu.matmul %231, %9, %cst_63 {dimension_numbers = #tpu.dot_dimension_numbers<[1], [0], [0], [1], [0, 0, 1, 1], [], []>} : vector<16x128xbf16>, vector<128x512xbf16>, vector<16x512xf32> -> vector<16x512xf32>
    %233 = arith.addf %230, %232 : vector<16x512xf32>
    %234 = vector.extract_strided_slice %233 {offsets = [0, 0], sizes = [16, 128], strides = [1, 1]} : vector<16x512xf32> to vector<16x128xf32>
    %235 = arith.negf %234 : vector<16x128xf32>
    %236 = math.exp %235 : vector<16x128xf32>
    %cst_64 = arith.constant 1.000000e+00 : f32
    %237 = vector.broadcast %cst_64 : f32 to vector<16x128xf32>
    %238 = arith.addf %237, %236 : vector<16x128xf32>
    %239 = arith.divf %237, %238 : vector<16x128xf32>
    %240 = vector.extract_strided_slice %233 {offsets = [0, 128], sizes = [16, 128], strides = [1, 1]} : vector<16x512xf32> to vector<16x128xf32>
    %241 = arith.negf %240 : vector<16x128xf32>
    %242 = math.exp %241 : vector<16x128xf32>
    %cst_65 = arith.constant 1.000000e+00 : f32
    %243 = vector.broadcast %cst_65 : f32 to vector<16x128xf32>
    %244 = arith.addf %243, %242 : vector<16x128xf32>
    %245 = arith.divf %243, %244 : vector<16x128xf32>
    %246 = vector.extract_strided_slice %233 {offsets = [0, 256], sizes = [16, 128], strides = [1, 1]} : vector<16x512xf32> to vector<16x128xf32>
    %247 = math.tanh %246 : vector<16x128xf32>
    %248 = vector.extract_strided_slice %233 {offsets = [0, 384], sizes = [16, 128], strides = [1, 1]} : vector<16x512xf32> to vector<16x128xf32>
    %249 = arith.negf %248 : vector<16x128xf32>
    %250 = math.exp %249 : vector<16x128xf32>
    %cst_66 = arith.constant 1.000000e+00 : f32
    %251 = vector.broadcast %cst_66 : f32 to vector<16x128xf32>
    %252 = arith.addf %251, %250 : vector<16x128xf32>
    %253 = arith.divf %251, %252 : vector<16x128xf32>
    %254 = arith.mulf %245, %220 : vector<16x128xf32>
    %255 = arith.mulf %239, %247 : vector<16x128xf32>
    %256 = arith.addf %254, %255 : vector<16x128xf32>
    %257 = math.tanh %256 : vector<16x128xf32>
    %258 = arith.mulf %253, %257 : vector<16x128xf32>
    %259 = arith.truncf %258 : vector<16x128xf32> to vector<16x128xbf16>
    %260 = arith.index_cast %c6_i32 : i32 to index
    %c0_67 = arith.constant 0 : index
    %c0_68 = arith.constant 0 : index
    %261 = vector.load %arg5[%260, %c0_67, %c0_68] : memref<8x16x128xbf16, #tpu.memory_space<vmem>>, vector<1x16x128xbf16>
    %262 = vector.shape_cast %261 : vector<1x16x128xbf16> to vector<16x128xbf16>
    %263 = vector.shape_cast %259 : vector<16x128xbf16> to vector<1x16x128xbf16>
    tpu.vector_store %arg5[%260, %c0_67, %c0_68], %263 {strides = array<i32>} : memref<8x16x128xbf16, #tpu.memory_space<vmem>>, vector<1x16x128xbf16>,
    %c7_i32 = arith.constant 7 : i32
    %264 = arith.index_cast %c7_i32 : i32 to index
    %c0_69 = arith.constant 0 : index
    %c0_70 = arith.constant 0 : index
    %265 = vector.load %arg6[%264, %c0_69, %c0_70] : memref<8x16x512xf32, #tpu.memory_space<vmem>>, vector<1x16x512xf32>
    %266 = vector.shape_cast %265 : vector<1x16x512xf32> to vector<16x512xf32>
    %267 = arith.truncf %258 : vector<16x128xf32> to vector<16x128xbf16>
    %cst_71 = arith.constant dense<0.000000e+00> : vector<16x512xf32>
    %268 = tpu.matmul %267, %9, %cst_71 {dimension_numbers = #tpu.dot_dimension_numbers<[1], [0], [0], [1], [0, 0, 1, 1], [], []>} : vector<16x128xbf16>, vector<128x512xbf16>, vector<16x512xf32> -> vector<16x512xf32>
    %269 = arith.addf %266, %268 : vector<16x512xf32>
    %270 = vector.extract_strided_slice %269 {offsets = [0, 0], sizes = [16, 128], strides = [1, 1]} : vector<16x512xf32> to vector<16x128xf32>
    %271 = arith.negf %270 : vector<16x128xf32>
    %272 = math.exp %271 : vector<16x128xf32>
    %cst_72 = arith.constant 1.000000e+00 : f32
    %273 = vector.broadcast %cst_72 : f32 to vector<16x128xf32>
    %274 = arith.addf %273, %272 : vector<16x128xf32>
    %275 = arith.divf %273, %274 : vector<16x128xf32>
    %276 = vector.extract_strided_slice %269 {offsets = [0, 128], sizes = [16, 128], strides = [1, 1]} : vector<16x512xf32> to vector<16x128xf32>
    %277 = arith.negf %276 : vector<16x128xf32>
    %278 = math.exp %277 : vector<16x128xf32>
    %cst_73 = arith.constant 1.000000e+00 : f32
    %279 = vector.broadcast %cst_73 : f32 to vector<16x128xf32>
    %280 = arith.addf %279, %278 : vector<16x128xf32>
    %281 = arith.divf %279, %280 : vector<16x128xf32>
    %282 = vector.extract_strided_slice %269 {offsets = [0, 256], sizes = [16, 128], strides = [1, 1]} : vector<16x512xf32> to vector<16x128xf32>
    %283 = math.tanh %282 : vector<16x128xf32>
    %284 = vector.extract_strided_slice %269 {offsets = [0, 384], sizes = [16, 128], strides = [1, 1]} : vector<16x512xf32> to vector<16x128xf32>
    %285 = arith.negf %284 : vector<16x128xf32>
    %286 = math.exp %285 : vector<16x128xf32>
    %cst_74 = arith.constant 1.000000e+00 : f32
    %287 = vector.broadcast %cst_74 : f32 to vector<16x128xf32>
    %288 = arith.addf %287, %286 : vector<16x128xf32>
    %289 = arith.divf %287, %288 : vector<16x128xf32>
    %290 = arith.mulf %281, %256 : vector<16x128xf32>
    %291 = arith.mulf %275, %283 : vector<16x128xf32>
    %292 = arith.addf %290, %291 : vector<16x128xf32>
    %293 = math.tanh %292 : vector<16x128xf32>
    %294 = arith.mulf %289, %293 : vector<16x128xf32>
    %295 = arith.truncf %294 : vector<16x128xf32> to vector<16x128xbf16>
    %296 = arith.index_cast %c7_i32 : i32 to index
    %c0_75 = arith.constant 0 : index
    %c0_76 = arith.constant 0 : index
    %297 = vector.load %arg5[%296, %c0_75, %c0_76] : memref<8x16x128xbf16, #tpu.memory_space<vmem>>, vector<1x16x128xbf16>
    %298 = vector.shape_cast %297 : vector<1x16x128xbf16> to vector<16x128xbf16>
    %299 = vector.shape_cast %295 : vector<16x128xbf16> to vector<1x16x128xbf16>
    tpu.vector_store %arg5[%296, %c0_75, %c0_76], %299 {strides = array<i32>} : memref<8x16x128xbf16, #tpu.memory_space<vmem>>, vector<1x16x128xbf16>,
    %c8_i32 = arith.constant 8 : i32
    return
  }
  func.func @transform_0(%arg0: i32) -> (i32, i32, i32) {
    %c0_i32 = arith.constant 0 : i32
    %c0_i32_0 = arith.constant 0 : i32
    %c0_i32_1 = arith.constant 0 : i32
    %c0_i32_2 = arith.constant 0 : i32
    return %c0_i32, %c0_i32_0, %c0_i32_1 : i32, i32, i32
  }
  func.func @transform_1(%arg0: i32) -> (i32, i32) {
    %c0_i32 = arith.constant 0 : i32
    %c0_i32_0 = arith.constant 0 : i32
    %c0_i32_1 = arith.constant 0 : i32
    return %c0_i32, %c0_i32_0 : i32, i32
  }
  func.func @transform_2(%arg0: i32) -> (i32, i32) {
    %c0_i32 = arith.constant 0 : i32
    %c0_i32_0 = arith.constant 0 : i32
    %c0_i32_1 = arith.constant 0 : i32
    return %c0_i32, %c0_i32_0 : i32, i32
  }
  func.func @transform_3(%arg0: i32) -> (i32, i32) {
    %c0_i32 = arith.constant 0 : i32
    %c0_i32_0 = arith.constant 0 : i32
    %c0_i32_1 = arith.constant 0 : i32
    return %c0_i32, %c0_i32_0 : i32, i32
  }
  func.func @transform_4(%arg0: i32) -> (i32, i32, i32) {
    %c0_i32 = arith.constant 0 : i32
    %c0_i32_0 = arith.constant 0 : i32
    %c0_i32_1 = arith.constant 0 : i32
    %c0_i32_2 = arith.constant 0 : i32
    return %c0_i32, %c0_i32_0, %c0_i32_1 : i32, i32, i32
  }
}

</mosaic_0001>

<bundles_post_ra>
// kernel: lstm_network_forward.3
= control target key start
LH: loop header
LB: loop body
LE: loop exit
PB: predicated region body
PF: predicated region fallthrough
CT: control target
= control target key end

     0   :  { %v2806_v1 = vmov 0   ;;  %vm2808_vm0 = vmmov 0   ;;  %s3738_s1 = inlined_call_operand.vmem [shape: bf16[128,512], index: 1, kind: input, shape index: {}]   ;;  %s3739_s0 = inlined_call_operand.vmem [shape: bf16[8,16,128], index: 0, kind: input, shape index: {}]   ;;  %s3740_s2 = inlined_call_operand.vmem [shape: bf16[128,512], index: 2, kind: input, shape index: {}]   ;;  %s3741_s3 = inlined_call_operand.vmem [shape: f32[1,512], index: 3, kind: input, shape index: {}]   ;;  %s3742_s4 = inlined_call_operand.vmem [shape: bf16[128,128], index: 4, kind: input, shape index: {}]   ;;  %s3743_s5 = inlined_call_operand.vmem [shape: f32[1,128], index: 5, kind: input, shape index: {}]   ;;  %s3744_s6 = inlined_call_operand.vmem [shape: f32[16,128], index: 6, kind: output, shape index: {}]  }
   0x1   :  { %v2406_v0 = vld [vmem:[%s3738_s1 + $0x4] ss:$16 sps:$4 sm:$0xff]   ;;  %334 = vmatprep.mubr.bf16.mxu0 %v2806_v1  ;;  %447 = vmatprep.mubr.bf16.mxu1 %v2806_v1  ;;  %v2408_v2 = vld [vmem:[%s3738_s1 + $0xc] ss:$16 sps:$4 sm:$0xff]   ;;  %v2410_v3 = vld [vmem:[%s3738_s1] ss:$16 sps:$4 sm:$0xff]  }
   0x2   :  { %302 = vmatprep.subr.bf16.mxu0 %v2406_v0  ;;  %v2411_v4 = vld [vmem:[%s3738_s1 + $0x8] ss:$16 sps:$4 sm:$0xff]   ;;  %415 = vmatprep.subr.bf16.mxu1 %v2408_v2  ;;  %v2412_v5 = vld [vmem:[%s3738_s1 + $0x24] ss:$16 sps:$4 sm:$0xff]   ;;  %v2414_v6 = vld [vmem:[%s3738_s1 + $0x2c] ss:$16 sps:$4 sm:$0xff]  }
   0x3   :  { %303 = vmatpush1.bf16.msra.mxu0 %v2410_v3  ;;  %416 = vmatpush1.bf16.msra.mxu1 %v2411_v4  ;;  %v2416_v7 = vld [vmem:[%s3738_s1 + $0x20] ss:$16 sps:$4 sm:$0xff]   ;;  %v2417_v8 = vld [vmem:[%s3738_s1 + $0x28] ss:$16 sps:$4 sm:$0xff]   ;;  %v2418_v9 = vld [vmem:[%s3738_s1 + $0x44] ss:$16 sps:$4 sm:$0xff]  }
   0x4   :  { %304 = vmatprep.subr.bf16.mxu0 %v2412_v5  ;;  %417 = vmatprep.subr.bf16.mxu1 %v2414_v6  ;;  %v2420_v10 = vld [vmem:[%s3738_s1 + $0x4c] ss:$16 sps:$4 sm:$0xff]   ;;  %v2422_v11 = vld [vmem:[%s3738_s1 + $0x40] ss:$16 sps:$4 sm:$0xff]   ;;  %v2423_v12 = vld [vmem:[%s3738_s1 + $0x48] ss:$16 sps:$4 sm:$0xff]  }
   0x5   :  { %v2424_v13 = vld [vmem:[%s3738_s1 + $0x64] ss:$16 sps:$4 sm:$0xff]   ;;  %v2426_v14 = vld [vmem:[%s3738_s1 + $0x6c] ss:$16 sps:$4 sm:$0xff]   ;;  %v2428_v15 = vld [vmem:[%s3738_s1 + $0x60] ss:$16 sps:$4 sm:$0xff]  }
   0x6   :  { %v2429_v16 = vld [vmem:[%s3738_s1 + $0x68] ss:$16 sps:$4 sm:$0xff]   ;;  %v2430_v17 = vld [vmem:[%s3738_s1 + $0x84] ss:$16 sps:$4 sm:$0xff]   ;;  %v2432_v18 = vld [vmem:[%s3738_s1 + $0x8c] ss:$16 sps:$4 sm:$0xff]  }
   0x7   :  { %305 = vmatpush1.bf16.msra.mxu0 %v2416_v7  ;;  %418 = vmatpush1.bf16.msra.mxu1 %v2417_v8  ;;  %v2434_v19 = vld [vmem:[%s3738_s1 + $0x80] ss:$16 sps:$4 sm:$0xff]   ;;  %v2435_v20 = vld [vmem:[%s3738_s1 + $0x88] ss:$16 sps:$4 sm:$0xff]   ;;  %v2436_v21 = vld [vmem:[%s3738_s1 + $0xa4] ss:$16 sps:$4 sm:$0xff]  }
   0x8   :  { %306 = vmatprep.subr.bf16.mxu0 %v2418_v9  ;;  %419 = vmatprep.subr.bf16.mxu1 %v2420_v10  ;;  %v2438_v22 = vld [vmem:[%s3738_s1 + $0xac] ss:$16 sps:$4 sm:$0xff]   ;;  %v2440_v23 = vld [vmem:[%s3738_s1 + $0xa0] ss:$16 sps:$4 sm:$0xff]   ;;  %v2441_v24 = vld [vmem:[%s3738_s1 + $0xa8] ss:$16 sps:$4 sm:$0xff]   ;;  %v74_v10 = vlaneseq }
   0x9   :  { %v2442_v25 = vld [vmem:[%s3738_s1 + $0xc4] ss:$16 sps:$4 sm:$0xff]   ;;  %v2444_v26 = vld [vmem:[%s3738_s1 + $0xcc] ss:$16 sps:$4 sm:$0xff]   ;;  %v2446_v27 = vld [vmem:[%s3738_s1 + $0xc0] ss:$16 sps:$4 sm:$0xff]  }
   0xa   :  { %v2447_v28 = vld [vmem:[%s3738_s1 + $0xc8] ss:$16 sps:$4 sm:$0xff]   ;;  %v2448_v29 = vld [vmem:[%s3738_s1 + $0xe4] ss:$16 sps:$4 sm:$0xff]   ;;  %v2450_v30 = vld [vmem:[%s3738_s1 + $0xec] ss:$16 sps:$4 sm:$0xff]  }
   0xb   :  { %307 = vmatpush1.bf16.msra.mxu0 %v2422_v11  ;;  %420 = vmatpush1.bf16.msra.mxu1 %v2423_v12  ;;  %v2452_v31 = vld [vmem:[%s3738_s1 + $0xe0] ss:$16 sps:$4 sm:$0xff]   ;;  %v2453_v32 = vld [vmem:[%s3738_s1 + $0xe8] ss:$16 sps:$4 sm:$0xff]   ;;  %v2945_v33 = vld [vmem:[%s3740_s2 + $0x4] ss:$16 sps:$4 sm:$0xff]  }
   0xc   :  { %308 = vmatprep.subr.bf16.mxu0 %v2424_v13  ;;  %421 = vmatprep.subr.bf16.mxu1 %v2426_v14  ;;  %v2950_v34 = vld [vmem:[%s3740_s2 + $0xc] ss:$16 sps:$4 sm:$0xff]   ;;  %v2454_v35 = vld [vmem:[%s3739_s0] sm:$0xff]   ;;  %v2970_v38 = vld [vmem:[%s3740_s2 + $0x8] ss:$16 sps:$4 sm:$0xff]   ;;  %v75_v11 = vshrl.u32 %v74_v10, 7 }
   0xd   :  { %v2958_v36 = vld [vmem:[%s3740_s2] ss:$16 sps:$4 sm:$0xff]   ;;  %v2964_v37 = vld [vmem:[%s3740_s2 + $0x24] ss:$16 sps:$4 sm:$0xff]   ;;  %v2975_v39 = vld [vmem:[%s3740_s2 + $0x2c] ss:$16 sps:$4 sm:$0xff]  }
   0xe   :  { %v2982_v40 = vld [vmem:[%s3740_s2 + $0x20] ss:$16 sps:$4 sm:$0xff]   ;;  %v2989_v41 = vld [vmem:[%s3740_s2 + $0x44] ss:$16 sps:$4 sm:$0xff]   ;;  %v2995_v42 = vld [vmem:[%s3740_s2 + $0x28] ss:$16 sps:$4 sm:$0xff]  }
   0xf   :  { %309 = vmatpush1.bf16.msra.mxu0 %v2428_v15  ;;  %422 = vmatpush1.bf16.msra.mxu1 %v2429_v16  ;;  %v2458_v43 = vld [vmem:[%s3739_s0 + $0x8] sm:$0xff]   ;;  %v3005_v44 = vld [vmem:[%s3740_s2 + $0x40] ss:$16 sps:$4 sm:$0xff]   ;;  %v3010_v45 = vld [vmem:[%s3740_s2 + $0x64] ss:$16 sps:$4 sm:$0xff]   ;;  %v76_v12 = vsub.s32 0, %v75_v11 }
  0x10   :  { %310 = vmatprep.subr.bf16.mxu0 %v2430_v17  ;;  %423 = vmatprep.subr.bf16.mxu1 %v2432_v18  ;;  %v3016_v46 = vld [vmem:[%s3740_s2 + $0x4c] ss:$16 sps:$4 sm:$0xff]   ;;  %v3022_v47 = vld [vmem:[%s3740_s2 + $0x48] ss:$16 sps:$4 sm:$0xff]   ;;  %v3035_v49 = vld [vmem:[%s3740_s2 + $0x60] ss:$16 sps:$4 sm:$0xff]  }
  0x11   :  { %v3027_v48 = vld [vmem:[%s3740_s2 + $0x6c] ss:$16 sps:$4 sm:$0xff]   ;;  %v3041_v50 = vld [vmem:[%s3740_s2 + $0x84] ss:$16 sps:$4 sm:$0xff]   ;;  %v3048_v51 = vld [vmem:[%s3740_s2 + $0x68] ss:$16 sps:$4 sm:$0xff]  }
  0x12   :  { %v2464_v52 = vld [vmem:[%s3739_s0 + $0x10] sm:$0xff]   ;;  %v3063_v54 = vld [vmem:[%s3740_s2 + $0x8c] ss:$16 sps:$4 sm:$0xff]   ;;  %v3075_v56 = vld [vmem:[%s3740_s2 + $0x88] ss:$16 sps:$4 sm:$0xff]   ;;  %v80_v14 = vsub.s32 1, %v75_v11 }
  0x13   :  { %311 = vmatpush1.bf16.msra.mxu0 %v2434_v19  ;;  %424 = vmatpush1.bf16.msra.mxu1 %v2435_v20  ;;  %v3057_v53 = vld [vmem:[%s3740_s2 + $0x80] ss:$16 sps:$4 sm:$0xff]   ;;  %v3069_v55 = vld [vmem:[%s3740_s2 + $0xa4] ss:$16 sps:$4 sm:$0xff]   ;;  %v3080_v57 = vld [vmem:[%s3740_s2 + $0xac] ss:$16 sps:$4 sm:$0xff]  }
  0x14   :  { %312 = vmatprep.subr.bf16.mxu0 %v2436_v21  ;;  %425 = vmatprep.subr.bf16.mxu1 %v2438_v22  ;;  %v3088_v58 = vld [vmem:[%s3740_s2 + $0xa0] ss:$16 sps:$4 sm:$0xff]   ;;  %v3095_v59 = vld [vmem:[%s3740_s2 + $0xc4] ss:$16 sps:$4 sm:$0xff]   ;;  %v3101_v60 = vld [vmem:[%s3740_s2 + $0xa8] ss:$16 sps:$4 sm:$0xff]  }
  0x15   :  { %v2471_v61 = vld [vmem:[%s3739_s0 + $0x18] sm:$0xff]   ;;  %v3111_v62 = vld [vmem:[%s3740_s2 + $0xc0] ss:$16 sps:$4 sm:$0xff]   ;;  %v3123_v0 = vld [vmem:[%s3740_s2 + $0xe4] ss:$16 sps:$4 sm:$0xff]   ;;  %v88_v19 = vsub.s32 3, %v75_v11 }
  0x16   :  { %v3116_v63 = vld [vmem:[%s3740_s2 + $0xcc] ss:$16 sps:$4 sm:$0xff]   ;;  %v3128_v2 = vld [vmem:[%s3740_s2 + $0xc8] ss:$16 sps:$4 sm:$0xff]   ;;  %v3142_v4 = vld [vmem:[%s3740_s2 + $0xe0] ss:$16 sps:$4 sm:$0xff]  }
  0x17   :  { %313 = vmatpush1.bf16.msra.mxu0 %v2440_v23  ;;  %426 = vmatpush1.bf16.msra.mxu1 %v2441_v24  ;;  %v3133_v3 = vld [vmem:[%s3740_s2 + $0xec] ss:$16 sps:$4 sm:$0xff]   ;;  %v3149_v5 = vld [vmem:[%s3740_s2 + $0xe8] ss:$16 sps:$4 sm:$0xff]   ;;  %v2478_v6 = vld [vmem:[%s3739_s0 + $0x20] sm:$0xff]  }
  0x18   :  { %314 = vmatprep.subr.bf16.mxu0 %v2442_v25  ;;  %427 = vmatprep.subr.bf16.mxu1 %v2444_v26  ;;  %v2485_v7 = vld [vmem:[%s3739_s0 + $0x28] sm:$0xff]   ;;  %v2492_v8 = vld [vmem:[%s3739_s0 + $0x30] sm:$0xff]   ;;  %v2500_v9 = vld [vmem:[%s3739_s0 + $0x38] sm:$0xff]  }
  0x19   :  { %v72_v13 = vld [vmem:[%s3741_s3] sm:$0xf] }
  0x1a   :  { %v3215_v15 = vrot.slane %v72_v13, %v76_v12  ;;  %v3217_v16 = vrot.slane %v72_v13, %v80_v14 }
  0x1b   :  { %315 = vmatpush1.bf16.msra.mxu0 %v2446_v27  ;;  %428 = vmatpush1.bf16.msra.mxu1 %v2447_v28  ;;  %v84_v27 = vsub.s32 2, %v75_v11 }
  0x1c   :  { %316 = vmatprep.subr.bf16.mxu0 %v2448_v29  ;;  %429 = vmatprep.subr.bf16.mxu1 %v2450_v30 }
  0x1f   :  { %317 = vmatpush1.bf16.msra.mxu0 %v2452_v31  ;;  %430 = vmatpush1.bf16.msra.mxu1 %v2453_v32  ;;  %v3222_v32 = vrot.slane %v72_v13, %v88_v19 }
  0x20   :  { %792 = vmatprep.subr.bf16.mxu0 %v2945_v33  ;;  %835 = vmatprep.subr.bf16.mxu1 %v2950_v34 }
  0x22   :  { %335 = vmatmul.mubr.bf16.vlgmr.msra.gmra.mrb[0].mxu0 %v2454_v35  ;;  %448 = vmatmul.mubr.bf16.vlgmr.msra.gmra.mrb[0].mxu1 %v2454_v35 }
  0x23   :  { %793 = vmatpush1.bf16.msra.mxu0 %v2958_v36  ;;  %344 = vmatprep.mubr.bf16.mxu0 %v2806_v1 }
  0x24   :  { %457 = vmatprep.mubr.bf16.mxu1 %v2806_v1  ;;  %794 = vmatprep.subr.bf16.mxu0 %v2964_v37 }
  0x25   :  { %836 = vmatpush1.bf16.msra.mxu1 %v2970_v38 }
  0x26   :  { %837 = vmatprep.subr.bf16.mxu1 %v2975_v39 }
  0x27   :  { %795 = vmatpush1.bf16.msra.mxu0 %v2982_v40 }
  0x28   :  { %796 = vmatprep.subr.bf16.mxu0 %v2989_v41 }
  0x29   :  { %838 = vmatpush1.bf16.msra.mxu1 %v2995_v42 }
  0x2a   :  { %345 = vmatmul.mubr.bf16.gmra.mrb[4].mxu0 %v2458_v43  ;;  %458 = vmatmul.mubr.bf16.gmra.mrb[4].mxu1 %v2458_v43 }
  0x2b   :  { %354 = vmatprep.mubr.bf16.mxu0 %v2806_v1  ;;  %467 = vmatprep.mubr.bf16.mxu1 %v2806_v1 }
  0x2c   :  { %797 = vmatpush1.bf16.msra.mxu0 %v3005_v44  ;;  %839 = vmatprep.subr.bf16.mxu1 %v3016_v46 }
  0x2d   :  { %798 = vmatprep.subr.bf16.mxu0 %v3010_v45  ;;  %840 = vmatpush1.bf16.msra.mxu1 %v3022_v47 }
  0x2e   :  { %841 = vmatprep.subr.bf16.mxu1 %v3027_v48 }
  0x30   :  { %799 = vmatpush1.bf16.msra.mxu0 %v3035_v49 }
  0x31   :  { %800 = vmatprep.subr.bf16.mxu0 %v3041_v50  ;;  %842 = vmatpush1.bf16.msra.mxu1 %v3048_v51 }
  0x32   :  { %355 = vmatmul.mubr.bf16.gmra.mrb[8].mxu0 %v2464_v52  ;;  %468 = vmatmul.mubr.bf16.gmra.mrb[8].mxu1 %v2464_v52 }
  0x33   :  { %364 = vmatprep.mubr.bf16.mxu0 %v2806_v1  ;;  %477 = vmatprep.mubr.bf16.mxu1 %v2806_v1 }
  0x34   :  { %801 = vmatpush1.bf16.msra.mxu0 %v3057_v53  ;;  %843 = vmatprep.subr.bf16.mxu1 %v3063_v54 }
  0x35   :  { %802 = vmatprep.subr.bf16.mxu0 %v3069_v55  ;;  %844 = vmatpush1.bf16.msra.mxu1 %v3075_v56 }
  0x36   :  { %845 = vmatprep.subr.bf16.mxu1 %v3080_v57 }
  0x38   :  { %803 = vmatpush1.bf16.msra.mxu0 %v3088_v58 }
  0x39   :  { %804 = vmatprep.subr.bf16.mxu0 %v3095_v59  ;;  %846 = vmatpush1.bf16.msra.mxu1 %v3101_v60 }
  0x3a   :  { %365 = vmatmul.mubr.bf16.gmra.mrb[12].mxu0 %v2471_v61  ;;  %478 = vmatmul.mubr.bf16.gmra.mrb[12].mxu1 %v2471_v61  ;;  %v3225_v61 = vrot.slane %v72_v13, %v84_v27 }
  0x3b   :  { %374 = vmatprep.mubr.bf16.mxu0 %v2806_v1  ;;  %487 = vmatprep.mubr.bf16.mxu1 %v2806_v1 }
  0x3c   :  { %805 = vmatpush1.bf16.msra.mxu0 %v3111_v62  ;;  %847 = vmatprep.subr.bf16.mxu1 %v3116_v63 }
  0x3d   :  { %806 = vmatprep.subr.bf16.mxu0 %v3123_v0  ;;  %848 = vmatpush1.bf16.msra.mxu1 %v3128_v2 }
  0x3e   :  { %849 = vmatprep.subr.bf16.mxu1 %v3133_v3 }
  0x40   :  { %807 = vmatpush1.bf16.msra.mxu0 %v3142_v4 }
  0x41   :  { %850 = vmatpush1.bf16.msra.mxu1 %v3149_v5  ;;  %944 = vmatprep.subr.bf16.mxu0 %v2945_v33 }
  0x42   :  { %375 = vmatmul.mubr.bf16.gmra.mrb[16].mxu0 %v2478_v6  ;;  %488 = vmatmul.mubr.bf16.gmra.mrb[16].mxu1 %v2478_v6 }
  0x43   :  { %384 = vmatprep.mubr.bf16.mxu0 %v2806_v1  ;;  %497 = vmatprep.mubr.bf16.mxu1 %v2806_v1 }
  0x44   :  { %987 = vmatprep.subr.bf16.mxu1 %v2950_v34 }
  0x4a   :  { %385 = vmatmul.mubr.bf16.gmra.mrb[20].mxu0 %v2485_v7  ;;  %498 = vmatmul.mubr.bf16.gmra.mrb[20].mxu1 %v2485_v7 }
  0x4b   :  { %394 = vmatprep.mubr.bf16.mxu0 %v2806_v1  ;;  %507 = vmatprep.mubr.bf16.mxu1 %v2806_v1 }
  0x52   :  { %395 = vmatmul.mubr.bf16.gmra.mrb[24].mxu0 %v2492_v8  ;;  %508 = vmatmul.mubr.bf16.gmra.mrb[24].mxu1 %v2492_v8 }
  0x53   :  { %404 = vmatprep.mubr.bf16.mxu0 %v2806_v1  ;;  %517 = vmatprep.mubr.bf16.mxu1 %v2806_v1 }
  0x5a   :  { %405 = vmatmul.mubr.bf16.gmra.mrb[28].mxu0 %v2500_v9  ;;  %518 = vmatmul.mubr.bf16.gmra.mrb[28].mxu1 %v2500_v9 }
  0x5b   :  { %824 = vmatprep.mubr.bf16.mxu0 %v2806_v1  ;;  %867 = vmatprep.mubr.bf16.mxu1 %v2806_v1 }
  0x62   :  { %825 = vmatmul.mubr.bf16.vlgmr.msra.gmra.mrb[0].mxu0 %v2806_v1  ;;  %868 = vmatmul.mubr.bf16.vlgmr.msra.gmra.mrb[0].mxu1 %v2806_v1 }
  0x63   :  { %945 = vmatpush1.bf16.msra.mxu0 %v2958_v36  ;;  %988 = vmatpush1.bf16.msra.mxu1 %v2970_v38 }
  0x64   :  { %946 = vmatprep.subr.bf16.mxu0 %v2964_v37  ;;  %989 = vmatprep.subr.bf16.mxu1 %v2975_v39 }
  0x65   :  { %976 = vmatprep.mubr.bf16.mxu0 %v2806_v1  ;;  %1019 = vmatprep.mubr.bf16.mxu1 %v2806_v1 }
  0x67   :  { %947 = vmatpush1.bf16.msra.mxu0 %v2982_v40  ;;  %990 = vmatpush1.bf16.msra.mxu1 %v2995_v42 }
  0x68   :  { %948 = vmatprep.subr.bf16.mxu0 %v2989_v41  ;;  %991 = vmatprep.subr.bf16.mxu1 %v3016_v46 }
  0x6b   :  { %949 = vmatpush1.bf16.msra.mxu0 %v3005_v44  ;;  %992 = vmatpush1.bf16.msra.mxu1 %v3022_v47 }
  0x6c   :  { %950 = vmatprep.subr.bf16.mxu0 %v3010_v45  ;;  %993 = vmatprep.subr.bf16.mxu1 %v3027_v48 }
  0x6f   :  { %951 = vmatpush1.bf16.msra.mxu0 %v3035_v49  ;;  %994 = vmatpush1.bf16.msra.mxu1 %v3048_v51 }
  0x70   :  { %952 = vmatprep.subr.bf16.mxu0 %v3041_v50  ;;  %995 = vmatprep.subr.bf16.mxu1 %v3063_v54 }
  0x73   :  { %953 = vmatpush1.bf16.msra.mxu0 %v3057_v53  ;;  %996 = vmatpush1.bf16.msra.mxu1 %v3075_v56 }
  0x74   :  { %954 = vmatprep.subr.bf16.mxu0 %v3069_v55  ;;  %997 = vmatprep.subr.bf16.mxu1 %v3080_v57 }
  0x77   :  { %955 = vmatpush1.bf16.msra.mxu0 %v3088_v58  ;;  %998 = vmatpush1.bf16.msra.mxu1 %v3101_v60 }
  0x78   :  { %956 = vmatprep.subr.bf16.mxu0 %v3095_v59  ;;  %999 = vmatprep.subr.bf16.mxu1 %v3116_v63 }
  0x7b   :  { %957 = vmatpush1.bf16.msra.mxu0 %v3111_v62  ;;  %1000 = vmatpush1.bf16.msra.mxu1 %v3128_v2 }
  0x7c   :  { %958 = vmatprep.subr.bf16.mxu0 %v3123_v0  ;;  %1001 = vmatprep.subr.bf16.mxu1 %v3133_v3 }
  0x7f   :  { %959 = vmatpush1.bf16.msra.mxu0 %v3142_v4  ;;  %1002 = vmatpush1.bf16.msra.mxu1 %v3149_v5 }
  0x80   :  { %1096 = vmatprep.subr.bf16.mxu0 %v2945_v33  ;;  %1139 = vmatprep.subr.bf16.mxu1 %v2950_v34 }
 0x135   :  { %v826_v17 = vpop.f32.mrb[0].mxu0  ;;  %v869_v18 = vpop.f32.mrb[0].mxu1 }
 0x136   :  { %v2275_v20 = vadd.f32 %v826_v17, %v3215_v15  ;;  %v828_v21 = vpop.f32.mrb[1].mxu0  ;;  %v871_v22 = vpop.f32.mrb[1].mxu1  ;;  %v2307_v7 = vadd.f32 %v869_v18, %v3225_v61 }
 0x137   :  { %v2276_v23 = vadd.f32 %v828_v21, %v3217_v16  ;;  %v830_v24 = vpop.f32.mrb[2].mxu0  ;;  %v873_v25 = vpop.f32.mrb[2].mxu1  ;;  %v2308_v6 = vadd.f32 %v871_v22, %v3222_v32 }
 0x138   :  { %v2189_v26 = vmul.f32 -1.442695, %v2275_v20  ;;  %v2277_v28 = vadd.f32 %v830_v24, %v3215_v15  ;;  %v832_v29 = vpop.f32.mrb[3].mxu0  ;;  %v875_v30 = vpop.f32.mrb[3].mxu1  ;;  %v2309_v10 = vadd.f32 %v873_v25, %v3225_v61 }
 0x139   :  { %v2191_v31 = vmul.f32 -1.442695, %v2276_v23  ;;  %v2278_v35 = vadd.f32 %v832_v29, %v3217_v16  ;;  %v2193_v8 = vmul.f32 -1.442695, %v2308_v6  ;;  %v2310_v9 = vadd.f32 %v875_v30, %v3222_v32 }
 0x13a   :  { %2518 = vpow2.f32 %v2189_v26  ;;  %v2190_v43 = vmul.f32 -1.442695, %v2277_v28 }
 0x13b   :  { %2520 = vpow2.f32 %v2191_v31  ;;  %v2192_v52 = vmul.f32 -1.442695, %v2278_v35  ;;  %v2194_v17 = vmul.f32 -1.442695, %v2310_v9 }
 0x13c   :  { %2522 = vpow2.f32 %v2190_v43 }
 0x13d   :  { %2524 = vpow2.f32 %v2192_v52 }
 0x13e   :  { %2526 = vtanh.f32 %v2307_v7 }
 0x13f   :  { %2528 = vpow2.f32 %v2193_v8 }
 0x140   :  { %2530 = vtanh.f32 %v2309_v10 }
 0x144   :  { %v2519_v11 = vpop.eup %2518 }
 0x145   :  { %v2521_v12 = vpop.eup %2520  ;;  %v892_v14 = vadd.f32 1.0, %v2519_v11 }
 0x146   :  { %v904_v19 = vadd.f32 1.0, %v2521_v12  ;;  %v2523_v13 = vpop.eup %2522 }
 0x147   :  { %2532 = vrcp.f32 %v892_v14  ;;  %v893_v20 = vadd.f32 1.0, %v2523_v13  ;;  %v2525_v21 = vpop.eup %2524 }
 0x148   :  { %2534 = vrcp.f32 %v904_v19  ;;  %v905_v18 = vadd.f32 1.0, %v2525_v21  ;;  %v2527_v22 = vpop.eup %2526 }
 0x149   :  { %2536 = vpow2.f32 %v2194_v17  ;;  %v2529_v23 = vpop.eup %2528 }
 0x14a   :  { %2538 = vrcp.f32 %v893_v20  ;;  %v2531_v24 = vpop.eup %2530  ;;  %v918_v31 = vadd.f32 1.0, %v2529_v23 }
 0x14b   :  { %2540 = vrcp.f32 %v905_v18 }
 0x14c   :  { %2542 = vrcp.f32 %v918_v31 }
 0x151   :  { %v2533_v25 = vpop.eup %2532 }
 0x152   :  { %v2535_v26 = vpop.eup %2534  ;;  %v926_v27 = vmul.f32 %v2533_v25, %v2527_v22 }
 0x153   :  { %v2537_v28 = vpop.eup %2536  ;;  %v924_v29 = vmul.f32 0.0, %v2535_v26 }
 0x154   :  { %v2539_v30 = vpop.eup %2538  ;;  %v919_v6 = vadd.f32 1.0, %v2537_v28 }
 0x155   :  { %v3231_v35 = vadd.f32 %v926_v27, %v924_v29  ;;  %v927_v43 = vmul.f32 %v2539_v30, %v2531_v24  ;;  %v2541_v52 = vpop.eup %2540 }
 0x156   :  { %v925_v7 = vmul.f32 0.0, %v2541_v52  ;;  %v2543_v9 = vpop.eup %2542 }
 0x157   :  { %2544 = vtanh.f32 %v3231_v35 }
 0x158   :  { %v3234_v8 = vadd.f32 %v927_v43, %v925_v7  ;;  %2546 = vrcp.f32 %v919_v6 }
 0x15a   :  { %2548 = vtanh.f32 %v3234_v8 }
 0x161   :  { %v2545_v10 = vpop.eup %2544 }
 0x162   :  { %v2547_v11 = vpop.eup %2546  ;;  %v932_v14 = vmul.f32 %v2545_v10, %v2543_v9 }
 0x164   :  { %v2549_v12 = vpop.eup %2548 }
 0x165   :  { %v933_v17 = vmul.f32 %v2549_v12, %v2547_v11 }
 0x167   :  { %v943_v19 = vpack.c.bf16 %v933_v17, %v932_v14 }
 0x169   :  { %977 = vmatmul.mubr.bf16.vlgmr.msra.gmra.mrb[4].mxu0 %v943_v19  ;;  %1020 = vmatmul.mubr.bf16.vlgmr.msra.gmra.mrb[4].mxu1 %v943_v19 }
 0x16a   :  { %1097 = vmatpush1.bf16.msra.mxu0 %v2958_v36  ;;  %1140 = vmatpush1.bf16.msra.mxu1 %v2970_v38 }
 0x16b   :  { %1098 = vmatprep.subr.bf16.mxu0 %v2964_v37  ;;  %1141 = vmatprep.subr.bf16.mxu1 %v2975_v39 }
 0x16c   :  { %1128 = vmatprep.mubr.bf16.mxu0 %v2806_v1  ;;  %1171 = vmatprep.mubr.bf16.mxu1 %v2806_v1 }
 0x16e   :  { %1099 = vmatpush1.bf16.msra.mxu0 %v2982_v40  ;;  %1142 = vmatpush1.bf16.msra.mxu1 %v2995_v42 }
 0x16f   :  { %1100 = vmatprep.subr.bf16.mxu0 %v2989_v41  ;;  %1143 = vmatprep.subr.bf16.mxu1 %v3016_v46 }
 0x172   :  { %1101 = vmatpush1.bf16.msra.mxu0 %v3005_v44  ;;  %1144 = vmatpush1.bf16.msra.mxu1 %v3022_v47 }
 0x173   :  { %1102 = vmatprep.subr.bf16.mxu0 %v3010_v45  ;;  %1145 = vmatprep.subr.bf16.mxu1 %v3027_v48 }
 0x176   :  { %1103 = vmatpush1.bf16.msra.mxu0 %v3035_v49  ;;  %1146 = vmatpush1.bf16.msra.mxu1 %v3048_v51 }
 0x177   :  { %1104 = vmatprep.subr.bf16.mxu0 %v3041_v50  ;;  %1147 = vmatprep.subr.bf16.mxu1 %v3063_v54 }
 0x17a   :  { %1105 = vmatpush1.bf16.msra.mxu0 %v3057_v53  ;;  %1148 = vmatpush1.bf16.msra.mxu1 %v3075_v56 }
 0x17b   :  { %1106 = vmatprep.subr.bf16.mxu0 %v3069_v55  ;;  %1149 = vmatprep.subr.bf16.mxu1 %v3080_v57 }
 0x17e   :  { %1107 = vmatpush1.bf16.msra.mxu0 %v3088_v58  ;;  %1150 = vmatpush1.bf16.msra.mxu1 %v3101_v60 }
 0x17f   :  { %1108 = vmatprep.subr.bf16.mxu0 %v3095_v59  ;;  %1151 = vmatprep.subr.bf16.mxu1 %v3116_v63 }
 0x182   :  { %1109 = vmatpush1.bf16.msra.mxu0 %v3111_v62  ;;  %1152 = vmatpush1.bf16.msra.mxu1 %v3128_v2 }
 0x183   :  { %1110 = vmatprep.subr.bf16.mxu0 %v3123_v0  ;;  %1153 = vmatprep.subr.bf16.mxu1 %v3133_v3 }
 0x186   :  { %1111 = vmatpush1.bf16.msra.mxu0 %v3142_v4  ;;  %1154 = vmatpush1.bf16.msra.mxu1 %v3149_v5 }
 0x187   :  { %1248 = vmatprep.subr.bf16.mxu0 %v2945_v33  ;;  %1291 = vmatprep.subr.bf16.mxu1 %v2950_v34 }
 0x23c   :  { %v978_v13 = vpop.f32.mrb[4].mxu0  ;;  %v1021_v20 = vpop.f32.mrb[4].mxu1 }
 0x23d   :  { %v2279_v21 = vadd.f32 %v978_v13, %v3215_v15  ;;  %v980_v18 = vpop.f32.mrb[5].mxu0  ;;  %v1023_v22 = vpop.f32.mrb[5].mxu1  ;;  %v2311_v7 = vadd.f32 %v1021_v20, %v3225_v61 }
 0x23e   :  { %v2280_v23 = vadd.f32 %v980_v18, %v3217_v16  ;;  %v982_v24 = vpop.f32.mrb[6].mxu0  ;;  %v1025_v25 = vpop.f32.mrb[6].mxu1  ;;  %v2312_v6 = vadd.f32 %v1023_v22, %v3222_v32 }
 0x23f   :  { %v2195_v26 = vmul.f32 -1.442695, %v2279_v21  ;;  %v2281_v27 = vadd.f32 %v982_v24, %v3215_v15  ;;  %v984_v28 = vpop.f32.mrb[7].mxu0  ;;  %v1027_v29 = vpop.f32.mrb[7].mxu1  ;;  %v2313_v11 = vadd.f32 %v1025_v25, %v3225_v61 }
 0x240   :  { %v2197_v30 = vmul.f32 -1.442695, %v2280_v23  ;;  %v2282_v31 = vadd.f32 %v984_v28, %v3217_v16  ;;  %v2199_v9 = vmul.f32 -1.442695, %v2312_v6  ;;  %v2314_v10 = vadd.f32 %v1027_v29, %v3222_v32 }
 0x241   :  { %2550 = vpow2.f32 %v2195_v26  ;;  %v2196_v43 = vmul.f32 -1.442695, %v2281_v27 }
 0x242   :  { %2552 = vpow2.f32 %v2197_v30  ;;  %v2198_v52 = vmul.f32 -1.442695, %v2282_v31  ;;  %v2200_v19 = vmul.f32 -1.442695, %v2314_v10 }
 0x243   :  { %2554 = vpow2.f32 %v2196_v43 }
 0x244   :  { %2556 = vpow2.f32 %v2198_v52 }
 0x245   :  { %2558 = vtanh.f32 %v2311_v7 }
 0x246   :  { %2560 = vpow2.f32 %v2199_v9 }
 0x247   :  { %2562 = vtanh.f32 %v2313_v11 }
 0x24b   :  { %v2551_v12 = vpop.eup %2550 }
 0x24c   :  { %v2553_v14 = vpop.eup %2552  ;;  %v1044_v17 = vadd.f32 1.0, %v2551_v12 }
 0x24d   :  { %v1056_v13 = vadd.f32 1.0, %v2553_v14  ;;  %v2555_v21 = vpop.eup %2554 }
 0x24e   :  { %2564 = vrcp.f32 %v1044_v17  ;;  %v1045_v18 = vadd.f32 1.0, %v2555_v21  ;;  %v2557_v22 = vpop.eup %2556 }
 0x24f   :  { %2566 = vrcp.f32 %v1056_v13  ;;  %v1057_v20 = vadd.f32 1.0, %v2557_v22  ;;  %v2559_v23 = vpop.eup %2558 }
 0x250   :  { %2568 = vpow2.f32 %v2200_v19  ;;  %v2561_v24 = vpop.eup %2560 }
 0x251   :  { %2570 = vrcp.f32 %v1045_v18  ;;  %v2563_v25 = vpop.eup %2562  ;;  %v1070_v43 = vadd.f32 1.0, %v2561_v24 }
 0x252   :  { %2572 = vrcp.f32 %v1057_v20 }
 0x253   :  { %2574 = vrcp.f32 %v1070_v43 }
 0x258   :  { %v2565_v26 = vpop.eup %2564 }
 0x259   :  { %v2567_v27 = vpop.eup %2566  ;;  %v1078_v28 = vmul.f32 %v2565_v26, %v2559_v23 }
 0x25a   :  { %v2569_v29 = vpop.eup %2568  ;;  %v1076_v30 = vmul.f32 %v2567_v27, %v3231_v35 }
 0x25b   :  { %v2571_v31 = vpop.eup %2570  ;;  %v1071_v9 = vadd.f32 1.0, %v2569_v29 }
 0x25c   :  { %v3280_v52 = vadd.f32 %v1078_v28, %v1076_v30  ;;  %v1079_v6 = vmul.f32 %v2571_v31, %v2563_v25  ;;  %v2573_v7 = vpop.eup %2572 }
 0x25d   :  { %v1077_v10 = vmul.f32 %v2573_v7, %v3234_v8  ;;  %v2575_v12 = vpop.eup %2574 }
 0x25e   :  { %2576 = vtanh.f32 %v3280_v52 }
 0x25f   :  { %v3284_v11 = vadd.f32 %v1079_v6, %v1077_v10  ;;  %2578 = vrcp.f32 %v1071_v9 }
 0x261   :  { %2580 = vtanh.f32 %v3284_v11 }
 0x268   :  { %v2577_v14 = vpop.eup %2576 }
 0x269   :  { %v2579_v35 = vpop.eup %2578  ;;  %v1084_v19 = vmul.f32 %v2577_v14, %v2575_v12 }
 0x26b   :  { %v2581_v17 = vpop.eup %2580 }
 0x26c   :  { %v1085_v13 = vmul.f32 %v2581_v17, %v2579_v35 }
 0x26e   :  { %v1095_v21 = vpack.c.bf16 %v1085_v13, %v1084_v19 }
 0x270   :  { %1129 = vmatmul.mubr.bf16.vlgmr.msra.gmra.mrb[8].mxu0 %v1095_v21  ;;  %1172 = vmatmul.mubr.bf16.vlgmr.msra.gmra.mrb[8].mxu1 %v1095_v21 }
 0x271   :  { %1249 = vmatpush1.bf16.msra.mxu0 %v2958_v36  ;;  %1292 = vmatpush1.bf16.msra.mxu1 %v2970_v38 }
 0x272   :  { %1250 = vmatprep.subr.bf16.mxu0 %v2964_v37  ;;  %1293 = vmatprep.subr.bf16.mxu1 %v2975_v39 }
 0x273   :  { %1280 = vmatprep.mubr.bf16.mxu0 %v2806_v1  ;;  %1323 = vmatprep.mubr.bf16.mxu1 %v2806_v1 }
 0x275   :  { %1251 = vmatpush1.bf16.msra.mxu0 %v2982_v40  ;;  %1294 = vmatpush1.bf16.msra.mxu1 %v2995_v42 }
 0x276   :  { %1252 = vmatprep.subr.bf16.mxu0 %v2989_v41  ;;  %1295 = vmatprep.subr.bf16.mxu1 %v3016_v46 }
 0x279   :  { %1253 = vmatpush1.bf16.msra.mxu0 %v3005_v44  ;;  %1296 = vmatpush1.bf16.msra.mxu1 %v3022_v47 }
 0x27a   :  { %1254 = vmatprep.subr.bf16.mxu0 %v3010_v45  ;;  %1297 = vmatprep.subr.bf16.mxu1 %v3027_v48 }
 0x27d   :  { %1255 = vmatpush1.bf16.msra.mxu0 %v3035_v49  ;;  %1298 = vmatpush1.bf16.msra.mxu1 %v3048_v51 }
 0x27e   :  { %1256 = vmatprep.subr.bf16.mxu0 %v3041_v50  ;;  %1299 = vmatprep.subr.bf16.mxu1 %v3063_v54 }
 0x281   :  { %1257 = vmatpush1.bf16.msra.mxu0 %v3057_v53  ;;  %1300 = vmatpush1.bf16.msra.mxu1 %v3075_v56 }
 0x282   :  { %1258 = vmatprep.subr.bf16.mxu0 %v3069_v55  ;;  %1301 = vmatprep.subr.bf16.mxu1 %v3080_v57 }
 0x285   :  { %1259 = vmatpush1.bf16.msra.mxu0 %v3088_v58  ;;  %1302 = vmatpush1.bf16.msra.mxu1 %v3101_v60 }
 0x286   :  { %1260 = vmatprep.subr.bf16.mxu0 %v3095_v59  ;;  %1303 = vmatprep.subr.bf16.mxu1 %v3116_v63 }
 0x289   :  { %1261 = vmatpush1.bf16.msra.mxu0 %v3111_v62  ;;  %1304 = vmatpush1.bf16.msra.mxu1 %v3128_v2 }
 0x28a   :  { %1262 = vmatprep.subr.bf16.mxu0 %v3123_v0  ;;  %1305 = vmatprep.subr.bf16.mxu1 %v3133_v3 }
 0x28d   :  { %1263 = vmatpush1.bf16.msra.mxu0 %v3142_v4  ;;  %1306 = vmatpush1.bf16.msra.mxu1 %v3149_v5 }
 0x28e   :  { %1400 = vmatprep.subr.bf16.mxu0 %v2945_v33  ;;  %1443 = vmatprep.subr.bf16.mxu1 %v2950_v34 }
 0x343   :  { %v1130_v8 = vpop.f32.mrb[8].mxu0  ;;  %v1173_v18 = vpop.f32.mrb[8].mxu1 }
 0x344   :  { %v2283_v22 = vadd.f32 %v1130_v8, %v3215_v15  ;;  %v1132_v20 = vpop.f32.mrb[9].mxu0  ;;  %v1175_v23 = vpop.f32.mrb[9].mxu1  ;;  %v2315_v10 = vadd.f32 %v1173_v18, %v3225_v61 }
 0x345   :  { %v2284_v24 = vadd.f32 %v1132_v20, %v3217_v16  ;;  %v1134_v25 = vpop.f32.mrb[10].mxu0  ;;  %v1177_v26 = vpop.f32.mrb[10].mxu1  ;;  %v2316_v9 = vadd.f32 %v1175_v23, %v3222_v32 }
 0x346   :  { %v2201_v27 = vmul.f32 -1.442695, %v2283_v22  ;;  %v2285_v28 = vadd.f32 %v1134_v25, %v3215_v15  ;;  %v1136_v29 = vpop.f32.mrb[11].mxu0  ;;  %v1179_v30 = vpop.f32.mrb[11].mxu1  ;;  %v2317_v35 = vadd.f32 %v1177_v26, %v3225_v61 }
 0x347   :  { %v2203_v31 = vmul.f32 -1.442695, %v2284_v24  ;;  %v2286_v43 = vadd.f32 %v1136_v29, %v3217_v16  ;;  %v2205_v12 = vmul.f32 -1.442695, %v2316_v9  ;;  %v2318_v14 = vadd.f32 %v1179_v30, %v3222_v32 }
 0x348   :  { %2582 = vpow2.f32 %v2201_v27  ;;  %v2202_v6 = vmul.f32 -1.442695, %v2285_v28 }
 0x349   :  { %2584 = vpow2.f32 %v2203_v31  ;;  %v2204_v7 = vmul.f32 -1.442695, %v2286_v43  ;;  %v2206_v21 = vmul.f32 -1.442695, %v2318_v14 }
 0x34a   :  { %2586 = vpow2.f32 %v2202_v6 }
 0x34b   :  { %2588 = vpow2.f32 %v2204_v7 }
 0x34c   :  { %2590 = vtanh.f32 %v2315_v10 }
 0x34d   :  { %2592 = vpow2.f32 %v2205_v12 }
 0x34e   :  { %2594 = vtanh.f32 %v2317_v35 }
 0x352   :  { %v2583_v17 = vpop.eup %2582 }
 0x353   :  { %v2585_v19 = vpop.eup %2584  ;;  %v1196_v13 = vadd.f32 1.0, %v2583_v17 }
 0x354   :  { %v1208_v8 = vadd.f32 1.0, %v2585_v19  ;;  %v2587_v22 = vpop.eup %2586 }
 0x355   :  { %2596 = vrcp.f32 %v1196_v13  ;;  %v1197_v20 = vadd.f32 1.0, %v2587_v22  ;;  %v2589_v23 = vpop.eup %2588 }
 0x356   :  { %2598 = vrcp.f32 %v1208_v8  ;;  %v1209_v18 = vadd.f32 1.0, %v2589_v23  ;;  %v2591_v24 = vpop.eup %2590 }
 0x357   :  { %2600 = vpow2.f32 %v2206_v21  ;;  %v2593_v25 = vpop.eup %2592 }
 0x358   :  { %2602 = vrcp.f32 %v1197_v20  ;;  %v2595_v26 = vpop.eup %2594  ;;  %v1222_v6 = vadd.f32 1.0, %v2593_v25 }
 0x359   :  { %2604 = vrcp.f32 %v1209_v18 }
 0x35a   :  { %2606 = vrcp.f32 %v1222_v6 }
 0x35f   :  { %v2597_v27 = vpop.eup %2596 }
 0x360   :  { %v2599_v28 = vpop.eup %2598  ;;  %v1230_v29 = vmul.f32 %v2597_v27, %v2591_v24 }
 0x361   :  { %v2601_v30 = vpop.eup %2600  ;;  %v1228_v31 = vmul.f32 %v2599_v28, %v3280_v52 }
 0x362   :  { %v2603_v43 = vpop.eup %2602  ;;  %v1223_v12 = vadd.f32 1.0, %v2601_v30 }
 0x363   :  { %v3330_v7 = vadd.f32 %v1230_v29, %v1228_v31  ;;  %v1231_v9 = vmul.f32 %v2603_v43, %v2595_v26  ;;  %v2605_v10 = vpop.eup %2604 }
 0x364   :  { %v1229_v14 = vmul.f32 %v2605_v10, %v3284_v11  ;;  %v2607_v17 = vpop.eup %2606 }
 0x365   :  { %2608 = vtanh.f32 %v3330_v7 }
 0x366   :  { %v3334_v35 = vadd.f32 %v1231_v9, %v1229_v14  ;;  %2610 = vrcp.f32 %v1223_v12 }
 0x368   :  { %2612 = vtanh.f32 %v3334_v35 }
 0x36f   :  { %v2609_v19 = vpop.eup %2608 }
 0x370   :  { %v2611_v52 = vpop.eup %2610  ;;  %v1236_v21 = vmul.f32 %v2609_v19, %v2607_v17 }
 0x372   :  { %v2613_v13 = vpop.eup %2612 }
 0x373   :  { %v1237_v8 = vmul.f32 %v2613_v13, %v2611_v52 }
 0x375   :  { %v1247_v22 = vpack.c.bf16 %v1237_v8, %v1236_v21 }
 0x377   :  { %1281 = vmatmul.mubr.bf16.vlgmr.msra.gmra.mrb[12].mxu0 %v1247_v22  ;;  %1324 = vmatmul.mubr.bf16.vlgmr.msra.gmra.mrb[12].mxu1 %v1247_v22 }
 0x378   :  { %1401 = vmatpush1.bf16.msra.mxu0 %v2958_v36  ;;  %1444 = vmatpush1.bf16.msra.mxu1 %v2970_v38 }
 0x379   :  { %1402 = vmatprep.subr.bf16.mxu0 %v2964_v37  ;;  %1445 = vmatprep.subr.bf16.mxu1 %v2975_v39 }
 0x37a   :  { %1432 = vmatprep.mubr.bf16.mxu0 %v2806_v1  ;;  %1475 = vmatprep.mubr.bf16.mxu1 %v2806_v1 }
 0x37c   :  { %1403 = vmatpush1.bf16.msra.mxu0 %v2982_v40  ;;  %1446 = vmatpush1.bf16.msra.mxu1 %v2995_v42 }
 0x37d   :  { %1404 = vmatprep.subr.bf16.mxu0 %v2989_v41  ;;  %1447 = vmatprep.subr.bf16.mxu1 %v3016_v46 }
 0x380   :  { %1405 = vmatpush1.bf16.msra.mxu0 %v3005_v44  ;;  %1448 = vmatpush1.bf16.msra.mxu1 %v3022_v47 }
 0x381   :  { %1406 = vmatprep.subr.bf16.mxu0 %v3010_v45  ;;  %1449 = vmatprep.subr.bf16.mxu1 %v3027_v48 }
 0x384   :  { %1407 = vmatpush1.bf16.msra.mxu0 %v3035_v49  ;;  %1450 = vmatpush1.bf16.msra.mxu1 %v3048_v51 }
 0x385   :  { %1408 = vmatprep.subr.bf16.mxu0 %v3041_v50  ;;  %1451 = vmatprep.subr.bf16.mxu1 %v3063_v54 }
 0x388   :  { %1409 = vmatpush1.bf16.msra.mxu0 %v3057_v53  ;;  %1452 = vmatpush1.bf16.msra.mxu1 %v3075_v56 }
 0x389   :  { %1410 = vmatprep.subr.bf16.mxu0 %v3069_v55  ;;  %1453 = vmatprep.subr.bf16.mxu1 %v3080_v57 }
 0x38c   :  { %1411 = vmatpush1.bf16.msra.mxu0 %v3088_v58  ;;  %1454 = vmatpush1.bf16.msra.mxu1 %v3101_v60 }
 0x38d   :  { %1412 = vmatprep.subr.bf16.mxu0 %v3095_v59  ;;  %1455 = vmatprep.subr.bf16.mxu1 %v3116_v63 }
 0x390   :  { %1413 = vmatpush1.bf16.msra.mxu0 %v3111_v62  ;;  %1456 = vmatpush1.bf16.msra.mxu1 %v3128_v2 }
 0x391   :  { %1414 = vmatprep.subr.bf16.mxu0 %v3123_v0  ;;  %1457 = vmatprep.subr.bf16.mxu1 %v3133_v3 }
 0x394   :  { %1415 = vmatpush1.bf16.msra.mxu0 %v3142_v4  ;;  %1458 = vmatpush1.bf16.msra.mxu1 %v3149_v5 }
 0x395   :  { %1552 = vmatprep.subr.bf16.mxu0 %v2945_v33  ;;  %1595 = vmatprep.subr.bf16.mxu1 %v2950_v34 }
 0x44a   :  { %v1282_v36 = vpop.f32.mrb[12].mxu0  ;;  %v1325_v37 = vpop.f32.mrb[12].mxu1 }
 0x44b   :  { %v2287_v38 = vadd.f32 %v1282_v36, %v3215_v15  ;;  %v1284_v39 = vpop.f32.mrb[13].mxu0  ;;  %v1327_v40 = vpop.f32.mrb[13].mxu1  ;;  %v2319_v53 = vadd.f32 %v1325_v37, %v3225_v61 }
 0x44c   :  { %v2288_v41 = vadd.f32 %v1284_v39, %v3217_v16  ;;  %v1286_v42 = vpop.f32.mrb[14].mxu0  ;;  %v1329_v44 = vpop.f32.mrb[14].mxu1  ;;  %v2320_v51 = vadd.f32 %v1327_v40, %v3222_v32 }
 0x44d   :  { %v2207_v45 = vmul.f32 -1.442695, %v2287_v38  ;;  %v2289_v46 = vadd.f32 %v1286_v42, %v3215_v15  ;;  %v1288_v47 = vpop.f32.mrb[15].mxu0  ;;  %v1331_v48 = vpop.f32.mrb[15].mxu1  ;;  %v2321_v11 = vadd.f32 %v1329_v44, %v3225_v61  ;;  %v3396_v44 = vld [vmem:[%s3740_s2 + $0x8] ss:$16 sps:$4 sm:$0xff]  }
 0x44e   :  { %v2209_v49 = vmul.f32 -1.442695, %v2288_v41  ;;  %v2290_v33 = vadd.f32 %v1288_v47, %v3217_v16  ;;  %v2211_v54 = vmul.f32 -1.442695, %v2320_v51  ;;  %v2322_v55 = vadd.f32 %v1331_v48, %v3222_v32  ;;  %v3416_v47 = vld [vmem:[%s3740_s2 + $0x20] ss:$16 sps:$4 sm:$0xff]  }
 0x44f   :  { %2614 = vpow2.f32 %v2207_v45  ;;  %v2208_v34 = vmul.f32 -1.442695, %v2289_v46  ;;  %v3402_v45 = vld [vmem:[%s3740_s2 + $0x24] ss:$16 sps:$4 sm:$0xff]   ;;  %v3408_v46 = vld [vmem:[%s3740_s2 + $0x2c] ss:$16 sps:$4 sm:$0xff]  }
 0x450   :  { %2616 = vpow2.f32 %v2209_v49  ;;  %v2210_v50 = vmul.f32 -1.442695, %v2290_v33  ;;  %v2212_v24 = vmul.f32 -1.442695, %v2322_v55  ;;  %v3422_v48 = vld [vmem:[%s3740_s2 + $0x28] ss:$16 sps:$4 sm:$0xff]  }
 0x451   :  { %2618 = vpow2.f32 %v2208_v34  ;;  %v3428_v49 = vld [vmem:[%s3740_s2 + $0x44] ss:$16 sps:$4 sm:$0xff]   ;;  %v3434_v33 = vld [vmem:[%s3740_s2 + $0x4c] ss:$16 sps:$4 sm:$0xff]   ;;  %v3440_v34 = vld [vmem:[%s3740_s2 + $0x40] ss:$16 sps:$4 sm:$0xff]  }
 0x452   :  { %2620 = vpow2.f32 %v2210_v50  ;;  %v3446_v50 = vld [vmem:[%s3740_s2 + $0x48] ss:$16 sps:$4 sm:$0xff]   ;;  %v3452_v51 = vld [vmem:[%s3740_s2 + $0x64] ss:$16 sps:$4 sm:$0xff]  }
 0x453   :  { %2622 = vtanh.f32 %v2319_v53  ;;  %v3458_v53 = vld [vmem:[%s3740_s2 + $0x6c] ss:$16 sps:$4 sm:$0xff]   ;;  %v3470_v55 = vld [vmem:[%s3740_s2 + $0x68] ss:$16 sps:$4 sm:$0xff]  }
 0x454   :  { %2624 = vpow2.f32 %v2211_v54  ;;  %v3464_v54 = vld [vmem:[%s3740_s2 + $0x60] ss:$16 sps:$4 sm:$0xff]  }
 0x455   :  { %2626 = vtanh.f32 %v2321_v11  ;;  %v3476_v11 = vld [vmem:[%s3740_s2 + $0x84] ss:$16 sps:$4 sm:$0xff]  }
 0x459   :  { %v2615_v20 = vpop.eup %2614 }
 0x45a   :  { %v2617_v23 = vpop.eup %2616  ;;  %v1348_v18 = vadd.f32 1.0, %v2615_v20  ;;  %v3482_v20 = vld [vmem:[%s3740_s2 + $0x8c] ss:$16 sps:$4 sm:$0xff]  }
 0x45b   :  { %v1360_v25 = vadd.f32 1.0, %v2617_v23  ;;  %v2619_v26 = vpop.eup %2618  ;;  %v3488_v23 = vld [vmem:[%s3740_s2 + $0x80] ss:$16 sps:$4 sm:$0xff]  }
 0x45c   :  { %2628 = vrcp.f32 %v1348_v18  ;;  %v1349_v27 = vadd.f32 1.0, %v2619_v26  ;;  %v2621_v28 = vpop.eup %2620  ;;  %v3495_v18 = vld [vmem:[%s3740_s2 + $0xa4] ss:$16 sps:$4 sm:$0xff]  }
 0x45d   :  { %2630 = vrcp.f32 %v1360_v25  ;;  %v1361_v29 = vadd.f32 1.0, %v2621_v28  ;;  %v2623_v30 = vpop.eup %2622 }
 0x45e   :  { %2632 = vpow2.f32 %v2212_v24  ;;  %v2625_v31 = vpop.eup %2624 }
 0x45f   :  { %2634 = vrcp.f32 %v1349_v27  ;;  %v2627_v43 = vpop.eup %2626  ;;  %v1374_v19 = vadd.f32 1.0, %v2625_v31 }
 0x460   :  { %2636 = vrcp.f32 %v1361_v29 }
 0x461   :  { %2638 = vrcp.f32 %v1374_v19 }
 0x466   :  { %v2629_v6 = vpop.eup %2628 }
 0x467   :  { %v2631_v9 = vpop.eup %2630  ;;  %v1382_v10 = vmul.f32 %v2629_v6, %v2623_v30 }
 0x468   :  { %v2633_v12 = vpop.eup %2632  ;;  %v1380_v14 = vmul.f32 %v2631_v9, %v3330_v7 }
 0x469   :  { %v2635_v17 = vpop.eup %2634  ;;  %v1375_v8 = vadd.f32 1.0, %v2633_v12 }
 0x46a   :  { %v3380_v52 = vadd.f32 %v1382_v10, %v1380_v14  ;;  %v1383_v13 = vmul.f32 %v2635_v17, %v2627_v43  ;;  %v2637_v21 = vpop.eup %2636 }
 0x46b   :  { %v1381_v22 = vmul.f32 %v2637_v21, %v3334_v35  ;;  %v2639_v37 = vpop.eup %2638  ;;  %v3390_v35 = vld [vmem:[%s3740_s2] ss:$16 sps:$4 sm:$0xff]  }
 0x46c   :  { %2640 = vtanh.f32 %v3380_v52 }
 0x46d   :  { %v3384_v36 = vadd.f32 %v1383_v13, %v1381_v22  ;;  %2642 = vrcp.f32 %v1375_v8 }
 0x46f   :  { %2644 = vtanh.f32 %v3384_v36 }
 0x476   :  { %v2641_v38 = vpop.eup %2640 }
 0x477   :  { %v2643_v7 = vpop.eup %2642  ;;  %v1388_v40 = vmul.f32 %v2641_v38, %v2639_v37 }
 0x479   :  { %v2645_v39 = vpop.eup %2644 }
 0x47a   :  { %v1389_v41 = vmul.f32 %v2645_v39, %v2643_v7 }
 0x47c   :  { %v1399_v42 = vpack.c.bf16 %v1389_v41, %v1388_v40 }
 0x47e   :  { %1433 = vmatmul.mubr.bf16.vlgmr.msra.gmra.mrb[16].mxu0 %v1399_v42  ;;  %1476 = vmatmul.mubr.bf16.vlgmr.msra.gmra.mrb[16].mxu1 %v1399_v42 }
 0x47f   :  { %1553 = vmatpush1.bf16.msra.mxu0 %v3390_v35  ;;  %1596 = vmatpush1.bf16.msra.mxu1 %v3396_v44 }
 0x480   :  { %1554 = vmatprep.subr.bf16.mxu0 %v3402_v45  ;;  %1597 = vmatprep.subr.bf16.mxu1 %v3408_v46 }
 0x481   :  { %1584 = vmatprep.mubr.bf16.mxu0 %v2806_v1  ;;  %1627 = vmatprep.mubr.bf16.mxu1 %v2806_v1 }
 0x483   :  { %1555 = vmatpush1.bf16.msra.mxu0 %v3416_v47  ;;  %1598 = vmatpush1.bf16.msra.mxu1 %v3422_v48 }
 0x484   :  { %1556 = vmatprep.subr.bf16.mxu0 %v3428_v49  ;;  %1599 = vmatprep.subr.bf16.mxu1 %v3434_v33 }
 0x487   :  { %1557 = vmatpush1.bf16.msra.mxu0 %v3440_v34  ;;  %1600 = vmatpush1.bf16.msra.mxu1 %v3446_v50 }
 0x488   :  { %1558 = vmatprep.subr.bf16.mxu0 %v3452_v51  ;;  %1601 = vmatprep.subr.bf16.mxu1 %v3458_v53 }
 0x48b   :  { %1559 = vmatpush1.bf16.msra.mxu0 %v3464_v54  ;;  %1602 = vmatpush1.bf16.msra.mxu1 %v3470_v55 }
 0x48c   :  { %1560 = vmatprep.subr.bf16.mxu0 %v3476_v11  ;;  %1603 = vmatprep.subr.bf16.mxu1 %v3482_v20 }
 0x48f   :  { %1561 = vmatpush1.bf16.msra.mxu0 %v3488_v23  ;;  %1604 = vmatpush1.bf16.msra.mxu1 %v3075_v56  ;;  %v3512_v56 = vld [vmem:[%s3740_s2 + $0x4] ss:$16 sps:$4 sm:$0xff]  }
 0x490   :  { %1562 = vmatprep.subr.bf16.mxu0 %v3495_v18  ;;  %1605 = vmatprep.subr.bf16.mxu1 %v3080_v57  ;;  %v3518_v57 = vld [vmem:[%s3740_s2 + $0xc] ss:$16 sps:$4 sm:$0xff]  }
 0x493   :  { %1563 = vmatpush1.bf16.msra.mxu0 %v3088_v58  ;;  %1606 = vmatpush1.bf16.msra.mxu1 %v3101_v60 }
 0x494   :  { %1564 = vmatprep.subr.bf16.mxu0 %v3095_v59  ;;  %1607 = vmatprep.subr.bf16.mxu1 %v3116_v63 }
 0x497   :  { %1565 = vmatpush1.bf16.msra.mxu0 %v3111_v62  ;;  %1608 = vmatpush1.bf16.msra.mxu1 %v3128_v2 }
 0x498   :  { %1566 = vmatprep.subr.bf16.mxu0 %v3123_v0  ;;  %1609 = vmatprep.subr.bf16.mxu1 %v3133_v3 }
 0x49b   :  { %1567 = vmatpush1.bf16.msra.mxu0 %v3142_v4  ;;  %1610 = vmatpush1.bf16.msra.mxu1 %v3149_v5 }
 0x49c   :  { %1704 = vmatprep.subr.bf16.mxu0 %v3512_v56  ;;  %1747 = vmatprep.subr.bf16.mxu1 %v3518_v57 }
 0x551   :  { %v1434_v58 = vpop.f32.mrb[16].mxu0  ;;  %v1477_v59 = vpop.f32.mrb[16].mxu1 }
 0x552   :  { %v2291_v60 = vadd.f32 %v1434_v58, %v3215_v15  ;;  %v1436_v62 = vpop.f32.mrb[17].mxu0  ;;  %v1479_v63 = vpop.f32.mrb[17].mxu1  ;;  %v2323_v31 = vadd.f32 %v1477_v59, %v3225_v61 }
 0x553   :  { %v2292_v0 = vadd.f32 %v1436_v62, %v3217_v16  ;;  %v1438_v2 = vpop.f32.mrb[18].mxu0  ;;  %v1481_v3 = vpop.f32.mrb[18].mxu1  ;;  %v2324_v30 = vadd.f32 %v1479_v63, %v3222_v32 }
 0x554   :  { %v2213_v4 = vmul.f32 -1.442695, %v2291_v60  ;;  %v2293_v5 = vadd.f32 %v1438_v2, %v3215_v15  ;;  %v1440_v24 = vpop.f32.mrb[19].mxu0  ;;  %v1483_v25 = vpop.f32.mrb[19].mxu1  ;;  %v2325_v9 = vadd.f32 %v1481_v3, %v3225_v61 }
 0x555   :  { %v2215_v26 = vmul.f32 -1.442695, %v2292_v0  ;;  %v2294_v27 = vadd.f32 %v1440_v24, %v3217_v16  ;;  %v2217_v43 = vmul.f32 -1.442695, %v2324_v30  ;;  %v2326_v6 = vadd.f32 %v1483_v25, %v3222_v32  ;;  %v3572_v30 = vld [vmem:[%s3740_s2 + $0xa0] ss:$16 sps:$4 sm:$0xff]  }
 0x556   :  { %2646 = vpow2.f32 %v2213_v4  ;;  %v2214_v28 = vmul.f32 -1.442695, %v2293_v5 }
 0x557   :  { %2648 = vpow2.f32 %v2215_v26  ;;  %v2216_v29 = vmul.f32 -1.442695, %v2294_v27  ;;  %v2218_v17 = vmul.f32 -1.442695, %v2326_v6  ;;  %v3590_v6 = vld [vmem:[%s3740_s2 + $0xcc] ss:$16 sps:$4 sm:$0xff]  }
 0x558   :  { %2650 = vpow2.f32 %v2214_v28 }
 0x559   :  { %2652 = vpow2.f32 %v2216_v29  ;;  %v3566_v29 = vld [vmem:[%s3740_s2 + $0xac] ss:$16 sps:$4 sm:$0xff]  }
 0x55a   :  { %2654 = vtanh.f32 %v2323_v31  ;;  %v3578_v31 = vld [vmem:[%s3740_s2 + $0xa8] ss:$16 sps:$4 sm:$0xff]  }
 0x55b   :  { %2656 = vpow2.f32 %v2217_v43  ;;  %v3584_v43 = vld [vmem:[%s3740_s2 + $0xc4] ss:$16 sps:$4 sm:$0xff]  }
 0x55c   :  { %2658 = vtanh.f32 %v2325_v9  ;;  %v3596_v9 = vld [vmem:[%s3740_s2 + $0xc0] ss:$16 sps:$4 sm:$0xff]  }
 0x560   :  { %v2647_v10 = vpop.eup %2646 }
 0x561   :  { %v2649_v12 = vpop.eup %2648  ;;  %v1500_v14 = vadd.f32 1.0, %v2647_v10  ;;  %v3602_v10 = vld [vmem:[%s3740_s2 + $0xc8] ss:$16 sps:$4 sm:$0xff]  }
 0x562   :  { %v1512_v19 = vadd.f32 1.0, %v2649_v12  ;;  %v2651_v13 = vpop.eup %2650  ;;  %v3608_v12 = vld [vmem:[%s3740_s2 + $0xe4] ss:$16 sps:$4 sm:$0xff]  }
 0x563   :  { %2660 = vrcp.f32 %v1500_v14  ;;  %v1501_v21 = vadd.f32 1.0, %v2651_v13  ;;  %v2653_v8 = vpop.eup %2652  ;;  %v3614_v14 = vld [vmem:[%s3740_s2 + $0xec] ss:$16 sps:$4 sm:$0xff]  }
 0x564   :  { %2662 = vrcp.f32 %v1512_v19  ;;  %v1513_v22 = vadd.f32 1.0, %v2653_v8  ;;  %v2655_v37 = vpop.eup %2654  ;;  %v3626_v19 = vld [vmem:[%s3740_s2 + $0xe8] ss:$16 sps:$4 sm:$0xff]  }
 0x565   :  { %2664 = vpow2.f32 %v2218_v17  ;;  %v2657_v38 = vpop.eup %2656  ;;  %v3620_v17 = vld [vmem:[%s3740_s2 + $0xe0] ss:$16 sps:$4 sm:$0xff]  }
 0x566   :  { %2666 = vrcp.f32 %v1501_v21  ;;  %v2659_v7 = vpop.eup %2658  ;;  %v1526_v60 = vadd.f32 1.0, %v2657_v38 }
 0x567   :  { %2668 = vrcp.f32 %v1513_v22 }
 0x568   :  { %2670 = vrcp.f32 %v1526_v60 }
 0x56d   :  { %v2661_v39 = vpop.eup %2660 }
 0x56e   :  { %v2663_v40 = vpop.eup %2662  ;;  %v1534_v41 = vmul.f32 %v2661_v39, %v2655_v37 }
 0x56f   :  { %v2665_v42 = vpop.eup %2664  ;;  %v1532_v58 = vmul.f32 %v2663_v40, %v3380_v52 }
 0x570   :  { %v2667_v59 = vpop.eup %2666  ;;  %v1527_v2 = vadd.f32 1.0, %v2665_v42 }
 0x571   :  { %v3530_v62 = vadd.f32 %v1534_v41, %v1532_v58  ;;  %v1535_v63 = vmul.f32 %v2667_v59, %v2659_v7  ;;  %v2669_v0 = vpop.eup %2668 }
 0x572   :  { %v1533_v3 = vmul.f32 %v2669_v0, %v3384_v36  ;;  %v2671_v5 = vpop.eup %2670  ;;  %v3559_v36 = vld [vmem:[%s3740_s2 + $0x88] ss:$16 sps:$4 sm:$0xff]  }
 0x573   :  { %2672 = vtanh.f32 %v3530_v62 }
 0x574   :  { %v3534_v4 = vadd.f32 %v1535_v63, %v1533_v3  ;;  %2674 = vrcp.f32 %v1527_v2 }
 0x576   :  { %2676 = vtanh.f32 %v3534_v4 }
 0x57d   :  { %v2673_v24 = vpop.eup %2672 }
 0x57e   :  { %v2675_v52 = vpop.eup %2674  ;;  %v1540_v26 = vmul.f32 %v2673_v24, %v2671_v5 }
 0x580   :  { %v2677_v25 = vpop.eup %2676 }
 0x581   :  { %v1541_v27 = vmul.f32 %v2677_v25, %v2675_v52 }
 0x583   :  { %v1551_v28 = vpack.c.bf16 %v1541_v27, %v1540_v26 }
 0x585   :  { %1585 = vmatmul.mubr.bf16.vlgmr.msra.gmra.mrb[20].mxu0 %v1551_v28  ;;  %1628 = vmatmul.mubr.bf16.vlgmr.msra.gmra.mrb[20].mxu1 %v1551_v28 }
 0x586   :  { %1705 = vmatpush1.bf16.msra.mxu0 %v3390_v35  ;;  %1748 = vmatpush1.bf16.msra.mxu1 %v3396_v44 }
 0x587   :  { %1706 = vmatprep.subr.bf16.mxu0 %v3402_v45  ;;  %1749 = vmatprep.subr.bf16.mxu1 %v3408_v46 }
 0x588   :  { %1736 = vmatprep.mubr.bf16.mxu0 %v2806_v1  ;;  %1779 = vmatprep.mubr.bf16.mxu1 %v2806_v1 }
 0x58a   :  { %1707 = vmatpush1.bf16.msra.mxu0 %v3416_v47  ;;  %1750 = vmatpush1.bf16.msra.mxu1 %v3422_v48 }
 0x58b   :  { %1708 = vmatprep.subr.bf16.mxu0 %v3428_v49  ;;  %1751 = vmatprep.subr.bf16.mxu1 %v3434_v33 }
 0x58e   :  { %1709 = vmatpush1.bf16.msra.mxu0 %v3440_v34  ;;  %1752 = vmatpush1.bf16.msra.mxu1 %v3446_v50 }
 0x58f   :  { %1710 = vmatprep.subr.bf16.mxu0 %v3452_v51  ;;  %1753 = vmatprep.subr.bf16.mxu1 %v3458_v53 }
 0x592   :  { %1711 = vmatpush1.bf16.msra.mxu0 %v3464_v54  ;;  %1754 = vmatpush1.bf16.msra.mxu1 %v3470_v55 }
 0x593   :  { %1712 = vmatprep.subr.bf16.mxu0 %v3476_v11  ;;  %1755 = vmatprep.subr.bf16.mxu1 %v3482_v20 }
 0x596   :  { %1713 = vmatpush1.bf16.msra.mxu0 %v3488_v23  ;;  %1756 = vmatpush1.bf16.msra.mxu1 %v3559_v36 }
 0x597   :  { %1714 = vmatprep.subr.bf16.mxu0 %v3495_v18  ;;  %1757 = vmatprep.subr.bf16.mxu1 %v3566_v29 }
 0x59a   :  { %1715 = vmatpush1.bf16.msra.mxu0 %v3572_v30  ;;  %1758 = vmatpush1.bf16.msra.mxu1 %v3578_v31 }
 0x59b   :  { %1716 = vmatprep.subr.bf16.mxu0 %v3584_v43  ;;  %1759 = vmatprep.subr.bf16.mxu1 %v3590_v6 }
 0x59e   :  { %1717 = vmatpush1.bf16.msra.mxu0 %v3596_v9  ;;  %1760 = vmatpush1.bf16.msra.mxu1 %v3602_v10 }
 0x59f   :  { %1718 = vmatprep.subr.bf16.mxu0 %v3608_v12  ;;  %1761 = vmatprep.subr.bf16.mxu1 %v3614_v14 }
 0x5a2   :  { %1719 = vmatpush1.bf16.msra.mxu0 %v3620_v17  ;;  %1762 = vmatpush1.bf16.msra.mxu1 %v3626_v19 }
 0x5a3   :  { %1856 = vmatprep.subr.bf16.mxu0 %v3512_v56  ;;  %1899 = vmatprep.subr.bf16.mxu1 %v3518_v57 }
 0x658   :  { %v1586_v13 = vpop.f32.mrb[20].mxu0  ;;  %v1629_v21 = vpop.f32.mrb[20].mxu1 }
 0x659   :  { %v2295_v8 = vadd.f32 %v1586_v13, %v3215_v15  ;;  %v1588_v22 = vpop.f32.mrb[21].mxu0  ;;  %v1631_v37 = vpop.f32.mrb[21].mxu1  ;;  %v2327_v0 = vadd.f32 %v1629_v21, %v3225_v61 }
 0x65a   :  { %v2296_v38 = vadd.f32 %v1588_v22, %v3217_v16  ;;  %v1590_v7 = vpop.f32.mrb[22].mxu0  ;;  %v1633_v39 = vpop.f32.mrb[22].mxu1  ;;  %v2328_v63 = vadd.f32 %v1631_v37, %v3222_v32 }
 0x65b   :  { %v2219_v40 = vmul.f32 -1.442695, %v2295_v8  ;;  %v2297_v41 = vadd.f32 %v1590_v7, %v3215_v15  ;;  %v1592_v42 = vpop.f32.mrb[23].mxu0  ;;  %v1635_v58 = vpop.f32.mrb[23].mxu1  ;;  %v2329_v5 = vadd.f32 %v1633_v39, %v3225_v61 }
 0x65c   :  { %v2221_v59 = vmul.f32 -1.442695, %v2296_v38  ;;  %v2298_v56 = vadd.f32 %v1592_v42, %v3217_v16  ;;  %v2223_v2 = vmul.f32 -1.442695, %v2328_v63  ;;  %v2330_v3 = vadd.f32 %v1635_v58, %v3222_v32 }
 0x65d   :  { %2678 = vpow2.f32 %v2219_v40  ;;  %v2220_v57 = vmul.f32 -1.442695, %v2297_v41 }
 0x65e   :  { %2680 = vpow2.f32 %v2221_v59  ;;  %v2222_v60 = vmul.f32 -1.442695, %v2298_v56  ;;  %v2224_v26 = vmul.f32 -1.442695, %v2330_v3 }
 0x65f   :  { %2682 = vpow2.f32 %v2220_v57 }
 0x660   :  { %2684 = vpow2.f32 %v2222_v60 }
 0x661   :  { %2686 = vtanh.f32 %v2327_v0 }
 0x662   :  { %2688 = vpow2.f32 %v2223_v2 }
 0x663   :  { %2690 = vtanh.f32 %v2329_v5 }
 0x667   :  { %v2679_v24 = vpop.eup %2678 }
 0x668   :  { %v2681_v52 = vpop.eup %2680  ;;  %v1652_v25 = vadd.f32 1.0, %v2679_v24 }
 0x669   :  { %v1664_v27 = vadd.f32 1.0, %v2681_v52  ;;  %v2683_v28 = vpop.eup %2682 }
 0x66a   :  { %2692 = vrcp.f32 %v1652_v25  ;;  %v1653_v13 = vadd.f32 1.0, %v2683_v28  ;;  %v2685_v8 = vpop.eup %2684 }
 0x66b   :  { %2694 = vrcp.f32 %v1664_v27  ;;  %v1665_v21 = vadd.f32 1.0, %v2685_v8  ;;  %v2687_v22 = vpop.eup %2686 }
 0x66c   :  { %2696 = vpow2.f32 %v2224_v26  ;;  %v2689_v37 = vpop.eup %2688 }
 0x66d   :  { %2698 = vrcp.f32 %v1653_v13  ;;  %v2691_v38 = vpop.eup %2690  ;;  %v1678_v59 = vadd.f32 1.0, %v2689_v37 }
 0x66e   :  { %2700 = vrcp.f32 %v1665_v21 }
 0x66f   :  { %2702 = vrcp.f32 %v1678_v59 }
 0x674   :  { %v2693_v7 = vpop.eup %2692 }
 0x675   :  { %v2695_v39 = vpop.eup %2694  ;;  %v1686_v40 = vmul.f32 %v2693_v7, %v2687_v22 }
 0x676   :  { %v2697_v41 = vpop.eup %2696  ;;  %v1684_v42 = vmul.f32 %v2695_v39, %v3530_v62 }
 0x677   :  { %v2699_v58 = vpop.eup %2698  ;;  %v1679_v63 = vadd.f32 1.0, %v2697_v41 }
 0x678   :  { %v3640_v56 = vadd.f32 %v1686_v40, %v1684_v42  ;;  %v1687_v57 = vmul.f32 %v2699_v58, %v2691_v38  ;;  %v2701_v60 = vpop.eup %2700 }
 0x679   :  { %v1685_v0 = vmul.f32 %v2701_v60, %v3534_v4  ;;  %v2703_v3 = vpop.eup %2702 }
 0x67a   :  { %2704 = vtanh.f32 %v3640_v56 }
 0x67b   :  { %v3644_v2 = vadd.f32 %v1687_v57, %v1685_v0  ;;  %2706 = vrcp.f32 %v1679_v63 }
 0x67d   :  { %2708 = vtanh.f32 %v3644_v2 }
 0x684   :  { %v2705_v5 = vpop.eup %2704 }
 0x685   :  { %v2707_v62 = vpop.eup %2706  ;;  %v1692_v52 = vmul.f32 %v2705_v5, %v2703_v3  ;;  %v2807_v5 = vmov 0.0  }
 0x687   :  { %v2709_v24 = vpop.eup %2708 }
 0x688   :  { %v1693_v25 = vmul.f32 %v2709_v24, %v2707_v62  ;;  %v2511_v62 = vld [vmem:[%s3742_s4 + $0x8] sm:$0xff]   ;;  %v2512_v24 = vld [vmem:[%s3742_s4 + $0x10] sm:$0xff]  }
 0x68a   :  { %v1703_v26 = vpack.c.bf16 %v1693_v25, %v1692_v52  ;;  %v2513_v52 = vld [vmem:[%s3742_s4 + $0x18] sm:$0xff]   ;;  %v2514_v25 = vld [vmem:[%s3742_s4 + $0x20] sm:$0xff]  }
 0x68c   :  { %1737 = vmatmul.mubr.bf16.vlgmr.msra.gmra.mrb[24].mxu0 %v1703_v26  ;;  %1780 = vmatmul.mubr.bf16.vlgmr.msra.gmra.mrb[24].mxu1 %v1703_v26  ;;  %v2515_v26 = vld [vmem:[%s3742_s4 + $0x28] sm:$0xff]  }
 0x68d   :  { %1857 = vmatpush1.bf16.msra.mxu0 %v3390_v35  ;;  %1900 = vmatpush1.bf16.msra.mxu1 %v3396_v44 }
 0x68e   :  { %1858 = vmatprep.subr.bf16.mxu0 %v3402_v45  ;;  %1901 = vmatprep.subr.bf16.mxu1 %v3408_v46 }
 0x68f   :  { %1888 = vmatprep.mubr.bf16.mxu0 %v2806_v1  ;;  %1931 = vmatprep.mubr.bf16.mxu1 %v2806_v1 }
 0x691   :  { %1859 = vmatpush1.bf16.msra.mxu0 %v3416_v47  ;;  %1902 = vmatpush1.bf16.msra.mxu1 %v3422_v48 }
 0x692   :  { %1860 = vmatprep.subr.bf16.mxu0 %v3428_v49  ;;  %1903 = vmatprep.subr.bf16.mxu1 %v3434_v33 }
 0x695   :  { %1861 = vmatpush1.bf16.msra.mxu0 %v3440_v34  ;;  %1904 = vmatpush1.bf16.msra.mxu1 %v3446_v50 }
 0x696   :  { %1862 = vmatprep.subr.bf16.mxu0 %v3452_v51  ;;  %1905 = vmatprep.subr.bf16.mxu1 %v3458_v53 }
 0x699   :  { %1863 = vmatpush1.bf16.msra.mxu0 %v3464_v54  ;;  %1906 = vmatpush1.bf16.msra.mxu1 %v3470_v55 }
 0x69a   :  { %1864 = vmatprep.subr.bf16.mxu0 %v3476_v11  ;;  %1907 = vmatprep.subr.bf16.mxu1 %v3482_v20 }
 0x69d   :  { %1865 = vmatpush1.bf16.msra.mxu0 %v3488_v23  ;;  %1908 = vmatpush1.bf16.msra.mxu1 %v3559_v36 }
 0x69e   :  { %1866 = vmatprep.subr.bf16.mxu0 %v3495_v18  ;;  %1909 = vmatprep.subr.bf16.mxu1 %v3566_v29 }
 0x6a1   :  { %1867 = vmatpush1.bf16.msra.mxu0 %v3572_v30  ;;  %1910 = vmatpush1.bf16.msra.mxu1 %v3578_v31 }
 0x6a2   :  { %1868 = vmatprep.subr.bf16.mxu0 %v3584_v43  ;;  %1911 = vmatprep.subr.bf16.mxu1 %v3590_v6 }
 0x6a5   :  { %1869 = vmatpush1.bf16.msra.mxu0 %v3596_v9  ;;  %1912 = vmatpush1.bf16.msra.mxu1 %v3602_v10 }
 0x6a6   :  { %1870 = vmatprep.subr.bf16.mxu0 %v3608_v12  ;;  %1913 = vmatprep.subr.bf16.mxu1 %v3614_v14 }
 0x6a9   :  { %1871 = vmatpush1.bf16.msra.mxu0 %v3620_v17  ;;  %1914 = vmatpush1.bf16.msra.mxu1 %v3626_v19 }
 0x6aa   :  { %2255 = vmatprep.subr.bf16.mxu0 %v2807_v5 }
 0x75f   :  { %v1738_v1 = vpop.f32.mrb[24].mxu0  ;;  %v1781_v35 = vpop.f32.mrb[24].mxu1 }
 0x760   :  { %v2299_v44 = vadd.f32 %v1738_v1, %v3215_v15  ;;  %v1740_v45 = vpop.f32.mrb[25].mxu0  ;;  %v1783_v46 = vpop.f32.mrb[25].mxu1  ;;  %v2331_v23 = vadd.f32 %v1781_v35, %v3225_v61  ;;  %v2516_v1 = vld [vmem:[%s3742_s4 + $0x30] sm:$0xff]   ;;  %v2517_v35 = vld [vmem:[%s3742_s4 + $0x38] sm:$0xff]  }
 0x761   :  { %v2300_v47 = vadd.f32 %v1740_v45, %v3217_v16  ;;  %v1742_v48 = vpop.f32.mrb[26].mxu0  ;;  %v1785_v49 = vpop.f32.mrb[26].mxu1  ;;  %v2332_v20 = vadd.f32 %v1783_v46, %v3222_v32 }
 0x762   :  { %v2225_v33 = vmul.f32 -1.442695, %v2299_v44  ;;  %v2301_v34 = vadd.f32 %v1742_v48, %v3215_v15  ;;  %v1744_v50 = vpop.f32.mrb[27].mxu0  ;;  %v1787_v51 = vpop.f32.mrb[27].mxu1  ;;  %v2333_v36 = vadd.f32 %v1785_v49, %v3225_v61 }
 0x763   :  { %v2227_v53 = vmul.f32 -1.442695, %v2300_v47  ;;  %v2302_v54 = vadd.f32 %v1744_v50, %v3217_v16  ;;  %v2229_v18 = vmul.f32 -1.442695, %v2332_v20  ;;  %v2334_v4 = vadd.f32 %v1787_v51, %v3222_v32 }
 0x764   :  { %2710 = vpow2.f32 %v2225_v33  ;;  %v2226_v55 = vmul.f32 -1.442695, %v2301_v34 }
 0x765   :  { %2712 = vpow2.f32 %v2227_v53  ;;  %v2228_v11 = vmul.f32 -1.442695, %v2302_v54  ;;  %v2230_v43 = vmul.f32 -1.442695, %v2334_v4 }
 0x766   :  { %2714 = vpow2.f32 %v2226_v55 }
 0x767   :  { %2716 = vpow2.f32 %v2228_v11 }
 0x768   :  { %2718 = vtanh.f32 %v2331_v23 }
 0x769   :  { %2720 = vpow2.f32 %v2229_v18 }
 0x76a   :  { %2722 = vtanh.f32 %v2333_v36 }
 0x76e   :  { %v2711_v29 = vpop.eup %2710 }
 0x76f   :  { %v2713_v30 = vpop.eup %2712  ;;  %v1804_v31 = vadd.f32 1.0, %v2711_v29 }
 0x770   :  { %v1816_v6 = vadd.f32 1.0, %v2713_v30  ;;  %v2715_v9 = vpop.eup %2714 }
 0x771   :  { %2724 = vrcp.f32 %v1804_v31  ;;  %v1805_v10 = vadd.f32 1.0, %v2715_v9  ;;  %v2717_v12 = vpop.eup %2716 }
 0x772   :  { %2726 = vrcp.f32 %v1816_v6  ;;  %v1817_v14 = vadd.f32 1.0, %v2717_v12  ;;  %v2719_v17 = vpop.eup %2718 }
 0x773   :  { %2728 = vpow2.f32 %v2230_v43  ;;  %v2721_v19 = vpop.eup %2720 }
 0x774   :  { %2730 = vrcp.f32 %v1805_v10  ;;  %v2723_v27 = vpop.eup %2722  ;;  %v1830_v38 = vadd.f32 1.0, %v2721_v19 }
 0x775   :  { %2732 = vrcp.f32 %v1817_v14 }
 0x776   :  { %2734 = vrcp.f32 %v1830_v38 }
 0x77b   :  { %v2725_v28 = vpop.eup %2724 }
 0x77c   :  { %v2727_v13 = vpop.eup %2726  ;;  %v1838_v8 = vmul.f32 %v2725_v28, %v2719_v17 }
 0x77d   :  { %v2729_v21 = vpop.eup %2728  ;;  %v1836_v22 = vmul.f32 %v2727_v13, %v3640_v56 }
 0x77e   :  { %v2731_v37 = vpop.eup %2730  ;;  %v1831_v41 = vadd.f32 1.0, %v2729_v21 }
 0x77f   :  { %v3688_v7 = vadd.f32 %v1838_v8, %v1836_v22  ;;  %v1839_v39 = vmul.f32 %v2731_v37, %v2723_v27  ;;  %v2733_v40 = vpop.eup %2732 }
 0x780   :  { %v1837_v42 = vmul.f32 %v2733_v40, %v3644_v2  ;;  %v2735_v59 = vpop.eup %2734  ;;  %v2510_v2 = vld [vmem:[%s3742_s4] sm:$0xff]  }
 0x781   :  { %2736 = vtanh.f32 %v3688_v7 }
 0x782   :  { %v3692_v58 = vadd.f32 %v1839_v39, %v1837_v42  ;;  %2738 = vrcp.f32 %v1831_v41 }
 0x784   :  { %2740 = vtanh.f32 %v3692_v58 }
 0x78b   :  { %v2737_v57 = vpop.eup %2736 }
 0x78c   :  { %v2739_v56 = vpop.eup %2738  ;;  %v1844_v63 = vmul.f32 %v2737_v57, %v2735_v59 }
 0x78e   :  { %v2741_v60 = vpop.eup %2740 }
 0x78f   :  { %v1845_v0 = vmul.f32 %v2741_v60, %v2739_v56 }
 0x791   :  { %v1855_v3 = vpack.c.bf16 %v1845_v0, %v1844_v63 }
 0x793   :  { %1889 = vmatmul.mubr.bf16.vlgmr.msra.gmra.mrb[28].mxu0 %v1855_v3  ;;  %1932 = vmatmul.mubr.bf16.vlgmr.msra.gmra.mrb[28].mxu1 %v1855_v3 }
 0x794   :  { %2256 = vmatpush3.bf16.msra.mxu0 %v2510_v2  ;;  %2271 = vmatprep.mubr.msk.bf16.mxu0 %vm2808_vm0, %v2807_v5 }
 0x795   :  { %2257 = vmatprep.subr.bf16.mxu0 %v2807_v5 }
 0x798   :  { %2258 = vmatpush3.bf16.msra.mxu0 %v2511_v62 }
 0x799   :  { %2259 = vmatprep.subr.bf16.mxu0 %v2807_v5 }
 0x79c   :  { %2260 = vmatpush3.bf16.msra.mxu0 %v2512_v24 }
 0x79d   :  { %2261 = vmatprep.subr.bf16.mxu0 %v2807_v5 }
 0x7a0   :  { %2262 = vmatpush3.bf16.msra.mxu0 %v2513_v52 }
 0x7a1   :  { %2263 = vmatprep.subr.bf16.mxu0 %v2807_v5 }
 0x7a4   :  { %2264 = vmatpush3.bf16.msra.mxu0 %v2514_v25 }
 0x7a5   :  { %2265 = vmatprep.subr.bf16.mxu0 %v2807_v5 }
 0x7a8   :  { %2266 = vmatpush3.bf16.msra.mxu0 %v2515_v26 }
 0x7a9   :  { %2267 = vmatprep.subr.bf16.mxu0 %v2807_v5 }
 0x7ac   :  { %2268 = vmatpush3.bf16.msra.mxu0 %v2516_v1 }
 0x7ad   :  { %2269 = vmatprep.subr.bf16.mxu0 %v2807_v5 }
 0x7b0   :  { %2270 = vmatpush3.bf16.msra.mxu0 %v2517_v35 }
 0x866   :  { %v1890_v44 = vpop.f32.mrb[28].mxu0  ;;  %v1933_v45 = vpop.f32.mrb[28].mxu1 }
 0x867   :  { %v2303_v46 = vadd.f32 %v1890_v44, %v3215_v15  ;;  %v1892_v47 = vpop.f32.mrb[29].mxu0  ;;  %v1935_v48 = vpop.f32.mrb[29].mxu1  ;;  %v2335_v4 = vadd.f32 %v1933_v45, %v3225_v61 }
 0x868   :  { %v2304_v49 = vadd.f32 %v1892_v47, %v3217_v16  ;;  %v1894_v33 = vpop.f32.mrb[30].mxu0  ;;  %v1937_v34 = vpop.f32.mrb[30].mxu1  ;;  %v2336_v18 = vadd.f32 %v1935_v48, %v3222_v32 }
 0x869   :  { %v2231_v50 = vmul.f32 -1.442695, %v2303_v46  ;;  %v2305_v51 = vadd.f32 %v1894_v33, %v3215_v15  ;;  %v1896_v53 = vpop.f32.mrb[31].mxu0  ;;  %v1939_v54 = vpop.f32.mrb[31].mxu1  ;;  %v2337_v15 = vadd.f32 %v1937_v34, %v3225_v61 }
 0x86a   :  { %v2233_v55 = vmul.f32 -1.442695, %v2304_v49  ;;  %v2306_v11 = vadd.f32 %v1896_v53, %v3217_v16  ;;  %v2235_v36 = vmul.f32 -1.442695, %v2336_v18  ;;  %v2338_v29 = vadd.f32 %v1939_v54, %v3222_v32 }
 0x86b   :  { %2742 = vpow2.f32 %v2231_v50  ;;  %v2232_v20 = vmul.f32 -1.442695, %v2305_v51 }
 0x86c   :  { %2744 = vpow2.f32 %v2233_v55  ;;  %v2234_v23 = vmul.f32 -1.442695, %v2306_v11  ;;  %v2236_v16 = vmul.f32 -1.442695, %v2338_v29 }
 0x86d   :  { %2746 = vpow2.f32 %v2232_v20 }
 0x86e   :  { %2748 = vpow2.f32 %v2234_v23 }
 0x86f   :  { %2750 = vtanh.f32 %v2335_v4 }
 0x870   :  { %2752 = vpow2.f32 %v2235_v36 }
 0x871   :  { %2754 = vtanh.f32 %v2337_v15 }
 0x875   :  { %v2743_v30 = vpop.eup %2742 }
 0x876   :  { %v2745_v31 = vpop.eup %2744  ;;  %v1956_v43 = vadd.f32 1.0, %v2743_v30 }
 0x877   :  { %v1968_v6 = vadd.f32 1.0, %v2745_v31  ;;  %v2747_v9 = vpop.eup %2746 }
 0x878   :  { %2756 = vrcp.f32 %v1956_v43  ;;  %v1957_v10 = vadd.f32 1.0, %v2747_v9  ;;  %v2749_v12 = vpop.eup %2748 }
 0x879   :  { %2758 = vrcp.f32 %v1968_v6  ;;  %v1969_v14 = vadd.f32 1.0, %v2749_v12  ;;  %v2751_v32 = vpop.eup %2750 }
 0x87a   :  { %2760 = vpow2.f32 %v2236_v16  ;;  %v2753_v17 = vpop.eup %2752 }
 0x87b   :  { %2762 = vrcp.f32 %v1957_v10  ;;  %v2755_v61 = vpop.eup %2754  ;;  %v1982_v13 = vadd.f32 1.0, %v2753_v17 }
 0x87c   :  { %2764 = vrcp.f32 %v1969_v14 }
 0x87d   :  { %2766 = vrcp.f32 %v1982_v13 }
 0x882   :  { %v2757_v19 = vpop.eup %2756 }
 0x883   :  { %v2759_v27 = vpop.eup %2758  ;;  %v1990_v28 = vmul.f32 %v2757_v19, %v2751_v32 }
 0x884   :  { %v2761_v8 = vpop.eup %2760  ;;  %v1988_v21 = vmul.f32 %v2759_v27, %v3688_v7  ;;  %v2237_v7 = vld [vmem:[%s3743_s5] ss:$0 sm:$0xff] }
 0x885   :  { %v2763_v22 = vpop.eup %2762  ;;  %v1983_v40 = vadd.f32 1.0, %v2761_v8 }
 0x886   :  { %v1992_v37 = vadd.f32 %v1990_v28, %v1988_v21  ;;  %v1991_v38 = vmul.f32 %v2763_v22, %v2755_v61  ;;  %v2765_v39 = vpop.eup %2764 }
 0x887   :  { %v1989_v41 = vmul.f32 %v2765_v39, %v3692_v58  ;;  %v2767_v59 = vpop.eup %2766 }
 0x888   :  { %2768 = vtanh.f32 %v1992_v37 }
 0x889   :  { %v1993_v42 = vadd.f32 %v1991_v38, %v1989_v41  ;;  %2770 = vrcp.f32 %v1983_v40 }
 0x88b   :  { %2772 = vtanh.f32 %v1993_v42 }
 0x892   :  { %v2769_v57 = vpop.eup %2768 }
 0x893   :  { %v1996_v56 = vmul.f32 %v2769_v57, %v2767_v59  ;;  %v2771_v60 = vpop.eup %2770 }
 0x895   :  { %v2773_v63 = vpop.eup %2772 }
 0x896   :  { %v1997_v0 = vmul.f32 %v2773_v63, %v2771_v60 }
 0x898   :  { %v1998_v3 = vpack.c.bf16 %v1997_v0, %v1996_v56 }
 0x89a   :  { %2272 = vmatmul.mubr.bf16.vlgmr.msra.gmra.mrb[32].mxu0 %v1998_v3 }
 0x96d   :  { %v2104_v2 = vpop.f32.mrb[32].mxu0 }
 0x96e   :  { %v2105_v5 = vadd.f32 %v2237_v7, %v2104_v2  ;;  %v2273_v62 = vpop.f32.mrb[33].mxu0 }
 0x96f   :  { %v2107_v24 = vpop.f32.mrb[34].mxu0 }
 0x970   :  { %2111 = vst [vmem:[%s3744_s6] sm:$0xff] %v2105_v5  ;;  %v2108_v58 = vadd.f32 %v2237_v7, %v2107_v24  ;;  %v2274_v52 = vpop.f32.mrb[35].mxu0 }
 0x972   :  { %2112 = vst [vmem:[%s3744_s6 + $0x8] sm:$0xff] %v2108_v58 }

// kernel: lstm_network_forward.2
= control target key start
LH: loop header
LB: loop body
LE: loop exit
PB: predicated region body
PF: predicated region fallthrough
CT: control target
= control target key end

     0   :  { %9 = vsyncpa [#allocation4], 0  ;;  %s3543_s0 = inlined_call_operand.vmem [shape: bf16[8,16,128], index: 0, kind: input, shape index: {}]   ;;  %s3544_s1 = inlined_call_operand.hbm [shape: bf16[128,512], index: 1, kind: input, shape index: {}]   ;;  %s3545_s2 = inlined_call_operand.hbm [shape: bf16[128,512], index: 2, kind: input, shape index: {}]   ;;  %s3546_s3 = inlined_call_operand.vmem [shape: f32[1,512], index: 3, kind: input, shape index: {}]   ;;  %s3547_s4 = inlined_call_operand.vmem [shape: bf16[8,16,128], index: 4, kind: output, shape index: {}]  }
   0x1   :  { %10 = vsyncpa [#allocation6], 0  ;;  %s2892_s15 = smov [#allocation3]   ;;  %s2844_s19 = scalar_lea.hbm %s3544_s1, 4096 }
   0x2   :  { %s18_s16 = sshll.u32 %s2892_s15, 4  ;;  %p2845_p0 = scmp.ne.s32.totalorder %s3544_s1, %s2844_s19  ;;  %s19_s16 = int_to_ptr.vmem [resolvable:$true] %s18_s16 }
   0x3   :  { %p2848_p1 = scmp.lt.u32.totalorder %s2844_s19, %s3544_s1 }
   0x5   :  { %p2850_p2 = pnand %p2848_p1, %p2845_p0 }
   0x7   :  { %2853 = shalt.err (!%p2850_p2)
}
   0x8   :  { %s2854_s24 = scalar_lea.vmem %s19_s16, 4096  ;;  %p2859_p4 = scmp.lt.s32.totalorder %s19_s16, %s19_s16 }
   0x9   :  { %p2855_p3 = scmp.ne.s32.totalorder %s19_s16, %s2854_s24  ;;  %p2860_p5 = scmp.lt.s32.totalorder %s2854_s24, %s2854_s24 }
   0xb   :  { %p2861_p6 = por %p2860_p5, %p2859_p4 }
   0xd   :  { %p2862_p7 = pnand %p2861_p6, %p2855_p3 }
   0xf   :  { %2865 = shalt.err (!%p2862_p7)
}
  0x10   :  { %s2893_s25 = smov 256   ;;  %s2894_s26 = smov 16  }
  0x11   :  { %24 = dma.hbm_to_vmem [thread:$0]  %s3544_s1, 4096, %s19_s16, [#allocation4], %s2893_s25, %s2893_s25, %s2894_s26  }
  0x12   :  { %s2895_s29 = smov [#allocation5]   ;;  %s2866_s7 = scalar_lea.hbm %s3545_s2, 4096 }
  0x13   :  { %s30_s30 = sshll.u32 %s2895_s29, 4  ;;  %p2867_p8 = scmp.ne.s32.totalorder %s3545_s2, %s2866_s7  ;;  %s31_s30 = int_to_ptr.vmem [resolvable:$true] %s30_s30 }
  0x14   :  { %p2870_p9 = scmp.lt.u32.totalorder %s2866_s7, %s3545_s2 }
  0x16   :  { %p2872_p10 = pnand %p2870_p9, %p2867_p8 }
  0x18   :  { %2875 = shalt.err (!%p2872_p10)
}
  0x19   :  { %s2876_s12 = scalar_lea.vmem %s31_s30, 4096  ;;  %p2881_p12 = scmp.lt.s32.totalorder %s31_s30, %s31_s30 }
  0x1a   :  { %p2877_p11 = scmp.ne.s32.totalorder %s31_s30, %s2876_s12  ;;  %p2882_p13 = scmp.lt.s32.totalorder %s2876_s12, %s2876_s12 }
  0x1c   :  { %p2883_p0 = por %p2882_p13, %p2881_p12 }
  0x1e   :  { %p2884_p1 = pnand %p2883_p0, %p2877_p11 }
  0x20   :  { %2887 = shalt.err (!%p2884_p1)
}
  0x21   :  { %36 = dma.hbm_to_vmem [thread:$0]  %s3545_s2, 4096, %s31_s30, [#allocation6], %s2893_s25, %s2893_s25, %s2894_s26  }
  0x22   :  { %2888 = dma.done.wait [#allocation4], 4096  }
  0x23   :  { %2889 = vsyncadd [#allocation4], 4294963200 }
  0x24   :  { %2890 = dma.done.wait [#allocation6], 4096  }
  0x25   :  { %2891 = vsyncadd [#allocation6], 4294963200  ;;  %v2896_v0 = vmov 0   ;;  %v2452_v1 = vld [vmem:[#allocation3 + $0x4] ss:$16 sps:$4 sm:$0xff]   ;;  %v2504_v43 = vld [vmem:[%s3543_s0 + $0x8] sm:$0xff]  }
  0x26   :  { %356 = vmatprep.mubr.bf16.mxu0 %v2896_v0  ;;  %469 = vmatprep.mubr.bf16.mxu1 %v2896_v0  ;;  %v2454_v2 = vld [vmem:[#allocation3 + $0xc] ss:$16 sps:$4 sm:$0xff]   ;;  %v2456_v3 = vld [vmem:[#allocation3] ss:$16 sps:$4 sm:$0xff]   ;;  %v2457_v4 = vld [vmem:[#allocation3 + $0x8] ss:$16 sps:$4 sm:$0xff]  }
  0x27   :  { %324 = vmatprep.subr.bf16.mxu0 %v2452_v1  ;;  %437 = vmatprep.subr.bf16.mxu1 %v2454_v2  ;;  %v2458_v5 = vld [vmem:[#allocation3 + $0x24] ss:$16 sps:$4 sm:$0xff]   ;;  %v2460_v6 = vld [vmem:[#allocation3 + $0x2c] ss:$16 sps:$4 sm:$0xff]   ;;  %v2462_v7 = vld [vmem:[#allocation3 + $0x20] ss:$16 sps:$4 sm:$0xff]  }
  0x28   :  { %325 = vmatpush1.bf16.msra.mxu0 %v2456_v3  ;;  %438 = vmatpush1.bf16.msra.mxu1 %v2457_v4  ;;  %v2463_v8 = vld [vmem:[#allocation3 + $0x28] ss:$16 sps:$4 sm:$0xff]   ;;  %v2464_v9 = vld [vmem:[#allocation3 + $0x44] ss:$16 sps:$4 sm:$0xff]   ;;  %v2466_v10 = vld [vmem:[#allocation3 + $0x4c] ss:$16 sps:$4 sm:$0xff]  }
  0x29   :  { %326 = vmatprep.subr.bf16.mxu0 %v2458_v5  ;;  %439 = vmatprep.subr.bf16.mxu1 %v2460_v6  ;;  %v2468_v11 = vld [vmem:[#allocation3 + $0x40] ss:$16 sps:$4 sm:$0xff]   ;;  %v2469_v12 = vld [vmem:[#allocation3 + $0x48] ss:$16 sps:$4 sm:$0xff]   ;;  %v2470_v13 = vld [vmem:[#allocation3 + $0x64] ss:$16 sps:$4 sm:$0xff]  }
  0x2a   :  { %v2472_v14 = vld [vmem:[#allocation3 + $0x6c] ss:$16 sps:$4 sm:$0xff]   ;;  %v2474_v15 = vld [vmem:[#allocation3 + $0x60] ss:$16 sps:$4 sm:$0xff]   ;;  %v2475_v16 = vld [vmem:[#allocation3 + $0x68] ss:$16 sps:$4 sm:$0xff]  }
  0x2b   :  { %v2476_v17 = vld [vmem:[#allocation3 + $0x84] ss:$16 sps:$4 sm:$0xff]   ;;  %v2478_v18 = vld [vmem:[#allocation3 + $0x8c] ss:$16 sps:$4 sm:$0xff]   ;;  %v2480_v19 = vld [vmem:[#allocation3 + $0x80] ss:$16 sps:$4 sm:$0xff]  }
  0x2c   :  { %327 = vmatpush1.bf16.msra.mxu0 %v2462_v7  ;;  %440 = vmatpush1.bf16.msra.mxu1 %v2463_v8  ;;  %v2481_v20 = vld [vmem:[#allocation3 + $0x88] ss:$16 sps:$4 sm:$0xff]   ;;  %v2482_v21 = vld [vmem:[#allocation3 + $0xa4] ss:$16 sps:$4 sm:$0xff]   ;;  %v2484_v22 = vld [vmem:[#allocation3 + $0xac] ss:$16 sps:$4 sm:$0xff]  }
  0x2d   :  { %328 = vmatprep.subr.bf16.mxu0 %v2464_v9  ;;  %441 = vmatprep.subr.bf16.mxu1 %v2466_v10  ;;  %v2486_v23 = vld [vmem:[#allocation3 + $0xa0] ss:$16 sps:$4 sm:$0xff]   ;;  %v2487_v24 = vld [vmem:[#allocation3 + $0xa8] ss:$16 sps:$4 sm:$0xff]   ;;  %v2488_v25 = vld [vmem:[#allocation3 + $0xc4] ss:$16 sps:$4 sm:$0xff]   ;;  %v96_v10 = vlaneseq }
  0x2e   :  { %v2490_v26 = vld [vmem:[#allocation3 + $0xcc] ss:$16 sps:$4 sm:$0xff]   ;;  %v2492_v27 = vld [vmem:[#allocation3 + $0xc0] ss:$16 sps:$4 sm:$0xff]   ;;  %v2493_v28 = vld [vmem:[#allocation3 + $0xc8] ss:$16 sps:$4 sm:$0xff]  }
  0x2f   :  { %v2494_v29 = vld [vmem:[#allocation3 + $0xe4] ss:$16 sps:$4 sm:$0xff]   ;;  %v2496_v30 = vld [vmem:[#allocation3 + $0xec] ss:$16 sps:$4 sm:$0xff]   ;;  %v2498_v31 = vld [vmem:[#allocation3 + $0xe0] ss:$16 sps:$4 sm:$0xff]  }
  0x30   :  { %329 = vmatpush1.bf16.msra.mxu0 %v2468_v11  ;;  %442 = vmatpush1.bf16.msra.mxu1 %v2469_v12  ;;  %v2499_v32 = vld [vmem:[#allocation3 + $0xe8] ss:$16 sps:$4 sm:$0xff]   ;;  %v2948_v33 = vld [vmem:[#allocation5 + $0x4] ss:$16 sps:$4 sm:$0xff]   ;;  %v2950_v34 = vld [vmem:[#allocation5 + $0xc] ss:$16 sps:$4 sm:$0xff]  }
  0x31   :  { %330 = vmatprep.subr.bf16.mxu0 %v2470_v13  ;;  %443 = vmatprep.subr.bf16.mxu1 %v2472_v14  ;;  %v2500_v35 = vld [vmem:[%s3543_s0] sm:$0xff]   ;;  %v2961_v38 = vld [vmem:[#allocation5 + $0x8] ss:$16 sps:$4 sm:$0xff]   ;;  %v2963_v39 = vld [vmem:[#allocation5 + $0x2c] ss:$16 sps:$4 sm:$0xff]   ;;  %v97_v11 = vshrl.u32 %v96_v10, 7 }
  0x32   :  { %v2955_v36 = vld [vmem:[#allocation5] ss:$16 sps:$4 sm:$0xff]   ;;  %v2958_v37 = vld [vmem:[#allocation5 + $0x24] ss:$16 sps:$4 sm:$0xff]   ;;  %v2974_v42 = vld [vmem:[#allocation5 + $0x28] ss:$16 sps:$4 sm:$0xff]  }
  0x33   :  { %v2967_v40 = vld [vmem:[#allocation5 + $0x20] ss:$16 sps:$4 sm:$0xff]   ;;  %v2971_v41 = vld [vmem:[#allocation5 + $0x44] ss:$16 sps:$4 sm:$0xff]   ;;  %v2986_v46 = vld [vmem:[#allocation5 + $0x4c] ss:$16 sps:$4 sm:$0xff]  }
  0x34   :  { %331 = vmatpush1.bf16.msra.mxu0 %v2474_v15  ;;  %444 = vmatpush1.bf16.msra.mxu1 %v2475_v16  ;;  %v2981_v44 = vld [vmem:[#allocation5 + $0x40] ss:$16 sps:$4 sm:$0xff]   ;;  %v2983_v45 = vld [vmem:[#allocation5 + $0x64] ss:$16 sps:$4 sm:$0xff]   ;;  %v2989_v47 = vld [vmem:[#allocation5 + $0x48] ss:$16 sps:$4 sm:$0xff]  }
  0x35   :  { %332 = vmatprep.subr.bf16.mxu0 %v2476_v17  ;;  %445 = vmatprep.subr.bf16.mxu1 %v2478_v18  ;;  %v2991_v48 = vld [vmem:[#allocation5 + $0x6c] ss:$16 sps:$4 sm:$0xff]   ;;  %v2996_v49 = vld [vmem:[#allocation5 + $0x60] ss:$16 sps:$4 sm:$0xff]   ;;  %v2999_v50 = vld [vmem:[#allocation5 + $0x84] ss:$16 sps:$4 sm:$0xff]  }
  0x36   :  { %v3003_v51 = vld [vmem:[#allocation5 + $0x68] ss:$16 sps:$4 sm:$0xff]   ;;  %v2510_v52 = vld [vmem:[%s3543_s0 + $0x10] sm:$0xff]   ;;  %v3012_v54 = vld [vmem:[#allocation5 + $0x8c] ss:$16 sps:$4 sm:$0xff]   ;;  %v98_v12 = vsub.s32 0, %v97_v11 }
  0x37   :  { %v3009_v53 = vld [vmem:[#allocation5 + $0x80] ss:$16 sps:$4 sm:$0xff]   ;;  %v3015_v55 = vld [vmem:[#allocation5 + $0xa4] ss:$16 sps:$4 sm:$0xff]   ;;  %v3018_v56 = vld [vmem:[#allocation5 + $0x88] ss:$16 sps:$4 sm:$0xff]  }
  0x38   :  { %333 = vmatpush1.bf16.msra.mxu0 %v2480_v19  ;;  %446 = vmatpush1.bf16.msra.mxu1 %v2481_v20  ;;  %v3020_v57 = vld [vmem:[#allocation5 + $0xac] ss:$16 sps:$4 sm:$0xff]   ;;  %v3025_v58 = vld [vmem:[#allocation5 + $0xa0] ss:$16 sps:$4 sm:$0xff]   ;;  %v3029_v59 = vld [vmem:[#allocation5 + $0xc4] ss:$16 sps:$4 sm:$0xff]  }
  0x39   :  { %334 = vmatprep.subr.bf16.mxu0 %v2482_v21  ;;  %447 = vmatprep.subr.bf16.mxu1 %v2484_v22  ;;  %v3032_v60 = vld [vmem:[#allocation5 + $0xa8] ss:$16 sps:$4 sm:$0xff]   ;;  %v3039_v62 = vld [vmem:[#allocation5 + $0xc0] ss:$16 sps:$4 sm:$0xff]   ;;  %v3041_v63 = vld [vmem:[#allocation5 + $0xcc] ss:$16 sps:$4 sm:$0xff]  }
  0x3a   :  { %v2517_v61 = vld [vmem:[%s3543_s0 + $0x18] sm:$0xff]   ;;  %v3045_v1 = vld [vmem:[#allocation5 + $0xe4] ss:$16 sps:$4 sm:$0xff]   ;;  %v3055_v4 = vld [vmem:[#allocation5 + $0xe0] ss:$16 sps:$4 sm:$0xff]   ;;  %v102_v14 = vsub.s32 1, %v97_v11 }
  0x3b   :  { %v3047_v2 = vld [vmem:[#allocation5 + $0xc8] ss:$16 sps:$4 sm:$0xff]   ;;  %v3049_v3 = vld [vmem:[#allocation5 + $0xec] ss:$16 sps:$4 sm:$0xff]   ;;  %v2524_v6 = vld [vmem:[%s3543_s0 + $0x20] sm:$0xff]   ;;  %v110_v19 = vsub.s32 3, %v97_v11 }
  0x3c   :  { %335 = vmatpush1.bf16.msra.mxu0 %v2486_v23  ;;  %448 = vmatpush1.bf16.msra.mxu1 %v2487_v24  ;;  %v3059_v5 = vld [vmem:[#allocation5 + $0xe8] ss:$16 sps:$4 sm:$0xff]   ;;  %v2538_v8 = vld [vmem:[%s3543_s0 + $0x30] sm:$0xff]   ;;  %v94_v13 = vld [vmem:[%s3546_s3] sm:$0xf] }
  0x3d   :  { %336 = vmatprep.subr.bf16.mxu0 %v2488_v25  ;;  %449 = vmatprep.subr.bf16.mxu1 %v2490_v26  ;;  %v2531_v7 = vld [vmem:[%s3543_s0 + $0x28] sm:$0xff]   ;;  %v2546_v9 = vld [vmem:[%s3543_s0 + $0x38] sm:$0xff]   ;;  %v3125_v15 = vrot.slane %v94_v13, %v98_v12  ;;  %v3127_v16 = vrot.slane %v94_v13, %v102_v14 }
  0x40   :  { %337 = vmatpush1.bf16.msra.mxu0 %v2492_v27  ;;  %450 = vmatpush1.bf16.msra.mxu1 %v2493_v28  ;;  %v106_v27 = vsub.s32 2, %v97_v11 }
  0x41   :  { %338 = vmatprep.subr.bf16.mxu0 %v2494_v29  ;;  %451 = vmatprep.subr.bf16.mxu1 %v2496_v30 }
  0x44   :  { %339 = vmatpush1.bf16.msra.mxu0 %v2498_v31  ;;  %452 = vmatpush1.bf16.msra.mxu1 %v2499_v32  ;;  %v3132_v32 = vrot.slane %v94_v13, %v110_v19 }
  0x45   :  { %814 = vmatprep.subr.bf16.mxu0 %v2948_v33  ;;  %857 = vmatprep.subr.bf16.mxu1 %v2950_v34 }
  0x47   :  { %357 = vmatmul.mubr.bf16.vlgmr.msra.gmra.mrb[0].mxu0 %v2500_v35  ;;  %470 = vmatmul.mubr.bf16.vlgmr.msra.gmra.mrb[0].mxu1 %v2500_v35 }
  0x48   :  { %815 = vmatpush1.bf16.msra.mxu0 %v2955_v36  ;;  %366 = vmatprep.mubr.bf16.mxu0 %v2896_v0 }
  0x49   :  { %479 = vmatprep.mubr.bf16.mxu1 %v2896_v0  ;;  %816 = vmatprep.subr.bf16.mxu0 %v2958_v37 }
  0x4a   :  { %858 = vmatpush1.bf16.msra.mxu1 %v2961_v38 }
  0x4b   :  { %859 = vmatprep.subr.bf16.mxu1 %v2963_v39 }
  0x4c   :  { %817 = vmatpush1.bf16.msra.mxu0 %v2967_v40 }
  0x4d   :  { %818 = vmatprep.subr.bf16.mxu0 %v2971_v41 }
  0x4e   :  { %860 = vmatpush1.bf16.msra.mxu1 %v2974_v42 }
  0x4f   :  { %367 = vmatmul.mubr.bf16.gmra.mrb[4].mxu0 %v2504_v43  ;;  %480 = vmatmul.mubr.bf16.gmra.mrb[4].mxu1 %v2504_v43 }
  0x50   :  { %376 = vmatprep.mubr.bf16.mxu0 %v2896_v0  ;;  %489 = vmatprep.mubr.bf16.mxu1 %v2896_v0 }
  0x51   :  { %819 = vmatpush1.bf16.msra.mxu0 %v2981_v44  ;;  %861 = vmatprep.subr.bf16.mxu1 %v2986_v46 }
  0x52   :  { %820 = vmatprep.subr.bf16.mxu0 %v2983_v45  ;;  %862 = vmatpush1.bf16.msra.mxu1 %v2989_v47 }
  0x53   :  { %863 = vmatprep.subr.bf16.mxu1 %v2991_v48 }
  0x55   :  { %821 = vmatpush1.bf16.msra.mxu0 %v2996_v49 }
  0x56   :  { %822 = vmatprep.subr.bf16.mxu0 %v2999_v50  ;;  %864 = vmatpush1.bf16.msra.mxu1 %v3003_v51 }
  0x57   :  { %377 = vmatmul.mubr.bf16.gmra.mrb[8].mxu0 %v2510_v52  ;;  %490 = vmatmul.mubr.bf16.gmra.mrb[8].mxu1 %v2510_v52 }
  0x58   :  { %386 = vmatprep.mubr.bf16.mxu0 %v2896_v0  ;;  %499 = vmatprep.mubr.bf16.mxu1 %v2896_v0 }
  0x59   :  { %823 = vmatpush1.bf16.msra.mxu0 %v3009_v53  ;;  %865 = vmatprep.subr.bf16.mxu1 %v3012_v54 }
  0x5a   :  { %824 = vmatprep.subr.bf16.mxu0 %v3015_v55  ;;  %866 = vmatpush1.bf16.msra.mxu1 %v3018_v56 }
  0x5b   :  { %867 = vmatprep.subr.bf16.mxu1 %v3020_v57 }
  0x5d   :  { %825 = vmatpush1.bf16.msra.mxu0 %v3025_v58 }
  0x5e   :  { %826 = vmatprep.subr.bf16.mxu0 %v3029_v59  ;;  %868 = vmatpush1.bf16.msra.mxu1 %v3032_v60 }
  0x5f   :  { %387 = vmatmul.mubr.bf16.gmra.mrb[12].mxu0 %v2517_v61  ;;  %500 = vmatmul.mubr.bf16.gmra.mrb[12].mxu1 %v2517_v61  ;;  %v3135_v61 = vrot.slane %v94_v13, %v106_v27 }
  0x60   :  { %396 = vmatprep.mubr.bf16.mxu0 %v2896_v0  ;;  %509 = vmatprep.mubr.bf16.mxu1 %v2896_v0 }
  0x61   :  { %827 = vmatpush1.bf16.msra.mxu0 %v3039_v62  ;;  %869 = vmatprep.subr.bf16.mxu1 %v3041_v63 }
  0x62   :  { %828 = vmatprep.subr.bf16.mxu0 %v3045_v1  ;;  %870 = vmatpush1.bf16.msra.mxu1 %v3047_v2 }
  0x63   :  { %871 = vmatprep.subr.bf16.mxu1 %v3049_v3 }
  0x65   :  { %829 = vmatpush1.bf16.msra.mxu0 %v3055_v4 }
  0x66   :  { %872 = vmatpush1.bf16.msra.mxu1 %v3059_v5  ;;  %975 = vmatprep.subr.bf16.mxu0 %v2948_v33 }
  0x67   :  { %397 = vmatmul.mubr.bf16.gmra.mrb[16].mxu0 %v2524_v6  ;;  %510 = vmatmul.mubr.bf16.gmra.mrb[16].mxu1 %v2524_v6 }
  0x68   :  { %406 = vmatprep.mubr.bf16.mxu0 %v2896_v0  ;;  %519 = vmatprep.mubr.bf16.mxu1 %v2896_v0 }
  0x69   :  { %1018 = vmatprep.subr.bf16.mxu1 %v2950_v34 }
  0x6f   :  { %407 = vmatmul.mubr.bf16.gmra.mrb[20].mxu0 %v2531_v7  ;;  %520 = vmatmul.mubr.bf16.gmra.mrb[20].mxu1 %v2531_v7 }
  0x70   :  { %416 = vmatprep.mubr.bf16.mxu0 %v2896_v0  ;;  %529 = vmatprep.mubr.bf16.mxu1 %v2896_v0 }
  0x77   :  { %417 = vmatmul.mubr.bf16.gmra.mrb[24].mxu0 %v2538_v8  ;;  %530 = vmatmul.mubr.bf16.gmra.mrb[24].mxu1 %v2538_v8 }
  0x78   :  { %426 = vmatprep.mubr.bf16.mxu0 %v2896_v0  ;;  %539 = vmatprep.mubr.bf16.mxu1 %v2896_v0 }
  0x7f   :  { %427 = vmatmul.mubr.bf16.gmra.mrb[28].mxu0 %v2546_v9  ;;  %540 = vmatmul.mubr.bf16.gmra.mrb[28].mxu1 %v2546_v9 }
  0x80   :  { %846 = vmatprep.mubr.bf16.mxu0 %v2896_v0  ;;  %889 = vmatprep.mubr.bf16.mxu1 %v2896_v0 }
  0x87   :  { %847 = vmatmul.mubr.bf16.vlgmr.msra.gmra.mrb[0].mxu0 %v2896_v0  ;;  %890 = vmatmul.mubr.bf16.vlgmr.msra.gmra.mrb[0].mxu1 %v2896_v0 }
  0x88   :  { %976 = vmatpush1.bf16.msra.mxu0 %v2955_v36  ;;  %1019 = vmatpush1.bf16.msra.mxu1 %v2961_v38 }
  0x89   :  { %977 = vmatprep.subr.bf16.mxu0 %v2958_v37  ;;  %1020 = vmatprep.subr.bf16.mxu1 %v2963_v39 }
  0x8a   :  { %1007 = vmatprep.mubr.bf16.mxu0 %v2896_v0  ;;  %1050 = vmatprep.mubr.bf16.mxu1 %v2896_v0 }
  0x8c   :  { %978 = vmatpush1.bf16.msra.mxu0 %v2967_v40  ;;  %1021 = vmatpush1.bf16.msra.mxu1 %v2974_v42 }
  0x8d   :  { %979 = vmatprep.subr.bf16.mxu0 %v2971_v41  ;;  %1022 = vmatprep.subr.bf16.mxu1 %v2986_v46 }
  0x90   :  { %980 = vmatpush1.bf16.msra.mxu0 %v2981_v44  ;;  %1023 = vmatpush1.bf16.msra.mxu1 %v2989_v47 }
  0x91   :  { %981 = vmatprep.subr.bf16.mxu0 %v2983_v45  ;;  %1024 = vmatprep.subr.bf16.mxu1 %v2991_v48 }
  0x94   :  { %982 = vmatpush1.bf16.msra.mxu0 %v2996_v49  ;;  %1025 = vmatpush1.bf16.msra.mxu1 %v3003_v51 }
  0x95   :  { %983 = vmatprep.subr.bf16.mxu0 %v2999_v50  ;;  %1026 = vmatprep.subr.bf16.mxu1 %v3012_v54 }
  0x98   :  { %984 = vmatpush1.bf16.msra.mxu0 %v3009_v53  ;;  %1027 = vmatpush1.bf16.msra.mxu1 %v3018_v56 }
  0x99   :  { %985 = vmatprep.subr.bf16.mxu0 %v3015_v55  ;;  %1028 = vmatprep.subr.bf16.mxu1 %v3020_v57 }
  0x9c   :  { %986 = vmatpush1.bf16.msra.mxu0 %v3025_v58  ;;  %1029 = vmatpush1.bf16.msra.mxu1 %v3032_v60 }
  0x9d   :  { %987 = vmatprep.subr.bf16.mxu0 %v3029_v59  ;;  %1030 = vmatprep.subr.bf16.mxu1 %v3041_v63 }
  0xa0   :  { %988 = vmatpush1.bf16.msra.mxu0 %v3039_v62  ;;  %1031 = vmatpush1.bf16.msra.mxu1 %v3047_v2 }
  0xa1   :  { %989 = vmatprep.subr.bf16.mxu0 %v3045_v1  ;;  %1032 = vmatprep.subr.bf16.mxu1 %v3049_v3 }
  0xa4   :  { %990 = vmatpush1.bf16.msra.mxu0 %v3055_v4  ;;  %1033 = vmatpush1.bf16.msra.mxu1 %v3059_v5 }
  0xa5   :  { %1137 = vmatprep.subr.bf16.mxu0 %v2948_v33  ;;  %1180 = vmatprep.subr.bf16.mxu1 %v2950_v34 }
 0x15a   :  { %v848_v17 = vpop.f32.mrb[0].mxu0  ;;  %v891_v18 = vpop.f32.mrb[0].mxu1 }
 0x15b   :  { %v2319_v20 = vadd.f32 %v848_v17, %v3125_v15  ;;  %v850_v21 = vpop.f32.mrb[1].mxu0  ;;  %v893_v22 = vpop.f32.mrb[1].mxu1  ;;  %v2351_v7 = vadd.f32 %v891_v18, %v3135_v61 }
 0x15c   :  { %v2320_v23 = vadd.f32 %v850_v21, %v3127_v16  ;;  %v852_v24 = vpop.f32.mrb[2].mxu0  ;;  %v895_v25 = vpop.f32.mrb[2].mxu1  ;;  %v2352_v6 = vadd.f32 %v893_v22, %v3132_v32 }
 0x15d   :  { %v2178_v26 = vmul.f32 -1.442695, %v2319_v20  ;;  %v2321_v28 = vadd.f32 %v852_v24, %v3125_v15  ;;  %v854_v29 = vpop.f32.mrb[3].mxu0  ;;  %v897_v30 = vpop.f32.mrb[3].mxu1  ;;  %v2353_v10 = vadd.f32 %v895_v25, %v3135_v61 }
 0x15e   :  { %v2180_v31 = vmul.f32 -1.442695, %v2320_v23  ;;  %v2322_v35 = vadd.f32 %v854_v29, %v3127_v16  ;;  %v2182_v8 = vmul.f32 -1.442695, %v2352_v6  ;;  %v2354_v9 = vadd.f32 %v897_v30, %v3132_v32 }
 0x15f   :  { %2556 = vpow2.f32 %v2178_v26  ;;  %v2179_v43 = vmul.f32 -1.442695, %v2321_v28 }
 0x160   :  { %2558 = vpow2.f32 %v2180_v31  ;;  %v2181_v52 = vmul.f32 -1.442695, %v2322_v35  ;;  %v2183_v17 = vmul.f32 -1.442695, %v2354_v9 }
 0x161   :  { %2560 = vpow2.f32 %v2179_v43 }
 0x162   :  { %2562 = vpow2.f32 %v2181_v52 }
 0x163   :  { %2564 = vtanh.f32 %v2351_v7 }
 0x164   :  { %2566 = vpow2.f32 %v2182_v8 }
 0x165   :  { %2568 = vtanh.f32 %v2353_v10 }
 0x169   :  { %v2557_v11 = vpop.eup %2556 }
 0x16a   :  { %v2559_v12 = vpop.eup %2558  ;;  %v914_v14 = vadd.f32 1.0, %v2557_v11 }
 0x16b   :  { %v926_v19 = vadd.f32 1.0, %v2559_v12  ;;  %v2561_v13 = vpop.eup %2560 }
 0x16c   :  { %2570 = vrcp.f32 %v914_v14  ;;  %v915_v20 = vadd.f32 1.0, %v2561_v13  ;;  %v2563_v21 = vpop.eup %2562 }
 0x16d   :  { %2572 = vrcp.f32 %v926_v19  ;;  %v927_v18 = vadd.f32 1.0, %v2563_v21  ;;  %v2565_v22 = vpop.eup %2564 }
 0x16e   :  { %2574 = vpow2.f32 %v2183_v17  ;;  %v2567_v23 = vpop.eup %2566 }
 0x16f   :  { %2576 = vrcp.f32 %v915_v20  ;;  %v2569_v24 = vpop.eup %2568  ;;  %v940_v31 = vadd.f32 1.0, %v2567_v23 }
 0x170   :  { %2578 = vrcp.f32 %v927_v18 }
 0x171   :  { %2580 = vrcp.f32 %v940_v31 }
 0x176   :  { %v2571_v25 = vpop.eup %2570 }
 0x177   :  { %v2573_v26 = vpop.eup %2572  ;;  %v948_v27 = vmul.f32 %v2571_v25, %v2565_v22 }
 0x178   :  { %v2575_v28 = vpop.eup %2574  ;;  %v946_v29 = vmul.f32 0.0, %v2573_v26 }
 0x179   :  { %v2577_v30 = vpop.eup %2576  ;;  %v941_v6 = vadd.f32 1.0, %v2575_v28 }
 0x17a   :  { %v3141_v35 = vadd.f32 %v948_v27, %v946_v29  ;;  %v949_v43 = vmul.f32 %v2577_v30, %v2569_v24  ;;  %v2579_v52 = vpop.eup %2578 }
 0x17b   :  { %v947_v7 = vmul.f32 0.0, %v2579_v52  ;;  %v2581_v9 = vpop.eup %2580 }
 0x17c   :  { %2582 = vtanh.f32 %v3141_v35 }
 0x17d   :  { %v3144_v8 = vadd.f32 %v949_v43, %v947_v7  ;;  %2584 = vrcp.f32 %v941_v6 }
 0x17f   :  { %2586 = vtanh.f32 %v3144_v8 }
 0x186   :  { %v2583_v10 = vpop.eup %2582 }
 0x187   :  { %v2585_v11 = vpop.eup %2584  ;;  %v954_v14 = vmul.f32 %v2583_v10, %v2581_v9 }
 0x189   :  { %v2587_v12 = vpop.eup %2586 }
 0x18a   :  { %v955_v17 = vmul.f32 %v2587_v12, %v2585_v11 }
 0x18c   :  { %v956_v19 = vpack.c.bf16 %v955_v17, %v954_v14 }
 0x18e   :  { %2276 = vst [vmem:[%s3547_s4] sm:$0xff] %v956_v19   ;;  %1008 = vmatmul.mubr.bf16.vlgmr.msra.gmra.mrb[4].mxu0 %v956_v19  ;;  %1051 = vmatmul.mubr.bf16.vlgmr.msra.gmra.mrb[4].mxu1 %v956_v19 }
 0x18f   :  { %1138 = vmatpush1.bf16.msra.mxu0 %v2955_v36  ;;  %1181 = vmatpush1.bf16.msra.mxu1 %v2961_v38 }
 0x190   :  { %1139 = vmatprep.subr.bf16.mxu0 %v2958_v37  ;;  %1182 = vmatprep.subr.bf16.mxu1 %v2963_v39 }
 0x191   :  { %1169 = vmatprep.mubr.bf16.mxu0 %v2896_v0  ;;  %1212 = vmatprep.mubr.bf16.mxu1 %v2896_v0 }
 0x193   :  { %1140 = vmatpush1.bf16.msra.mxu0 %v2967_v40  ;;  %1183 = vmatpush1.bf16.msra.mxu1 %v2974_v42 }
 0x194   :  { %1141 = vmatprep.subr.bf16.mxu0 %v2971_v41  ;;  %1184 = vmatprep.subr.bf16.mxu1 %v2986_v46 }
 0x197   :  { %1142 = vmatpush1.bf16.msra.mxu0 %v2981_v44  ;;  %1185 = vmatpush1.bf16.msra.mxu1 %v2989_v47 }
 0x198   :  { %1143 = vmatprep.subr.bf16.mxu0 %v2983_v45  ;;  %1186 = vmatprep.subr.bf16.mxu1 %v2991_v48 }
 0x19b   :  { %1144 = vmatpush1.bf16.msra.mxu0 %v2996_v49  ;;  %1187 = vmatpush1.bf16.msra.mxu1 %v3003_v51 }
 0x19c   :  { %1145 = vmatprep.subr.bf16.mxu0 %v2999_v50  ;;  %1188 = vmatprep.subr.bf16.mxu1 %v3012_v54 }
 0x19f   :  { %1146 = vmatpush1.bf16.msra.mxu0 %v3009_v53  ;;  %1189 = vmatpush1.bf16.msra.mxu1 %v3018_v56 }
 0x1a0   :  { %1147 = vmatprep.subr.bf16.mxu0 %v3015_v55  ;;  %1190 = vmatprep.subr.bf16.mxu1 %v3020_v57 }
 0x1a3   :  { %1148 = vmatpush1.bf16.msra.mxu0 %v3025_v58  ;;  %1191 = vmatpush1.bf16.msra.mxu1 %v3032_v60 }
 0x1a4   :  { %1149 = vmatprep.subr.bf16.mxu0 %v3029_v59  ;;  %1192 = vmatprep.subr.bf16.mxu1 %v3041_v63 }
 0x1a7   :  { %1150 = vmatpush1.bf16.msra.mxu0 %v3039_v62  ;;  %1193 = vmatpush1.bf16.msra.mxu1 %v3047_v2 }
 0x1a8   :  { %1151 = vmatprep.subr.bf16.mxu0 %v3045_v1  ;;  %1194 = vmatprep.subr.bf16.mxu1 %v3049_v3 }
 0x1ab   :  { %1152 = vmatpush1.bf16.msra.mxu0 %v3055_v4  ;;  %1195 = vmatpush1.bf16.msra.mxu1 %v3059_v5 }
 0x1ac   :  { %1299 = vmatprep.subr.bf16.mxu0 %v2948_v33  ;;  %1342 = vmatprep.subr.bf16.mxu1 %v2950_v34 }
 0x261   :  { %v1009_v13 = vpop.f32.mrb[4].mxu0  ;;  %v1052_v20 = vpop.f32.mrb[4].mxu1 }
 0x262   :  { %v2323_v21 = vadd.f32 %v1009_v13, %v3125_v15  ;;  %v1011_v18 = vpop.f32.mrb[5].mxu0  ;;  %v1054_v22 = vpop.f32.mrb[5].mxu1  ;;  %v2355_v7 = vadd.f32 %v1052_v20, %v3135_v61 }
 0x263   :  { %v2324_v23 = vadd.f32 %v1011_v18, %v3127_v16  ;;  %v1013_v24 = vpop.f32.mrb[6].mxu0  ;;  %v1056_v25 = vpop.f32.mrb[6].mxu1  ;;  %v2356_v6 = vadd.f32 %v1054_v22, %v3132_v32 }
 0x264   :  { %v2186_v26 = vmul.f32 -1.442695, %v2323_v21  ;;  %v2325_v27 = vadd.f32 %v1013_v24, %v3125_v15  ;;  %v1015_v28 = vpop.f32.mrb[7].mxu0  ;;  %v1058_v29 = vpop.f32.mrb[7].mxu1  ;;  %v2357_v11 = vadd.f32 %v1056_v25, %v3135_v61 }
 0x265   :  { %v2188_v30 = vmul.f32 -1.442695, %v2324_v23  ;;  %v2326_v31 = vadd.f32 %v1015_v28, %v3127_v16  ;;  %v2190_v9 = vmul.f32 -1.442695, %v2356_v6  ;;  %v2358_v10 = vadd.f32 %v1058_v29, %v3132_v32 }
 0x266   :  { %2588 = vpow2.f32 %v2186_v26  ;;  %v2187_v43 = vmul.f32 -1.442695, %v2325_v27 }
 0x267   :  { %2590 = vpow2.f32 %v2188_v30  ;;  %v2189_v52 = vmul.f32 -1.442695, %v2326_v31  ;;  %v2191_v19 = vmul.f32 -1.442695, %v2358_v10 }
 0x268   :  { %2592 = vpow2.f32 %v2187_v43 }
 0x269   :  { %2594 = vpow2.f32 %v2189_v52 }
 0x26a   :  { %2596 = vtanh.f32 %v2355_v7 }
 0x26b   :  { %2598 = vpow2.f32 %v2190_v9 }
 0x26c   :  { %2600 = vtanh.f32 %v2357_v11 }
 0x270   :  { %v2589_v12 = vpop.eup %2588 }
 0x271   :  { %v2591_v14 = vpop.eup %2590  ;;  %v1075_v17 = vadd.f32 1.0, %v2589_v12 }
 0x272   :  { %v1087_v13 = vadd.f32 1.0, %v2591_v14  ;;  %v2593_v21 = vpop.eup %2592 }
 0x273   :  { %2602 = vrcp.f32 %v1075_v17  ;;  %v1076_v18 = vadd.f32 1.0, %v2593_v21  ;;  %v2595_v22 = vpop.eup %2594 }
 0x274   :  { %2604 = vrcp.f32 %v1087_v13  ;;  %v1088_v20 = vadd.f32 1.0, %v2595_v22  ;;  %v2597_v23 = vpop.eup %2596 }
 0x275   :  { %2606 = vpow2.f32 %v2191_v19  ;;  %v2599_v24 = vpop.eup %2598 }
 0x276   :  { %2608 = vrcp.f32 %v1076_v18  ;;  %v2601_v25 = vpop.eup %2600  ;;  %v1101_v43 = vadd.f32 1.0, %v2599_v24 }
 0x277   :  { %2610 = vrcp.f32 %v1088_v20 }
 0x278   :  { %2612 = vrcp.f32 %v1101_v43 }
 0x27d   :  { %v2603_v26 = vpop.eup %2602 }
 0x27e   :  { %v2605_v27 = vpop.eup %2604  ;;  %v1109_v28 = vmul.f32 %v2603_v26, %v2597_v23 }
 0x27f   :  { %v2607_v29 = vpop.eup %2606  ;;  %v1107_v30 = vmul.f32 %v2605_v27, %v3141_v35 }
 0x280   :  { %v2609_v31 = vpop.eup %2608  ;;  %v1102_v9 = vadd.f32 1.0, %v2607_v29 }
 0x281   :  { %v3193_v52 = vadd.f32 %v1109_v28, %v1107_v30  ;;  %v1110_v6 = vmul.f32 %v2609_v31, %v2601_v25  ;;  %v2611_v7 = vpop.eup %2610 }
 0x282   :  { %v1108_v10 = vmul.f32 %v2611_v7, %v3144_v8  ;;  %v2613_v12 = vpop.eup %2612 }
 0x283   :  { %2614 = vtanh.f32 %v3193_v52 }
 0x284   :  { %v3197_v11 = vadd.f32 %v1110_v6, %v1108_v10  ;;  %2616 = vrcp.f32 %v1102_v9 }
 0x286   :  { %2618 = vtanh.f32 %v3197_v11 }
 0x28d   :  { %v2615_v14 = vpop.eup %2614 }
 0x28e   :  { %v2617_v35 = vpop.eup %2616  ;;  %v1115_v19 = vmul.f32 %v2615_v14, %v2613_v12 }
 0x290   :  { %v2619_v17 = vpop.eup %2618 }
 0x291   :  { %v1116_v13 = vmul.f32 %v2619_v17, %v2617_v35 }
 0x293   :  { %v1117_v21 = vpack.c.bf16 %v1116_v13, %v1115_v19 }
 0x295   :  { %2312 = vst [vmem:[%s3547_s4 + $0x8] sm:$0xff] %v1117_v21   ;;  %1170 = vmatmul.mubr.bf16.vlgmr.msra.gmra.mrb[8].mxu0 %v1117_v21  ;;  %1213 = vmatmul.mubr.bf16.vlgmr.msra.gmra.mrb[8].mxu1 %v1117_v21 }
 0x296   :  { %1300 = vmatpush1.bf16.msra.mxu0 %v2955_v36  ;;  %1343 = vmatpush1.bf16.msra.mxu1 %v2961_v38 }
 0x297   :  { %1301 = vmatprep.subr.bf16.mxu0 %v2958_v37  ;;  %1344 = vmatprep.subr.bf16.mxu1 %v2963_v39 }
 0x298   :  { %1331 = vmatprep.mubr.bf16.mxu0 %v2896_v0  ;;  %1374 = vmatprep.mubr.bf16.mxu1 %v2896_v0 }
 0x29a   :  { %1302 = vmatpush1.bf16.msra.mxu0 %v2967_v40  ;;  %1345 = vmatpush1.bf16.msra.mxu1 %v2974_v42 }
 0x29b   :  { %1303 = vmatprep.subr.bf16.mxu0 %v2971_v41  ;;  %1346 = vmatprep.subr.bf16.mxu1 %v2986_v46 }
 0x29e   :  { %1304 = vmatpush1.bf16.msra.mxu0 %v2981_v44  ;;  %1347 = vmatpush1.bf16.msra.mxu1 %v2989_v47 }
 0x29f   :  { %1305 = vmatprep.subr.bf16.mxu0 %v2983_v45  ;;  %1348 = vmatprep.subr.bf16.mxu1 %v2991_v48 }
 0x2a2   :  { %1306 = vmatpush1.bf16.msra.mxu0 %v2996_v49  ;;  %1349 = vmatpush1.bf16.msra.mxu1 %v3003_v51 }
 0x2a3   :  { %1307 = vmatprep.subr.bf16.mxu0 %v2999_v50  ;;  %1350 = vmatprep.subr.bf16.mxu1 %v3012_v54 }
 0x2a6   :  { %1308 = vmatpush1.bf16.msra.mxu0 %v3009_v53  ;;  %1351 = vmatpush1.bf16.msra.mxu1 %v3018_v56 }
 0x2a7   :  { %1309 = vmatprep.subr.bf16.mxu0 %v3015_v55  ;;  %1352 = vmatprep.subr.bf16.mxu1 %v3020_v57 }
 0x2aa   :  { %1310 = vmatpush1.bf16.msra.mxu0 %v3025_v58  ;;  %1353 = vmatpush1.bf16.msra.mxu1 %v3032_v60 }
 0x2ab   :  { %1311 = vmatprep.subr.bf16.mxu0 %v3029_v59  ;;  %1354 = vmatprep.subr.bf16.mxu1 %v3041_v63 }
 0x2ae   :  { %1312 = vmatpush1.bf16.msra.mxu0 %v3039_v62  ;;  %1355 = vmatpush1.bf16.msra.mxu1 %v3047_v2 }
 0x2af   :  { %1313 = vmatprep.subr.bf16.mxu0 %v3045_v1  ;;  %1356 = vmatprep.subr.bf16.mxu1 %v3049_v3 }
 0x2b2   :  { %1314 = vmatpush1.bf16.msra.mxu0 %v3055_v4  ;;  %1357 = vmatpush1.bf16.msra.mxu1 %v3059_v5 }
 0x2b3   :  { %1461 = vmatprep.subr.bf16.mxu0 %v2948_v33  ;;  %1504 = vmatprep.subr.bf16.mxu1 %v2950_v34 }
 0x368   :  { %v1171_v8 = vpop.f32.mrb[8].mxu0  ;;  %v1214_v18 = vpop.f32.mrb[8].mxu1 }
 0x369   :  { %v2327_v22 = vadd.f32 %v1171_v8, %v3125_v15  ;;  %v1173_v20 = vpop.f32.mrb[9].mxu0  ;;  %v1216_v23 = vpop.f32.mrb[9].mxu1  ;;  %v2359_v10 = vadd.f32 %v1214_v18, %v3135_v61 }
 0x36a   :  { %v2328_v24 = vadd.f32 %v1173_v20, %v3127_v16  ;;  %v1175_v25 = vpop.f32.mrb[10].mxu0  ;;  %v1218_v26 = vpop.f32.mrb[10].mxu1  ;;  %v2360_v9 = vadd.f32 %v1216_v23, %v3132_v32 }
 0x36b   :  { %v2196_v27 = vmul.f32 -1.442695, %v2327_v22  ;;  %v2329_v28 = vadd.f32 %v1175_v25, %v3125_v15  ;;  %v1177_v29 = vpop.f32.mrb[11].mxu0  ;;  %v1220_v30 = vpop.f32.mrb[11].mxu1  ;;  %v2361_v35 = vadd.f32 %v1218_v26, %v3135_v61 }
 0x36c   :  { %v2198_v31 = vmul.f32 -1.442695, %v2328_v24  ;;  %v2330_v43 = vadd.f32 %v1177_v29, %v3127_v16  ;;  %v2200_v12 = vmul.f32 -1.442695, %v2360_v9  ;;  %v2362_v14 = vadd.f32 %v1220_v30, %v3132_v32 }
 0x36d   :  { %2620 = vpow2.f32 %v2196_v27  ;;  %v2197_v6 = vmul.f32 -1.442695, %v2329_v28 }
 0x36e   :  { %2622 = vpow2.f32 %v2198_v31  ;;  %v2199_v7 = vmul.f32 -1.442695, %v2330_v43  ;;  %v2201_v21 = vmul.f32 -1.442695, %v2362_v14 }
 0x36f   :  { %2624 = vpow2.f32 %v2197_v6 }
 0x370   :  { %2626 = vpow2.f32 %v2199_v7 }
 0x371   :  { %2628 = vtanh.f32 %v2359_v10 }
 0x372   :  { %2630 = vpow2.f32 %v2200_v12 }
 0x373   :  { %2632 = vtanh.f32 %v2361_v35 }
 0x377   :  { %v2621_v17 = vpop.eup %2620 }
 0x378   :  { %v2623_v19 = vpop.eup %2622  ;;  %v1237_v13 = vadd.f32 1.0, %v2621_v17 }
 0x379   :  { %v1249_v8 = vadd.f32 1.0, %v2623_v19  ;;  %v2625_v22 = vpop.eup %2624 }
 0x37a   :  { %2634 = vrcp.f32 %v1237_v13  ;;  %v1238_v20 = vadd.f32 1.0, %v2625_v22  ;;  %v2627_v23 = vpop.eup %2626 }
 0x37b   :  { %2636 = vrcp.f32 %v1249_v8  ;;  %v1250_v18 = vadd.f32 1.0, %v2627_v23  ;;  %v2629_v24 = vpop.eup %2628 }
 0x37c   :  { %2638 = vpow2.f32 %v2201_v21  ;;  %v2631_v25 = vpop.eup %2630 }
 0x37d   :  { %2640 = vrcp.f32 %v1238_v20  ;;  %v2633_v26 = vpop.eup %2632  ;;  %v1263_v6 = vadd.f32 1.0, %v2631_v25 }
 0x37e   :  { %2642 = vrcp.f32 %v1250_v18 }
 0x37f   :  { %2644 = vrcp.f32 %v1263_v6 }
 0x384   :  { %v2635_v27 = vpop.eup %2634 }
 0x385   :  { %v2637_v28 = vpop.eup %2636  ;;  %v1271_v29 = vmul.f32 %v2635_v27, %v2629_v24 }
 0x386   :  { %v2639_v30 = vpop.eup %2638  ;;  %v1269_v31 = vmul.f32 %v2637_v28, %v3193_v52 }
 0x387   :  { %v2641_v43 = vpop.eup %2640  ;;  %v1264_v12 = vadd.f32 1.0, %v2639_v30 }
 0x388   :  { %v3246_v7 = vadd.f32 %v1271_v29, %v1269_v31  ;;  %v1272_v9 = vmul.f32 %v2641_v43, %v2633_v26  ;;  %v2643_v10 = vpop.eup %2642 }
 0x389   :  { %v1270_v14 = vmul.f32 %v2643_v10, %v3197_v11  ;;  %v2645_v17 = vpop.eup %2644 }
 0x38a   :  { %2646 = vtanh.f32 %v3246_v7 }
 0x38b   :  { %v3250_v35 = vadd.f32 %v1272_v9, %v1270_v14  ;;  %2648 = vrcp.f32 %v1264_v12 }
 0x38d   :  { %2650 = vtanh.f32 %v3250_v35 }
 0x394   :  { %v2647_v19 = vpop.eup %2646 }
 0x395   :  { %v2649_v52 = vpop.eup %2648  ;;  %v1277_v21 = vmul.f32 %v2647_v19, %v2645_v17 }
 0x397   :  { %v2651_v13 = vpop.eup %2650 }
 0x398   :  { %v1278_v8 = vmul.f32 %v2651_v13, %v2649_v52 }
 0x39a   :  { %v1279_v22 = vpack.c.bf16 %v1278_v8, %v1277_v21 }
 0x39c   :  { %2313 = vst [vmem:[%s3547_s4 + $0x10] sm:$0xff] %v1279_v22   ;;  %1332 = vmatmul.mubr.bf16.vlgmr.msra.gmra.mrb[12].mxu0 %v1279_v22  ;;  %1375 = vmatmul.mubr.bf16.vlgmr.msra.gmra.mrb[12].mxu1 %v1279_v22 }
 0x39d   :  { %1462 = vmatpush1.bf16.msra.mxu0 %v2955_v36  ;;  %1505 = vmatpush1.bf16.msra.mxu1 %v2961_v38 }
 0x39e   :  { %1463 = vmatprep.subr.bf16.mxu0 %v2958_v37  ;;  %1506 = vmatprep.subr.bf16.mxu1 %v2963_v39 }
 0x39f   :  { %1493 = vmatprep.mubr.bf16.mxu0 %v2896_v0  ;;  %1536 = vmatprep.mubr.bf16.mxu1 %v2896_v0 }
 0x3a1   :  { %1464 = vmatpush1.bf16.msra.mxu0 %v2967_v40  ;;  %1507 = vmatpush1.bf16.msra.mxu1 %v2974_v42 }
 0x3a2   :  { %1465 = vmatprep.subr.bf16.mxu0 %v2971_v41  ;;  %1508 = vmatprep.subr.bf16.mxu1 %v2986_v46 }
 0x3a5   :  { %1466 = vmatpush1.bf16.msra.mxu0 %v2981_v44  ;;  %1509 = vmatpush1.bf16.msra.mxu1 %v2989_v47 }
 0x3a6   :  { %1467 = vmatprep.subr.bf16.mxu0 %v2983_v45  ;;  %1510 = vmatprep.subr.bf16.mxu1 %v2991_v48 }
 0x3a9   :  { %1468 = vmatpush1.bf16.msra.mxu0 %v2996_v49  ;;  %1511 = vmatpush1.bf16.msra.mxu1 %v3003_v51 }
 0x3aa   :  { %1469 = vmatprep.subr.bf16.mxu0 %v2999_v50  ;;  %1512 = vmatprep.subr.bf16.mxu1 %v3012_v54 }
 0x3ad   :  { %1470 = vmatpush1.bf16.msra.mxu0 %v3009_v53  ;;  %1513 = vmatpush1.bf16.msra.mxu1 %v3018_v56 }
 0x3ae   :  { %1471 = vmatprep.subr.bf16.mxu0 %v3015_v55  ;;  %1514 = vmatprep.subr.bf16.mxu1 %v3020_v57 }
 0x3b1   :  { %1472 = vmatpush1.bf16.msra.mxu0 %v3025_v58  ;;  %1515 = vmatpush1.bf16.msra.mxu1 %v3032_v60 }
 0x3b2   :  { %1473 = vmatprep.subr.bf16.mxu0 %v3029_v59  ;;  %1516 = vmatprep.subr.bf16.mxu1 %v3041_v63 }
 0x3b5   :  { %1474 = vmatpush1.bf16.msra.mxu0 %v3039_v62  ;;  %1517 = vmatpush1.bf16.msra.mxu1 %v3047_v2 }
 0x3b6   :  { %1475 = vmatprep.subr.bf16.mxu0 %v3045_v1  ;;  %1518 = vmatprep.subr.bf16.mxu1 %v3049_v3 }
 0x3b9   :  { %1476 = vmatpush1.bf16.msra.mxu0 %v3055_v4  ;;  %1519 = vmatpush1.bf16.msra.mxu1 %v3059_v5 }
 0x3ba   :  { %1623 = vmatprep.subr.bf16.mxu0 %v2948_v33  ;;  %1666 = vmatprep.subr.bf16.mxu1 %v2950_v34 }
 0x46f   :  { %v1333_v36 = vpop.f32.mrb[12].mxu0  ;;  %v1376_v37 = vpop.f32.mrb[12].mxu1 }
 0x470   :  { %v2331_v38 = vadd.f32 %v1333_v36, %v3125_v15  ;;  %v1335_v39 = vpop.f32.mrb[13].mxu0  ;;  %v1378_v40 = vpop.f32.mrb[13].mxu1  ;;  %v2363_v53 = vadd.f32 %v1376_v37, %v3135_v61 }
 0x471   :  { %v2332_v41 = vadd.f32 %v1335_v39, %v3127_v16  ;;  %v1337_v42 = vpop.f32.mrb[14].mxu0  ;;  %v1380_v44 = vpop.f32.mrb[14].mxu1  ;;  %v2364_v51 = vadd.f32 %v1378_v40, %v3132_v32 }
 0x472   :  { %v2206_v45 = vmul.f32 -1.442695, %v2331_v38  ;;  %v2333_v46 = vadd.f32 %v1337_v42, %v3125_v15  ;;  %v1339_v47 = vpop.f32.mrb[15].mxu0  ;;  %v1382_v48 = vpop.f32.mrb[15].mxu1  ;;  %v2365_v56 = vadd.f32 %v1380_v44, %v3135_v61  ;;  %v3315_v42 = vld [vmem:[#allocation5 + $0x24] ss:$16 sps:$4 sm:$0xff]  }
 0x473   :  { %v2208_v49 = vmul.f32 -1.442695, %v2332_v41  ;;  %v2334_v33 = vadd.f32 %v1339_v47, %v3127_v16  ;;  %v2210_v54 = vmul.f32 -1.442695, %v2364_v51  ;;  %v2366_v55 = vadd.f32 %v1382_v48, %v3132_v32  ;;  %v3312_v41 = vld [vmem:[#allocation5 + $0x8] ss:$16 sps:$4 sm:$0xff]  }
 0x474   :  { %2652 = vpow2.f32 %v2206_v45  ;;  %v2207_v34 = vmul.f32 -1.442695, %v2333_v46  ;;  %v3318_v44 = vld [vmem:[#allocation5 + $0x2c] ss:$16 sps:$4 sm:$0xff]   ;;  %v3323_v45 = vld [vmem:[#allocation5 + $0x20] ss:$16 sps:$4 sm:$0xff]  }
 0x475   :  { %2654 = vpow2.f32 %v2208_v49  ;;  %v2209_v50 = vmul.f32 -1.442695, %v2334_v33  ;;  %v2211_v23 = vmul.f32 -1.442695, %v2366_v55  ;;  %v3326_v46 = vld [vmem:[#allocation5 + $0x28] ss:$16 sps:$4 sm:$0xff]  }
 0x476   :  { %2656 = vpow2.f32 %v2207_v34  ;;  %v3329_v47 = vld [vmem:[#allocation5 + $0x44] ss:$16 sps:$4 sm:$0xff]   ;;  %v3332_v48 = vld [vmem:[#allocation5 + $0x4c] ss:$16 sps:$4 sm:$0xff]   ;;  %v3335_v49 = vld [vmem:[#allocation5 + $0x40] ss:$16 sps:$4 sm:$0xff]  }
 0x477   :  { %2658 = vpow2.f32 %v2209_v50  ;;  %v3338_v33 = vld [vmem:[#allocation5 + $0x48] ss:$16 sps:$4 sm:$0xff]   ;;  %v3341_v34 = vld [vmem:[#allocation5 + $0x64] ss:$16 sps:$4 sm:$0xff]   ;;  %v3344_v50 = vld [vmem:[#allocation5 + $0x6c] ss:$16 sps:$4 sm:$0xff]  }
 0x478   :  { %2660 = vtanh.f32 %v2363_v53  ;;  %v3347_v51 = vld [vmem:[#allocation5 + $0x60] ss:$16 sps:$4 sm:$0xff]   ;;  %v3350_v53 = vld [vmem:[#allocation5 + $0x68] ss:$16 sps:$4 sm:$0xff]   ;;  %v3356_v55 = vld [vmem:[#allocation5 + $0x8c] ss:$16 sps:$4 sm:$0xff]  }
 0x479   :  { %2662 = vpow2.f32 %v2210_v54  ;;  %v3353_v54 = vld [vmem:[#allocation5 + $0x84] ss:$16 sps:$4 sm:$0xff]  }
 0x47a   :  { %2664 = vtanh.f32 %v2365_v56  ;;  %v3359_v56 = vld [vmem:[#allocation5 + $0x80] ss:$16 sps:$4 sm:$0xff]  }
 0x47e   :  { %v2653_v57 = vpop.eup %2652 }
 0x47f   :  { %v2655_v11 = vpop.eup %2654  ;;  %v1399_v20 = vadd.f32 1.0, %v2653_v57  ;;  %v3362_v57 = vld [vmem:[#allocation5 + $0x88] ss:$16 sps:$4 sm:$0xff]  }
 0x480   :  { %v1411_v18 = vadd.f32 1.0, %v2655_v11  ;;  %v2657_v24 = vpop.eup %2656  ;;  %v3365_v11 = vld [vmem:[#allocation5 + $0xa4] ss:$16 sps:$4 sm:$0xff]  }
 0x481   :  { %2666 = vrcp.f32 %v1399_v20  ;;  %v1400_v25 = vadd.f32 1.0, %v2657_v24  ;;  %v2659_v26 = vpop.eup %2658  ;;  %v3368_v20 = vld [vmem:[#allocation5 + $0xac] ss:$16 sps:$4 sm:$0xff]  }
 0x482   :  { %2668 = vrcp.f32 %v1411_v18  ;;  %v1412_v27 = vadd.f32 1.0, %v2659_v26  ;;  %v2661_v28 = vpop.eup %2660 }
 0x483   :  { %2670 = vpow2.f32 %v2211_v23  ;;  %v2663_v29 = vpop.eup %2662  ;;  %v3381_v23 = vld [vmem:[#allocation5 + $0x4] ss:$16 sps:$4 sm:$0xff]  }
 0x484   :  { %2672 = vrcp.f32 %v1400_v25  ;;  %v2665_v30 = vpop.eup %2664  ;;  %v1425_v14 = vadd.f32 1.0, %v2663_v29 }
 0x485   :  { %2674 = vrcp.f32 %v1412_v27 }
 0x486   :  { %2676 = vrcp.f32 %v1425_v14 }
 0x48b   :  { %v2667_v31 = vpop.eup %2666 }
 0x48c   :  { %v2669_v43 = vpop.eup %2668  ;;  %v1433_v6 = vmul.f32 %v2667_v31, %v2661_v28 }
 0x48d   :  { %v2671_v9 = vpop.eup %2670  ;;  %v1431_v10 = vmul.f32 %v2669_v43, %v3246_v7 }
 0x48e   :  { %v2673_v12 = vpop.eup %2672  ;;  %v1426_v13 = vadd.f32 1.0, %v2671_v9 }
 0x48f   :  { %v3299_v17 = vadd.f32 %v1433_v6, %v1431_v10  ;;  %v1434_v19 = vmul.f32 %v2673_v12, %v2665_v30  ;;  %v2675_v52 = vpop.eup %2674 }
 0x490   :  { %v1432_v21 = vmul.f32 %v2675_v52, %v3250_v35  ;;  %v2677_v22 = vpop.eup %2676  ;;  %v3309_v35 = vld [vmem:[#allocation5] ss:$16 sps:$4 sm:$0xff]  }
 0x491   :  { %2678 = vtanh.f32 %v3299_v17 }
 0x492   :  { %v3303_v8 = vadd.f32 %v1434_v19, %v1432_v21  ;;  %2680 = vrcp.f32 %v1426_v13 }
 0x494   :  { %2682 = vtanh.f32 %v3303_v8 }
 0x49b   :  { %v2679_v36 = vpop.eup %2678 }
 0x49c   :  { %v2681_v7 = vpop.eup %2680  ;;  %v1439_v38 = vmul.f32 %v2679_v36, %v2677_v22 }
 0x49e   :  { %v2683_v37 = vpop.eup %2682 }
 0x49f   :  { %v1440_v39 = vmul.f32 %v2683_v37, %v2681_v7 }
 0x4a1   :  { %v1441_v40 = vpack.c.bf16 %v1440_v39, %v1439_v38 }
 0x4a3   :  { %2314 = vst [vmem:[%s3547_s4 + $0x18] sm:$0xff] %v1441_v40   ;;  %1494 = vmatmul.mubr.bf16.vlgmr.msra.gmra.mrb[16].mxu0 %v1441_v40  ;;  %1537 = vmatmul.mubr.bf16.vlgmr.msra.gmra.mrb[16].mxu1 %v1441_v40 }
 0x4a4   :  { %1624 = vmatpush1.bf16.msra.mxu0 %v3309_v35  ;;  %1667 = vmatpush1.bf16.msra.mxu1 %v3312_v41 }
 0x4a5   :  { %1625 = vmatprep.subr.bf16.mxu0 %v3315_v42  ;;  %1668 = vmatprep.subr.bf16.mxu1 %v3318_v44 }
 0x4a6   :  { %1655 = vmatprep.mubr.bf16.mxu0 %v2896_v0  ;;  %1698 = vmatprep.mubr.bf16.mxu1 %v2896_v0 }
 0x4a8   :  { %1626 = vmatpush1.bf16.msra.mxu0 %v3323_v45  ;;  %1669 = vmatpush1.bf16.msra.mxu1 %v3326_v46 }
 0x4a9   :  { %1627 = vmatprep.subr.bf16.mxu0 %v3329_v47  ;;  %1670 = vmatprep.subr.bf16.mxu1 %v3332_v48 }
 0x4ac   :  { %1628 = vmatpush1.bf16.msra.mxu0 %v3335_v49  ;;  %1671 = vmatpush1.bf16.msra.mxu1 %v3338_v33 }
 0x4ad   :  { %1629 = vmatprep.subr.bf16.mxu0 %v3341_v34  ;;  %1672 = vmatprep.subr.bf16.mxu1 %v3344_v50 }
 0x4b0   :  { %1630 = vmatpush1.bf16.msra.mxu0 %v3347_v51  ;;  %1673 = vmatpush1.bf16.msra.mxu1 %v3350_v53 }
 0x4b1   :  { %1631 = vmatprep.subr.bf16.mxu0 %v3353_v54  ;;  %1674 = vmatprep.subr.bf16.mxu1 %v3356_v55 }
 0x4b4   :  { %1632 = vmatpush1.bf16.msra.mxu0 %v3359_v56  ;;  %1675 = vmatpush1.bf16.msra.mxu1 %v3362_v57 }
 0x4b5   :  { %1633 = vmatprep.subr.bf16.mxu0 %v3365_v11  ;;  %1676 = vmatprep.subr.bf16.mxu1 %v3368_v20 }
 0x4b8   :  { %1634 = vmatpush1.bf16.msra.mxu0 %v3025_v58  ;;  %1677 = vmatpush1.bf16.msra.mxu1 %v3032_v60  ;;  %v3384_v58 = vld [vmem:[#allocation5 + $0xc] ss:$16 sps:$4 sm:$0xff]  }
 0x4b9   :  { %1635 = vmatprep.subr.bf16.mxu0 %v3029_v59  ;;  %1678 = vmatprep.subr.bf16.mxu1 %v3041_v63 }
 0x4bc   :  { %1636 = vmatpush1.bf16.msra.mxu0 %v3039_v62  ;;  %1679 = vmatpush1.bf16.msra.mxu1 %v3047_v2 }
 0x4bd   :  { %1637 = vmatprep.subr.bf16.mxu0 %v3045_v1  ;;  %1680 = vmatprep.subr.bf16.mxu1 %v3049_v3 }
 0x4c0   :  { %1638 = vmatpush1.bf16.msra.mxu0 %v3055_v4  ;;  %1681 = vmatpush1.bf16.msra.mxu1 %v3059_v5 }
 0x4c1   :  { %1785 = vmatprep.subr.bf16.mxu0 %v3381_v23  ;;  %1828 = vmatprep.subr.bf16.mxu1 %v3384_v58 }
 0x576   :  { %v1495_v59 = vpop.f32.mrb[16].mxu0  ;;  %v1538_v60 = vpop.f32.mrb[16].mxu1 }
 0x577   :  { %v2335_v62 = vadd.f32 %v1495_v59, %v3125_v15  ;;  %v1497_v63 = vpop.f32.mrb[17].mxu0  ;;  %v1540_v1 = vpop.f32.mrb[17].mxu1  ;;  %v2367_v31 = vadd.f32 %v1538_v60, %v3135_v61 }
 0x578   :  { %v2336_v2 = vadd.f32 %v1497_v63, %v3127_v16  ;;  %v1499_v3 = vpop.f32.mrb[18].mxu0  ;;  %v1542_v4 = vpop.f32.mrb[18].mxu1  ;;  %v2368_v30 = vadd.f32 %v1540_v1, %v3132_v32 }
 0x579   :  { %v2216_v18 = vmul.f32 -1.442695, %v2335_v62  ;;  %v2337_v5 = vadd.f32 %v1499_v3, %v3125_v15  ;;  %v1501_v24 = vpop.f32.mrb[19].mxu0  ;;  %v1544_v25 = vpop.f32.mrb[19].mxu1  ;;  %v2369_v9 = vadd.f32 %v1542_v4, %v3135_v61 }
 0x57a   :  { %v2218_v26 = vmul.f32 -1.442695, %v2336_v2  ;;  %v2338_v27 = vadd.f32 %v1501_v24, %v3127_v16  ;;  %v2220_v43 = vmul.f32 -1.442695, %v2368_v30  ;;  %v2370_v6 = vadd.f32 %v1544_v25, %v3132_v32 }
 0x57b   :  { %2684 = vpow2.f32 %v2216_v18  ;;  %v2217_v28 = vmul.f32 -1.442695, %v2337_v5 }
 0x57c   :  { %2686 = vpow2.f32 %v2218_v26  ;;  %v2219_v29 = vmul.f32 -1.442695, %v2338_v27  ;;  %v2221_v19 = vmul.f32 -1.442695, %v2370_v6  ;;  %v3437_v6 = vld [vmem:[#allocation5 + $0xcc] ss:$16 sps:$4 sm:$0xff]  }
 0x57d   :  { %2688 = vpow2.f32 %v2217_v28 }
 0x57e   :  { %2690 = vpow2.f32 %v2219_v29 }
 0x57f   :  { %2692 = vtanh.f32 %v2367_v31  ;;  %v3431_v31 = vld [vmem:[#allocation5 + $0xa8] ss:$16 sps:$4 sm:$0xff]  }
 0x580   :  { %2694 = vpow2.f32 %v2220_v43  ;;  %v3434_v43 = vld [vmem:[#allocation5 + $0xc4] ss:$16 sps:$4 sm:$0xff]  }
 0x581   :  { %2696 = vtanh.f32 %v2369_v9  ;;  %v3440_v9 = vld [vmem:[#allocation5 + $0xc0] ss:$16 sps:$4 sm:$0xff]  }
 0x585   :  { %v2685_v10 = vpop.eup %2684 }
 0x586   :  { %v2687_v12 = vpop.eup %2686  ;;  %v1561_v14 = vadd.f32 1.0, %v2685_v10  ;;  %v3443_v10 = vld [vmem:[#allocation5 + $0xc8] ss:$16 sps:$4 sm:$0xff]  }
 0x587   :  { %v1573_v52 = vadd.f32 1.0, %v2687_v12  ;;  %v2689_v13 = vpop.eup %2688  ;;  %v3446_v12 = vld [vmem:[#allocation5 + $0xe4] ss:$16 sps:$4 sm:$0xff]  }
 0x588   :  { %2698 = vrcp.f32 %v1561_v14  ;;  %v1562_v21 = vadd.f32 1.0, %v2689_v13  ;;  %v2691_v22 = vpop.eup %2690  ;;  %v3449_v14 = vld [vmem:[#allocation5 + $0xec] ss:$16 sps:$4 sm:$0xff]  }
 0x589   :  { %2700 = vrcp.f32 %v1573_v52  ;;  %v1574_v36 = vadd.f32 1.0, %v2691_v22  ;;  %v2693_v7 = vpop.eup %2692  ;;  %v3455_v52 = vld [vmem:[#allocation5 + $0xe8] ss:$16 sps:$4 sm:$0xff]  }
 0x58a   :  { %2702 = vpow2.f32 %v2221_v19  ;;  %v2695_v37 = vpop.eup %2694  ;;  %v3452_v19 = vld [vmem:[#allocation5 + $0xe0] ss:$16 sps:$4 sm:$0xff]  }
 0x58b   :  { %2704 = vrcp.f32 %v1562_v21  ;;  %v2697_v38 = vpop.eup %2696  ;;  %v1587_v1 = vadd.f32 1.0, %v2695_v37 }
 0x58c   :  { %2706 = vrcp.f32 %v1574_v36 }
 0x58d   :  { %2708 = vrcp.f32 %v1587_v1 }
 0x592   :  { %v2699_v39 = vpop.eup %2698 }
 0x593   :  { %v2701_v40 = vpop.eup %2700  ;;  %v1595_v59 = vmul.f32 %v2699_v39, %v2693_v7 }
 0x594   :  { %v2703_v60 = vpop.eup %2702  ;;  %v1593_v62 = vmul.f32 %v2701_v40, %v3299_v17 }
 0x595   :  { %v2705_v63 = vpop.eup %2704  ;;  %v1588_v18 = vadd.f32 1.0, %v2703_v60 }
 0x596   :  { %v3396_v2 = vadd.f32 %v1595_v59, %v1593_v62  ;;  %v1596_v3 = vmul.f32 %v2705_v63, %v2697_v38  ;;  %v2707_v4 = vpop.eup %2706 }
 0x597   :  { %v1594_v5 = vmul.f32 %v2707_v4, %v3303_v8  ;;  %v2709_v25 = vpop.eup %2708  ;;  %v3428_v8 = vld [vmem:[#allocation5 + $0xa0] ss:$16 sps:$4 sm:$0xff]  }
 0x598   :  { %2710 = vtanh.f32 %v3396_v2 }
 0x599   :  { %v3400_v24 = vadd.f32 %v1596_v3, %v1594_v5  ;;  %2712 = vrcp.f32 %v1588_v18 }
 0x59b   :  { %2714 = vtanh.f32 %v3400_v24 }
 0x5a2   :  { %v2711_v26 = vpop.eup %2710 }
 0x5a3   :  { %v2713_v17 = vpop.eup %2712  ;;  %v1601_v28 = vmul.f32 %v2711_v26, %v2709_v25 }
 0x5a5   :  { %v2715_v27 = vpop.eup %2714 }
 0x5a6   :  { %v1602_v29 = vmul.f32 %v2715_v27, %v2713_v17 }
 0x5a8   :  { %v1603_v30 = vpack.c.bf16 %v1602_v29, %v1601_v28 }
 0x5aa   :  { %2315 = vst [vmem:[%s3547_s4 + $0x20] sm:$0xff] %v1603_v30   ;;  %1656 = vmatmul.mubr.bf16.vlgmr.msra.gmra.mrb[20].mxu0 %v1603_v30  ;;  %1699 = vmatmul.mubr.bf16.vlgmr.msra.gmra.mrb[20].mxu1 %v1603_v30 }
 0x5ab   :  { %1786 = vmatpush1.bf16.msra.mxu0 %v3309_v35  ;;  %1829 = vmatpush1.bf16.msra.mxu1 %v3312_v41 }
 0x5ac   :  { %1787 = vmatprep.subr.bf16.mxu0 %v3315_v42  ;;  %1830 = vmatprep.subr.bf16.mxu1 %v3318_v44 }
 0x5ad   :  { %1817 = vmatprep.mubr.bf16.mxu0 %v2896_v0  ;;  %1860 = vmatprep.mubr.bf16.mxu1 %v2896_v0 }
 0x5af   :  { %1788 = vmatpush1.bf16.msra.mxu0 %v3323_v45  ;;  %1831 = vmatpush1.bf16.msra.mxu1 %v3326_v46 }
 0x5b0   :  { %1789 = vmatprep.subr.bf16.mxu0 %v3329_v47  ;;  %1832 = vmatprep.subr.bf16.mxu1 %v3332_v48 }
 0x5b3   :  { %1790 = vmatpush1.bf16.msra.mxu0 %v3335_v49  ;;  %1833 = vmatpush1.bf16.msra.mxu1 %v3338_v33 }
 0x5b4   :  { %1791 = vmatprep.subr.bf16.mxu0 %v3341_v34  ;;  %1834 = vmatprep.subr.bf16.mxu1 %v3344_v50 }
 0x5b7   :  { %1792 = vmatpush1.bf16.msra.mxu0 %v3347_v51  ;;  %1835 = vmatpush1.bf16.msra.mxu1 %v3350_v53 }
 0x5b8   :  { %1793 = vmatprep.subr.bf16.mxu0 %v3353_v54  ;;  %1836 = vmatprep.subr.bf16.mxu1 %v3356_v55 }
 0x5bb   :  { %1794 = vmatpush1.bf16.msra.mxu0 %v3359_v56  ;;  %1837 = vmatpush1.bf16.msra.mxu1 %v3362_v57 }
 0x5bc   :  { %1795 = vmatprep.subr.bf16.mxu0 %v3365_v11  ;;  %1838 = vmatprep.subr.bf16.mxu1 %v3368_v20 }
 0x5bf   :  { %1796 = vmatpush1.bf16.msra.mxu0 %v3428_v8  ;;  %1839 = vmatpush1.bf16.msra.mxu1 %v3431_v31 }
 0x5c0   :  { %1797 = vmatprep.subr.bf16.mxu0 %v3434_v43  ;;  %1840 = vmatprep.subr.bf16.mxu1 %v3437_v6 }
 0x5c3   :  { %1798 = vmatpush1.bf16.msra.mxu0 %v3440_v9  ;;  %1841 = vmatpush1.bf16.msra.mxu1 %v3443_v10 }
 0x5c4   :  { %1799 = vmatprep.subr.bf16.mxu0 %v3446_v12  ;;  %1842 = vmatprep.subr.bf16.mxu1 %v3449_v14 }
 0x5c7   :  { %1800 = vmatpush1.bf16.msra.mxu0 %v3452_v19  ;;  %1843 = vmatpush1.bf16.msra.mxu1 %v3455_v52 }
 0x5c8   :  { %1947 = vmatprep.subr.bf16.mxu0 %v3381_v23  ;;  %1990 = vmatprep.subr.bf16.mxu1 %v3384_v58 }
 0x67d   :  { %v1657_v13 = vpop.f32.mrb[20].mxu0  ;;  %v1700_v21 = vpop.f32.mrb[20].mxu1 }
 0x67e   :  { %v2339_v22 = vadd.f32 %v1657_v13, %v3125_v15  ;;  %v1659_v36 = vpop.f32.mrb[21].mxu0  ;;  %v1702_v7 = vpop.f32.mrb[21].mxu1  ;;  %v2371_v4 = vadd.f32 %v1700_v21, %v3135_v61 }
 0x67f   :  { %v2340_v37 = vadd.f32 %v1659_v36, %v3127_v16  ;;  %v1661_v38 = vpop.f32.mrb[22].mxu0  ;;  %v1704_v39 = vpop.f32.mrb[22].mxu1  ;;  %v2372_v3 = vadd.f32 %v1702_v7, %v3132_v32 }
 0x680   :  { %v2226_v40 = vmul.f32 -1.442695, %v2339_v22  ;;  %v2341_v59 = vadd.f32 %v1661_v38, %v3125_v15  ;;  %v1663_v60 = vpop.f32.mrb[23].mxu0  ;;  %v1706_v62 = vpop.f32.mrb[23].mxu1  ;;  %v2373_v25 = vadd.f32 %v1704_v39, %v3135_v61 }
 0x681   :  { %v2228_v63 = vmul.f32 -1.442695, %v2340_v37  ;;  %v2342_v23 = vadd.f32 %v1663_v60, %v3127_v16  ;;  %v2230_v18 = vmul.f32 -1.442695, %v2372_v3  ;;  %v2374_v5 = vadd.f32 %v1706_v62, %v3132_v32 }
 0x682   :  { %2716 = vpow2.f32 %v2226_v40  ;;  %v2227_v58 = vmul.f32 -1.442695, %v2341_v59 }
 0x683   :  { %2718 = vpow2.f32 %v2228_v63  ;;  %v2229_v1 = vmul.f32 -1.442695, %v2342_v23  ;;  %v2231_v28 = vmul.f32 -1.442695, %v2374_v5 }
 0x684   :  { %2720 = vpow2.f32 %v2227_v58 }
 0x685   :  { %2722 = vpow2.f32 %v2229_v1 }
 0x686   :  { %2724 = vtanh.f32 %v2371_v4 }
 0x687   :  { %2726 = vpow2.f32 %v2230_v18 }
 0x688   :  { %2728 = vtanh.f32 %v2373_v25 }
 0x68c   :  { %v2717_v26 = vpop.eup %2716 }
 0x68d   :  { %v2719_v17 = vpop.eup %2718  ;;  %v1723_v27 = vadd.f32 1.0, %v2717_v26 }
 0x68e   :  { %v1735_v29 = vadd.f32 1.0, %v2719_v17  ;;  %v2721_v30 = vpop.eup %2720 }
 0x68f   :  { %2730 = vrcp.f32 %v1723_v27  ;;  %v1724_v13 = vadd.f32 1.0, %v2721_v30  ;;  %v2723_v22 = vpop.eup %2722 }
 0x690   :  { %2732 = vrcp.f32 %v1735_v29  ;;  %v1736_v21 = vadd.f32 1.0, %v2723_v22  ;;  %v2725_v36 = vpop.eup %2724 }
 0x691   :  { %2734 = vpow2.f32 %v2231_v28  ;;  %v2727_v7 = vpop.eup %2726 }
 0x692   :  { %2736 = vrcp.f32 %v1724_v13  ;;  %v2729_v37 = vpop.eup %2728  ;;  %v1749_v63 = vadd.f32 1.0, %v2727_v7 }
 0x693   :  { %2738 = vrcp.f32 %v1736_v21 }
 0x694   :  { %2740 = vrcp.f32 %v1749_v63 }
 0x699   :  { %v2731_v38 = vpop.eup %2730 }
 0x69a   :  { %v2733_v39 = vpop.eup %2732  ;;  %v1757_v40 = vmul.f32 %v2731_v38, %v2725_v36 }
 0x69b   :  { %v2735_v59 = vpop.eup %2734  ;;  %v1755_v60 = vmul.f32 %v2733_v39, %v3396_v2 }
 0x69c   :  { %v2737_v62 = vpop.eup %2736  ;;  %v1750_v3 = vadd.f32 1.0, %v2735_v59 }
 0x69d   :  { %v3469_v23 = vadd.f32 %v1757_v40, %v1755_v60  ;;  %v1758_v58 = vmul.f32 %v2737_v62, %v2729_v37  ;;  %v2739_v1 = vpop.eup %2738 }
 0x69e   :  { %v1756_v4 = vmul.f32 %v2739_v1, %v3400_v24  ;;  %v2741_v5 = vpop.eup %2740 }
 0x69f   :  { %2742 = vtanh.f32 %v3469_v23 }
 0x6a0   :  { %v3473_v18 = vadd.f32 %v1758_v58, %v1756_v4  ;;  %2744 = vrcp.f32 %v1750_v3 }
 0x6a2   :  { %2746 = vtanh.f32 %v3473_v18 }
 0x6a9   :  { %v2743_v25 = vpop.eup %2742 }
 0x6aa   :  { %v2745_v2 = vpop.eup %2744  ;;  %v1763_v17 = vmul.f32 %v2743_v25, %v2741_v5 }
 0x6ac   :  { %v2747_v26 = vpop.eup %2746 }
 0x6ad   :  { %v1764_v27 = vmul.f32 %v2747_v26, %v2745_v2 }
 0x6af   :  { %v1765_v28 = vpack.c.bf16 %v1764_v27, %v1763_v17 }
 0x6b1   :  { %2316 = vst [vmem:[%s3547_s4 + $0x28] sm:$0xff] %v1765_v28   ;;  %1818 = vmatmul.mubr.bf16.vlgmr.msra.gmra.mrb[24].mxu0 %v1765_v28  ;;  %1861 = vmatmul.mubr.bf16.vlgmr.msra.gmra.mrb[24].mxu1 %v1765_v28 }
 0x6b2   :  { %1948 = vmatpush1.bf16.msra.mxu0 %v3309_v35  ;;  %1991 = vmatpush1.bf16.msra.mxu1 %v3312_v41 }
 0x6b3   :  { %1949 = vmatprep.subr.bf16.mxu0 %v3315_v42  ;;  %1992 = vmatprep.subr.bf16.mxu1 %v3318_v44 }
 0x6b4   :  { %1979 = vmatprep.mubr.bf16.mxu0 %v2896_v0  ;;  %2022 = vmatprep.mubr.bf16.mxu1 %v2896_v0 }
 0x6b6   :  { %1950 = vmatpush1.bf16.msra.mxu0 %v3323_v45  ;;  %1993 = vmatpush1.bf16.msra.mxu1 %v3326_v46 }
 0x6b7   :  { %1951 = vmatprep.subr.bf16.mxu0 %v3329_v47  ;;  %1994 = vmatprep.subr.bf16.mxu1 %v3332_v48 }
 0x6ba   :  { %1952 = vmatpush1.bf16.msra.mxu0 %v3335_v49  ;;  %1995 = vmatpush1.bf16.msra.mxu1 %v3338_v33 }
 0x6bb   :  { %1953 = vmatprep.subr.bf16.mxu0 %v3341_v34  ;;  %1996 = vmatprep.subr.bf16.mxu1 %v3344_v50 }
 0x6be   :  { %1954 = vmatpush1.bf16.msra.mxu0 %v3347_v51  ;;  %1997 = vmatpush1.bf16.msra.mxu1 %v3350_v53 }
 0x6bf   :  { %1955 = vmatprep.subr.bf16.mxu0 %v3353_v54  ;;  %1998 = vmatprep.subr.bf16.mxu1 %v3356_v55 }
 0x6c2   :  { %1956 = vmatpush1.bf16.msra.mxu0 %v3359_v56  ;;  %1999 = vmatpush1.bf16.msra.mxu1 %v3362_v57 }
 0x6c3   :  { %1957 = vmatprep.subr.bf16.mxu0 %v3365_v11  ;;  %2000 = vmatprep.subr.bf16.mxu1 %v3368_v20 }
 0x6c6   :  { %1958 = vmatpush1.bf16.msra.mxu0 %v3428_v8  ;;  %2001 = vmatpush1.bf16.msra.mxu1 %v3431_v31 }
 0x6c7   :  { %1959 = vmatprep.subr.bf16.mxu0 %v3434_v43  ;;  %2002 = vmatprep.subr.bf16.mxu1 %v3437_v6 }
 0x6ca   :  { %1960 = vmatpush1.bf16.msra.mxu0 %v3440_v9  ;;  %2003 = vmatpush1.bf16.msra.mxu1 %v3443_v10 }
 0x6cb   :  { %1961 = vmatprep.subr.bf16.mxu0 %v3446_v12  ;;  %2004 = vmatprep.subr.bf16.mxu1 %v3449_v14 }
 0x6ce   :  { %1962 = vmatpush1.bf16.msra.mxu0 %v3452_v19  ;;  %2005 = vmatpush1.bf16.msra.mxu1 %v3455_v52 }
 0x784   :  { %v1819_v0 = vpop.f32.mrb[24].mxu0  ;;  %v1862_v35 = vpop.f32.mrb[24].mxu1 }
 0x785   :  { %v2343_v41 = vadd.f32 %v1819_v0, %v3125_v15  ;;  %v1821_v42 = vpop.f32.mrb[25].mxu0  ;;  %v1864_v44 = vpop.f32.mrb[25].mxu1  ;;  %v2375_v56 = vadd.f32 %v1862_v35, %v3135_v61 }
 0x786   :  { %v2344_v45 = vadd.f32 %v1821_v42, %v3127_v16  ;;  %v1823_v46 = vpop.f32.mrb[26].mxu0  ;;  %v1866_v47 = vpop.f32.mrb[26].mxu1  ;;  %v2376_v55 = vadd.f32 %v1864_v44, %v3132_v32 }
 0x787   :  { %v2236_v48 = vmul.f32 -1.442695, %v2343_v41  ;;  %v2345_v49 = vadd.f32 %v1823_v46, %v3125_v15  ;;  %v1825_v33 = vpop.f32.mrb[27].mxu0  ;;  %v1868_v34 = vpop.f32.mrb[27].mxu1  ;;  %v2377_v20 = vadd.f32 %v1866_v47, %v3135_v61 }
 0x788   :  { %v2238_v50 = vmul.f32 -1.442695, %v2344_v45  ;;  %v2346_v51 = vadd.f32 %v1825_v33, %v3127_v16  ;;  %v2240_v57 = vmul.f32 -1.442695, %v2376_v55  ;;  %v2378_v11 = vadd.f32 %v1868_v34, %v3132_v32 }
 0x789   :  { %2748 = vpow2.f32 %v2236_v48  ;;  %v2237_v53 = vmul.f32 -1.442695, %v2345_v49 }
 0x78a   :  { %2750 = vpow2.f32 %v2238_v50  ;;  %v2239_v54 = vmul.f32 -1.442695, %v2346_v51  ;;  %v2241_v43 = vmul.f32 -1.442695, %v2378_v11 }
 0x78b   :  { %2752 = vpow2.f32 %v2237_v53 }
 0x78c   :  { %2754 = vpow2.f32 %v2239_v54 }
 0x78d   :  { %2756 = vtanh.f32 %v2375_v56 }
 0x78e   :  { %2758 = vpow2.f32 %v2240_v57 }
 0x78f   :  { %2760 = vtanh.f32 %v2377_v20 }
 0x793   :  { %v2749_v24 = vpop.eup %2748 }
 0x794   :  { %v2751_v8 = vpop.eup %2750  ;;  %v1885_v31 = vadd.f32 1.0, %v2749_v24 }
 0x795   :  { %v1897_v6 = vadd.f32 1.0, %v2751_v8  ;;  %v2753_v9 = vpop.eup %2752 }
 0x796   :  { %2762 = vrcp.f32 %v1885_v31  ;;  %v1886_v10 = vadd.f32 1.0, %v2753_v9  ;;  %v2755_v12 = vpop.eup %2754 }
 0x797   :  { %2764 = vrcp.f32 %v1897_v6  ;;  %v1898_v14 = vadd.f32 1.0, %v2755_v12  ;;  %v2757_v19 = vpop.eup %2756 }
 0x798   :  { %2766 = vpow2.f32 %v2241_v43  ;;  %v2759_v52 = vpop.eup %2758 }
 0x799   :  { %2768 = vrcp.f32 %v1886_v10  ;;  %v2761_v29 = vpop.eup %2760  ;;  %v1911_v37 = vadd.f32 1.0, %v2759_v52 }
 0x79a   :  { %2770 = vrcp.f32 %v1898_v14 }
 0x79b   :  { %2772 = vrcp.f32 %v1911_v37 }
 0x7a0   :  { %v2763_v30 = vpop.eup %2762 }
 0x7a1   :  { %v2765_v13 = vpop.eup %2764  ;;  %v1919_v22 = vmul.f32 %v2763_v30, %v2757_v19 }
 0x7a2   :  { %v2767_v21 = vpop.eup %2766  ;;  %v1917_v36 = vmul.f32 %v2765_v13, %v3469_v23 }
 0x7a3   :  { %v2769_v7 = vpop.eup %2768  ;;  %v1912_v59 = vadd.f32 1.0, %v2767_v21 }
 0x7a4   :  { %v3520_v38 = vadd.f32 %v1919_v22, %v1917_v36  ;;  %v1920_v39 = vmul.f32 %v2769_v7, %v2761_v29  ;;  %v2771_v40 = vpop.eup %2770 }
 0x7a5   :  { %v1918_v60 = vmul.f32 %v2771_v40, %v3473_v18  ;;  %v2773_v63 = vpop.eup %2772 }
 0x7a6   :  { %2774 = vtanh.f32 %v3520_v38 }
 0x7a7   :  { %v3524_v62 = vadd.f32 %v1920_v39, %v1918_v60  ;;  %2776 = vrcp.f32 %v1912_v59 }
 0x7a9   :  { %2778 = vtanh.f32 %v3524_v62 }
 0x7b0   :  { %v2775_v58 = vpop.eup %2774 }
 0x7b1   :  { %v2777_v23 = vpop.eup %2776  ;;  %v1925_v3 = vmul.f32 %v2775_v58, %v2773_v63 }
 0x7b3   :  { %v2779_v1 = vpop.eup %2778 }
 0x7b4   :  { %v1926_v4 = vmul.f32 %v2779_v1, %v2777_v23 }
 0x7b6   :  { %v1927_v5 = vpack.c.bf16 %v1926_v4, %v1925_v3 }
 0x7b8   :  { %2317 = vst [vmem:[%s3547_s4 + $0x30] sm:$0xff] %v1927_v5   ;;  %1980 = vmatmul.mubr.bf16.vlgmr.msra.gmra.mrb[28].mxu0 %v1927_v5  ;;  %2023 = vmatmul.mubr.bf16.vlgmr.msra.gmra.mrb[28].mxu1 %v1927_v5 }
 0x88b   :  { %v1981_v18 = vpop.f32.mrb[28].mxu0  ;;  %v2024_v25 = vpop.f32.mrb[28].mxu1 }
 0x88c   :  { %v2347_v2 = vadd.f32 %v1981_v18, %v3125_v15  ;;  %v1983_v26 = vpop.f32.mrb[29].mxu0  ;;  %v2026_v17 = vpop.f32.mrb[29].mxu1  ;;  %v2379_v33 = vadd.f32 %v2024_v25, %v3135_v61 }
 0x88d   :  { %v2348_v27 = vadd.f32 %v1983_v26, %v3127_v16  ;;  %v1985_v28 = vpop.f32.mrb[30].mxu0  ;;  %v2028_v0 = vpop.f32.mrb[30].mxu1  ;;  %v2380_v49 = vadd.f32 %v2026_v17, %v3132_v32 }
 0x88e   :  { %v2246_v35 = vmul.f32 -1.442695, %v2347_v2  ;;  %v2349_v41 = vadd.f32 %v1985_v28, %v3125_v15  ;;  %v1987_v42 = vpop.f32.mrb[31].mxu0  ;;  %v2030_v44 = vpop.f32.mrb[31].mxu1  ;;  %v2381_v15 = vadd.f32 %v2028_v0, %v3135_v61 }
 0x88f   :  { %v2248_v45 = vmul.f32 -1.442695, %v2348_v27  ;;  %v2350_v46 = vadd.f32 %v1987_v42, %v3127_v16  ;;  %v2250_v34 = vmul.f32 -1.442695, %v2380_v49  ;;  %v2382_v50 = vadd.f32 %v2030_v44, %v3132_v32 }
 0x890   :  { %2780 = vpow2.f32 %v2246_v35  ;;  %v2247_v47 = vmul.f32 -1.442695, %v2349_v41 }
 0x891   :  { %2782 = vpow2.f32 %v2248_v45  ;;  %v2249_v48 = vmul.f32 -1.442695, %v2350_v46  ;;  %v2251_v16 = vmul.f32 -1.442695, %v2382_v50 }
 0x892   :  { %2784 = vpow2.f32 %v2247_v47 }
 0x893   :  { %2786 = vpow2.f32 %v2249_v48 }
 0x894   :  { %2788 = vtanh.f32 %v2379_v33 }
 0x895   :  { %2790 = vpow2.f32 %v2250_v34 }
 0x896   :  { %2792 = vtanh.f32 %v2381_v15 }
 0x89a   :  { %v2781_v51 = vpop.eup %2780 }
 0x89b   :  { %v2783_v53 = vpop.eup %2782  ;;  %v2047_v54 = vadd.f32 1.0, %v2781_v51 }
 0x89c   :  { %v2059_v55 = vadd.f32 1.0, %v2783_v53  ;;  %v2785_v56 = vpop.eup %2784 }
 0x89d   :  { %2794 = vrcp.f32 %v2047_v54  ;;  %v2048_v57 = vadd.f32 1.0, %v2785_v56  ;;  %v2787_v11 = vpop.eup %2786 }
 0x89e   :  { %2796 = vrcp.f32 %v2059_v55  ;;  %v2060_v20 = vadd.f32 1.0, %v2787_v11  ;;  %v2789_v32 = vpop.eup %2788 }
 0x89f   :  { %2798 = vpow2.f32 %v2251_v16  ;;  %v2791_v24 = vpop.eup %2790 }
 0x8a0   :  { %2800 = vrcp.f32 %v2048_v57  ;;  %v2793_v61 = vpop.eup %2792  ;;  %v2073_v6 = vadd.f32 1.0, %v2791_v24 }
 0x8a1   :  { %2802 = vrcp.f32 %v2060_v20 }
 0x8a2   :  { %2804 = vrcp.f32 %v2073_v6 }
 0x8a7   :  { %v2795_v8 = vpop.eup %2794 }
 0x8a8   :  { %v2797_v31 = vpop.eup %2796  ;;  %v2081_v43 = vmul.f32 %v2795_v8, %v2789_v32 }
 0x8a9   :  { %v2799_v9 = vpop.eup %2798  ;;  %v2079_v10 = vmul.f32 %v2797_v31, %v3520_v38 }
 0x8aa   :  { %v2801_v12 = vpop.eup %2800  ;;  %v2074_v29 = vadd.f32 1.0, %v2799_v9 }
 0x8ab   :  { %v2083_v14 = vadd.f32 %v2081_v43, %v2079_v10  ;;  %v2082_v19 = vmul.f32 %v2801_v12, %v2793_v61  ;;  %v2803_v52 = vpop.eup %2802 }
 0x8ac   :  { %v2080_v30 = vmul.f32 %v2803_v52, %v3524_v62  ;;  %v2805_v22 = vpop.eup %2804 }
 0x8ad   :  { %2806 = vtanh.f32 %v2083_v14 }
 0x8ae   :  { %v2084_v13 = vadd.f32 %v2082_v19, %v2080_v30  ;;  %2808 = vrcp.f32 %v2074_v29 }
 0x8b0   :  { %2810 = vtanh.f32 %v2084_v13 }
 0x8b7   :  { %v2807_v21 = vpop.eup %2806 }
 0x8b8   :  { %v2087_v36 = vmul.f32 %v2807_v21, %v2805_v22  ;;  %v2809_v7 = vpop.eup %2808 }
 0x8ba   :  { %v2811_v37 = vpop.eup %2810 }
 0x8bb   :  { %v2088_v39 = vmul.f32 %v2811_v37, %v2809_v7 }
 0x8bd   :  { %v2310_v40 = vpack.c.bf16 %v2088_v39, %v2087_v36 }
 0x8bf   :  { %2318 = vst [vmem:[%s3547_s4 + $0x38] sm:$0xff] %v2310_v40  }
 0x8c0   :  { %2104 = vsyncpa [#allocation4], 1 }
 0x8c1   :  { %2105 = vsyncpa [#allocation6], 1 }

</bundles_post_ra>
